<compile_context>
chip_gen: v5e
topology: v5e:2x2
jax: 0.10.0
libtpu: 0.0.40
codegen_flags: <defaults>
</compile_context>

<pallas_src>
import jax
import jax.numpy as jnp
from jax import lax
from jax.experimental import pallas as pl
from jax.experimental.pallas import tpu as pltpu

BN_EPS = 1e-5   # PyTorch BatchNorm2d default
GN_EPS = 1e-6   # taming-style GroupNorm eps


def _ceil_to(n, m):
    return ((n + m - 1) // m) * m


def _tile_bytes(shape, itemsize):
    """Bytes a VMEM tile of `shape` really occupies (lane dim -> 128, sublane -> 8/16/32)."""
    s = list(shape)
    if len(s) >= 1:
        s[-1] = _ceil_to(s[-1], 128)
    if len(s) >= 2:
        sub = {4: 8, 2: 16, 1: 32}.get(itemsize, 8)
        s[-2] = _ceil_to(s[-2], sub)
    n = 1
    for d in s:
        n *= d
    return n * itemsize


def _tpu_vmem_capacity():
    try:
        return int(pltpu.get_tpu_info().vmem_capacity_bytes)
    except Exception:
        return 128 << 20          # assume v5e/v6e-class if the query is unavailable


def _pick_kv_chunk(hw, max_chunk=512):
    if hw <= max_chunk:
        return hw
    for c in (512, 384, 256, 128):
        if c <= max_chunk and hw % c == 0:
            return c
    for c in range(max_chunk, 0, -1):
        if hw % c == 0:
            return c
    return hw


def conv_block_with_attention(x_nchw, p, *, norm=True, approx_recip=True):
    """x_nchw: (B, Cin, H, W) float32, params dict p. Returns (B, Cout, H, W)."""
    B, Cin, H, W = x_nchw.shape
    K = p["wconv"].shape[0]                 # wconv stored as (K, K, Cin, Cout)
    Cout = p["wconv"].shape[3]
    pad = K // 2
    HW = H * W
    KKC = K * K * Cin
    KKCp = _ceil_to(KKC, 128)               # lane-aligned patches tile

    # ---- im2col in the wrapper: the KxK conv becomes one MXU matmul per step.
    # TODO(synk): for HBM-bound v5e configs an in-kernel K^2 shifted-matmul conv
    # would avoid im2col's K^2 read amplification.
    x = jnp.transpose(x_nchw, (0, 2, 3, 1)).astype(jnp.bfloat16)      # NHWC bf16
    xpad = jnp.pad(x, ((0, 0), (pad, pad), (pad, pad), (0, 0)))
    cols = [xpad[:, ky:ky + H, kx:kx + W, :] for ky in range(K) for kx in range(K)]
    patches = jnp.concatenate(cols, axis=-1).reshape(B, HW, KKC)
    if KKCp != KKC:
        patches = jnp.pad(patches, ((0, 0), (0, 0), (0, KKCp - KKC)))

    wconv2d = p["wconv"].reshape(KKC, Cout).astype(jnp.float32)
    if KKCp != KKC:
        wconv2d = jnp.pad(wconv2d, ((0, KKCp - KKC), (0, 0)))
    wconv2d = wconv2d.astype(jnp.bfloat16)

    # ---- fold conv bias + BatchNorm(eval) into one per-channel scale/shift.
    if norm:
        cscale = p["bn_gamma"] / jnp.sqrt(p["bn_var"] + BN_EPS)
        cshift = p["bn_beta"] + (p["bconv"] - p["bn_mean"]) * cscale
    else:
        cscale = jnp.ones((Cout,), jnp.float32)
        cshift = p["bconv"]
    # TODO(synk): Dropout is eval-mode identity; train-mode RNG masking is not emitted.

    # ---- fold GroupNorm affine and the C^-0.5 logit scale into q/k/v; fuse q|k|v.
    gam, bet = p["gn_gamma"], p["gn_beta"]
    s = float(Cout) ** -0.5
    wq_f = (gam[:, None] * p["wq"]) * s
    bq_f = (bet @ p["wq"] + p["bq"]) * s
    wk_f = gam[:, None] * p["wk"]
    bk_f = bet @ p["wk"] + p["bk"]
    wv_f = gam[:, None] * p["wv"]
    bv_f = bet @ p["wv"] + p["bv"]
    wqkv = jnp.concatenate([wq_f, wk_f, wv_f], axis=1).astype(jnp.bfloat16)   # (C, 3C)
    bqkv = jnp.concatenate([bq_f, bk_f, bv_f])[None, :].astype(jnp.float32)   # (1, 3C)
    wp = p["wp"].astype(jnp.bfloat16)                                         # (C, C)
    rows = jnp.stack([cscale, cshift, p["bp"]]).astype(jnp.float32)           # (3, C)

    # GroupNorm group structure.
    G = min(32, Cout)
    assert Cout % G == 0, "GroupNorm requires channels divisible by num_groups"
    cg = Cout // G

    # ---- attention KV tiling & output layout decisions.
    kv_chunk = _pick_kv_chunk(HW)
    num_chunks = HW // kv_chunk
    transpose_out = (Cout < 128) and (HW % 128 == 0)   # lane-dense store, free NCHW

    # ---- generation-aware sizing.
    phys_vmem = _tpu_vmem_capacity()
    if phys_vmem <= (96 << 20):          # v7x-class: 64 MiB / TensorCore, 2 TCs
        budget = min(phys_vmem - (12 << 20), 48 << 20)
        target_rows = 1024
        prefer_even_grid = True
    else:                                # v5e / v6e: 128 MiB VMEM, single TensorCore
        budget = 96 << 20
        target_rows = 4096
        prefer_even_grid = False

    def vmem_estimate(bt):
        R8 = _ceil_to(bt * HW, 8)
        R16 = _ceil_to(bt * HW, 16)
        cpad = _ceil_to(Cout, 128)
        c3pad = _ceil_to(3 * Cout, 128)
        kcpad = _ceil_to(kv_chunk, 128)
        out_blk = (bt, Cout, HW) if transpose_out else (bt, HW, Cout)
        io = 2 * (_tile_bytes((bt, HW, KKCp), 2) + _tile_bytes(out_blk, 4))
        wts = 2 * (_tile_bytes((KKCp, Cout), 2) + _tile_bytes((Cout, 3 * Cout), 2)
                   + _tile_bytes((Cout, Cout), 2) + _tile_bytes((3, Cout), 4)
                   + _tile_bytes((1, 3 * Cout), 4))
        interm = (6 * R8 * cpad * 4              # f32 (R, C)-shaped temporaries
                  + R8 * c3pad * 4               # fused q|k|v projection output
                  + 4 * R16 * cpad * 2           # bf16 copies (hz, q, k, v)
                  + bt * _ceil_to(HW, 8) * kcpad * 4      # score chunk (f32)
                  + bt * _ceil_to(HW, 16) * kcpad * 2     # exp chunk (bf16)
                  + 3 * bt * _ceil_to(HW, 8) * 128 * 4)   # m, l, 1/l
        return io + wts + interm

    def pick_bt():
        bt = max(1, min(B, max(1, target_rows // max(HW, 1))))
        while B % bt:
            bt -= 1
        while bt > 1 and vmem_estimate(bt) > budget:
            bt -= 1
            while B % bt:
                bt -= 1
        if prefer_even_grid and bt > 1 and bt % 2 == 0 and (B // bt) % 2 == 1:
            bt //= 2                     # only worth it with 2 TensorCores (v7x)
        return bt

    Bt = pick_bt()
    grid = (B // Bt,)
    vmem_limit = int(min(budget, max(vmem_estimate(Bt) + (8 << 20), 32 << 20)))

    R = Bt * HW
    inv_n = 1.0 / float(HW * cg)
    out_block = (Bt, Cout, HW) if transpose_out else (Bt, HW, Cout)
    out_shape = (B, Cout, HW) if transpose_out else (B, HW, Cout)

    def kernel(patches_ref, wconv_ref, wqkv_ref, wp_ref, rows_ref, bqkv_ref, out_ref):
        rows_v = rows_ref[...]
        cscale_r = rows_v[0:1, :]
        cshift_r = rows_v[1:2, :]
        bp_r = rows_v[2:3, :]

        # ---- Conv via im2col: one bf16 MXU matmul, f32 accumulation ------
        p2d = patches_ref[...].reshape(R, KKCp)
        acc = jnp.dot(p2d, wconv_ref[...], preferred_element_type=jnp.float32)

        # ---- conv bias + BatchNorm(eval) folded into scale/shift, then ReLU
        h0 = jnp.maximum(acc * cscale_r + cshift_r, 0.0)     # (R, C) f32
        h0b = h0.reshape(Bt, HW, Cout)

        # ---- GroupNorm statistics (two-pass; VPU/XLU reductions only) ----
        if cg == 1:
            group_bc = lambda t: t                           # per-channel groups
        else:
            def group_bc(t):                                 # (Bt, C) -> group-sum bcast
                tg = jnp.sum(t.reshape(Bt, G, cg), axis=-1, keepdims=True)
                return jnp.broadcast_to(tg, (Bt, G, cg)).reshape(Bt, Cout)

        csum = jnp.sum(h0b, axis=1)                          # (Bt, C)
        mean_c = group_bc(csum) * inv_n
        d = h0b - mean_c[:, None, :]
        dsq = jnp.sum(d * d, axis=1)                         # (Bt, C)
        rstd_c = lax.rsqrt(group_bc(dsq) * inv_n + GN_EPS)
        hz = (d * rstd_c[:, None, :]).reshape(R, Cout)       # normalized (affine folded)

        # Park the residual in out_ref now so no extra (R, C) f32 slab stays
        # live across the attention phase.
        if transpose_out:
            out_ref[...] = jnp.transpose(h0b, (0, 2, 1)).astype(out_ref.dtype)
        else:
            out_ref[...] = h0b.astype(out_ref.dtype)

        # ---- fused q|k|v projection: one (R,C)x(C,3C) MXU matmul ---------
        hz_b = hz.astype(jnp.bfloat16)
        qkv = jnp.dot(hz_b, wqkv_ref[...],
                      preferred_element_type=jnp.float32) + bqkv_ref[...]   # (R, 3C)
        qb = qkv[:, :Cout].reshape(Bt, HW, Cout).astype(jnp.bfloat16)
        kb = qkv[:, Cout:2 * Cout].reshape(Bt, HW, Cout).astype(jnp.bfloat16)
        vb = qkv[:, 2 * Cout:].reshape(Bt, HW, Cout).astype(jnp.bfloat16)

        # ---- flash-style attention over KV chunks (online softmax) -------
        # (HW, HW) scores are never materialized; working set is (HW, kv_chunk).
        kc = kb[:, :kv_chunk, :]
        vc = vb[:, :kv_chunk, :]
        sc = jnp.einsum('bqc,bkc->bqk', qb, kc, preferred_element_type=jnp.float32)
        m_i = jnp.max(sc, axis=-1, keepdims=True)
        e = jnp.exp(sc - m_i)
        l_i = jnp.sum(e, axis=-1, keepdims=True)
        acc_o = jnp.einsum('bqk,bkc->bqc', e.astype(jnp.bfloat16), vc,
                           preferred_element_type=jnp.float32)
        for ci in range(1, num_chunks):          # static, unrolled KV loop
            j0 = ci * kv_chunk
            kc = kb[:, j0:j0 + kv_chunk, :]
            vc = vb[:, j0:j0 + kv_chunk, :]
            sc = jnp.einsum('bqc,bkc->bqk', qb, kc,
                            preferred_element_type=jnp.float32)
            m_new = jnp.maximum(m_i, jnp.max(sc, axis=-1, keepdims=True))
            alpha = jnp.exp(m_i - m_new)
            e = jnp.exp(sc - m_new)
            l_i = alpha * l_i + jnp.sum(e, axis=-1, keepdims=True)
            acc_o = alpha * acc_o + jnp.einsum('bqk,bkc->bqc', e.astype(jnp.bfloat16),
                                               vc, preferred_element_type=jnp.float32)
            m_i = m_new

        if approx_recip:
            o = acc_o * pl.reciprocal(l_i, approx=True)      # deferred softmax norm
        else:
            o = acc_o / l_i

        # ---- proj_out + residual (residual already parked in out_ref) ----
        o2 = jnp.dot(o.reshape(R, Cout).astype(jnp.bfloat16), wp_ref[...],
                     preferred_element_type=jnp.float32) + bp_r
        o2b = o2.reshape(Bt, HW, Cout)
        if transpose_out:
            out_ref[...] = out_ref[...] + jnp.transpose(o2b, (0, 2, 1)).astype(out_ref.dtype)
        else:
            out_ref[...] = out_ref[...] + o2b.astype(out_ref.dtype)

    def _full(shape):
        nd = len(shape)
        return pl.BlockSpec(shape, lambda b, _nd=nd: (0,) * _nd)

    out = pl.pallas_call(
        kernel,
        out_shape=jax.ShapeDtypeStruct(out_shape, jnp.float32),
        grid=grid,
        in_specs=[
            pl.BlockSpec((Bt, HW, KKCp), lambda b: (b, 0, 0)),   # im2col patches
            _full((KKCp, Cout)),                                 # conv weight (2D)
            _full((Cout, 3 * Cout)),                             # fused Wq|Wk|Wv
            _full((Cout, Cout)),                                 # proj_out weight
            _full((3, Cout)),                                    # cscale, cshift, bp
            _full((1, 3 * Cout)),                                # fused q|k|v biases
        ],
        out_specs=pl.BlockSpec(out_block, lambda b: (b, 0, 0)),
        compiler_params=pltpu.CompilerParams(
            dimension_semantics=("parallel",),
            vmem_limit_bytes=vmem_limit),
    )(patches, wconv2d, wqkv, wp, rows, bqkv)

    if transpose_out:
        return out.reshape(B, Cout, H, W)                    # already NCHW-ordered
    out = out.reshape(B, H, W, Cout)
    return jnp.transpose(out, (0, 3, 1, 2))


def ref_forward(x_nchw, p, *, norm=True):
    """Pure-JAX f32 reference of the same forward pass (for verification)."""
    x = jnp.transpose(x_nchw, (0, 2, 3, 1)).astype(jnp.float32)
    y = lax.conv_general_dilated(
        x, p["wconv"], (1, 1), "SAME",
        dimension_numbers=("NHWC", "HWIO", "NHWC")) + p["bconv"]
    if norm:
        y = (y - p["bn_mean"]) / jnp.sqrt(p["bn_var"] + BN_EPS) * p["bn_gamma"] + p["bn_beta"]
    y = jnp.maximum(y, 0.0)
    B, H, W, C = y.shape
    h0 = y.reshape(B, H * W, C)
    G = min(32, C)
    cg = C // G
    hg = h0.reshape(B, H * W, G, cg)
    mean = hg.mean(axis=(1, 3), keepdims=True)
    var = ((hg - mean) ** 2).mean(axis=(1, 3), keepdims=True)
    hn = ((hg - mean) / jnp.sqrt(var + GN_EPS)).reshape(B, H * W, C)
    hn = hn * p["gn_gamma"] + p["gn_beta"]
    q = hn @ p["wq"] + p["bq"]
    k = hn @ p["wk"] + p["bk"]
    v = hn @ p["wv"] + p["bv"]
    logits = jnp.einsum("bic,bjc->bij", q, k) * (C ** -0.5)
    attn = jax.nn.softmax(logits, axis=-1)
    o = jnp.einsum("bij,bjc->bic", attn, v)
    o = o @ p["wp"] + p["bp"]
    out = (h0 + o).reshape(B, H, W, C)
    return jnp.transpose(out, (0, 3, 1, 2))


if __name__ == "__main__":
    B, Cin, Cout, H, W, K = 2, 4, 32, 16, 16, 3
    keys = jax.random.split(jax.random.PRNGKey(0), 12)

    params = {
        "wconv": 0.1 * jax.random.normal(keys[0], (K, K, Cin, Cout), jnp.float32),
        "bconv": 0.1 * jax.random.normal(keys[1], (Cout,), jnp.float32),
        # BatchNorm (eval mode): deterministic, slightly non-trivial stats
        "bn_gamma": 1.0 + 0.05 * jax.random.normal(keys[2], (Cout,), jnp.float32),
        "bn_beta": 0.05 * jax.random.normal(keys[3], (Cout,), jnp.float32),
        "bn_mean": 0.1 * jax.random.normal(keys[4], (Cout,), jnp.float32),
        "bn_var": 1.0 + 0.1 * jnp.abs(jax.random.normal(keys[5], (Cout,), jnp.float32)),
        # GroupNorm affine
        "gn_gamma": jnp.ones((Cout,), jnp.float32),
        "gn_beta": jnp.zeros((Cout,), jnp.float32),
        # attention 1x1 convs
        "wq": 0.1 * jax.random.normal(keys[6], (Cout, Cout), jnp.float32),
        "bq": 0.05 * jax.random.normal(keys[7], (Cout,), jnp.float32),
        "wk": 0.1 * jax.random.normal(keys[8], (Cout, Cout), jnp.float32),
        "bk": 0.05 * jax.random.normal(keys[9], (Cout,), jnp.float32),
        "wv": 0.1 * jax.random.normal(keys[10], (Cout, Cout), jnp.float32),
        "bv": jnp.zeros((Cout,), jnp.float32),
        "wp": 0.1 * jax.random.normal(keys[11], (Cout, Cout), jnp.float32),
        "bp": jnp.zeros((Cout,), jnp.float32),
    }

    x = jax.random.normal(jax.random.PRNGKey(1), (B, Cin, H, W), jnp.float32)

    out = jax.block_until_ready(conv_block_with_attention(x, params))
    ref = ref_forward(x, params)

    assert out.shape == (B, Cout, H, W), out.shape
    err = float(jnp.max(jnp.abs(out - ref)))
    # bf16 MXU operands (f32 accumulation) => ~1e-2-scale deviations vs the pure-f32 reference.
    if err > 5e-2:
        raise SystemExit(f"mismatch vs reference: max abs err = {err}")
    print("KERNEL_OK")
</pallas_src>

<mosaic_0001>
module attributes {stable_mosaic.version = 11 : i64} {
  func.func @kernel(%arg0: i32, %arg1: memref<2x256x128xbf16, #tpu.memory_space<vmem>>, %arg2: memref<128x32xbf16, #tpu.memory_space<vmem>>, %arg3: memref<32x96xbf16, #tpu.memory_space<vmem>>, %arg4: memref<32x32xbf16, #tpu.memory_space<vmem>>, %arg5: memref<3x32xf32, #tpu.memory_space<vmem>>, %arg6: memref<1x96xf32, #tpu.memory_space<vmem>>, %arg7: memref<2x32x256xf32, #tpu.memory_space<vmem>>) attributes {dimension_semantics = [#tpu.dimension_semantics<parallel>], iteration_bounds = array<i64: 1>, scalar_prefetch = 0 : i64, scratch_operands = 0 : i64, tpu.core_type = #tpu.core_type<tc>, window_params = [{transform_indices = @transform_0, window_bounds = array<i64: 2, 256, 128>}, {pipeline_mode = #tpu.pipeline_mode<synchronous>, transform_indices = @transform_1, window_bounds = array<i64: 128, 32>}, {pipeline_mode = #tpu.pipeline_mode<synchronous>, transform_indices = @transform_2, window_bounds = array<i64: 32, 96>}, {pipeline_mode = #tpu.pipeline_mode<synchronous>, transform_indices = @transform_3, window_bounds = array<i64: 32, 32>}, {pipeline_mode = #tpu.pipeline_mode<synchronous>, transform_indices = @transform_4, window_bounds = array<i64: 3, 32>}, {pipeline_mode = #tpu.pipeline_mode<synchronous>, transform_indices = @transform_5, window_bounds = array<i64: 1, 96>}, {transform_indices = @transform_6, window_bounds = array<i64: 2, 32, 256>}]} {
    %c0 = arith.constant 0 : index
    %c0_0 = arith.constant 0 : index
    %0 = vector.load %arg5[%c0, %c0_0] : memref<3x32xf32, #tpu.memory_space<vmem>>, vector<3x32xf32>
    %1 = vector.extract_strided_slice %0 {offsets = [0, 0], sizes = [1, 32], strides = [1, 1]} : vector<3x32xf32> to vector<1x32xf32>
    %2 = vector.extract_strided_slice %0 {offsets = [1, 0], sizes = [1, 32], strides = [1, 1]} : vector<3x32xf32> to vector<1x32xf32>
    %3 = vector.extract_strided_slice %0 {offsets = [2, 0], sizes = [1, 32], strides = [1, 1]} : vector<3x32xf32> to vector<1x32xf32>
    %c0_1 = arith.constant 0 : index
    %c0_2 = arith.constant 0 : index
    %c0_3 = arith.constant 0 : index
    %4 = vector.load %arg1[%c0_1, %c0_2, %c0_3] : memref<2x256x128xbf16, #tpu.memory_space<vmem>>, vector<2x256x128xbf16>
    %5 = vector.shape_cast %4 : vector<2x256x128xbf16> to vector<512x128xbf16>
    %c0_4 = arith.constant 0 : index
    %c0_5 = arith.constant 0 : index
    %6 = vector.load %arg2[%c0_4, %c0_5] : memref<128x32xbf16, #tpu.memory_space<vmem>>, vector<128x32xbf16>
    %cst = arith.constant dense<0.000000e+00> : vector<512x32xf32>
    %7 = tpu.matmul %5, %6, %cst {dimension_numbers = #tpu.dot_dimension_numbers<[1], [0], [0], [1], [0, 0, 1, 1], [], []>} : vector<512x128xbf16>, vector<128x32xbf16>, vector<512x32xf32> -> vector<512x32xf32>
    %8 = vector.broadcast %1 : vector<1x32xf32> to vector<512x32xf32>
    %9 = arith.mulf %7, %8 : vector<512x32xf32>
    %10 = vector.broadcast %2 : vector<1x32xf32> to vector<512x32xf32>
    %11 = arith.addf %9, %10 : vector<512x32xf32>
    %cst_6 = arith.constant 0.000000e+00 : f32
    %12 = vector.broadcast %cst_6 : f32 to vector<512x32xf32>
    %13 = arith.maximumf %11, %12 : vector<512x32xf32>
    %14 = vector.shape_cast %13 : vector<512x32xf32> to vector<2x256x32xf32>
    %cst_7 = arith.constant dense<0.000000e+00> : vector<2x32xf32>
    %15 = vector.multi_reduction <add>, %14, %cst_7 [1] : vector<2x256x32xf32> to vector<2x32xf32>
    %cst_8 = arith.constant 3.906250e-03 : f32
    %16 = vector.broadcast %cst_8 : f32 to vector<2x32xf32>
    %17 = arith.mulf %15, %16 : vector<2x32xf32>
    %18 = vector.shape_cast %17 : vector<2x32xf32> to vector<2x1x32xf32>
    %19 = vector.broadcast %18 : vector<2x1x32xf32> to vector<2x256x32xf32>
    %20 = arith.subf %14, %19 : vector<2x256x32xf32>
    %21 = arith.mulf %20, %20 : vector<2x256x32xf32>
    %cst_9 = arith.constant dense<0.000000e+00> : vector<2x32xf32>
    %22 = vector.multi_reduction <add>, %21, %cst_9 [1] : vector<2x256x32xf32> to vector<2x32xf32>
    %cst_10 = arith.constant 3.906250e-03 : f32
    %23 = vector.broadcast %cst_10 : f32 to vector<2x32xf32>
    %24 = arith.mulf %22, %23 : vector<2x32xf32>
    %cst_11 = arith.constant 9.99999997E-7 : f32
    %25 = vector.broadcast %cst_11 : f32 to vector<2x32xf32>
    %26 = arith.addf %24, %25 : vector<2x32xf32>
    %27 = math.rsqrt %26 : vector<2x32xf32>
    %28 = vector.shape_cast %27 : vector<2x32xf32> to vector<2x1x32xf32>
    %29 = vector.broadcast %28 : vector<2x1x32xf32> to vector<2x256x32xf32>
    %30 = arith.mulf %20, %29 : vector<2x256x32xf32>
    %31 = vector.shape_cast %30 : vector<2x256x32xf32> to vector<512x32xf32>
    %32 = tpu.transpose %14, [0, 2, 1] : vector<2x256x32xf32> -> vector<2x32x256xf32>
    %c0_12 = arith.constant 0 : index
    %c0_13 = arith.constant 0 : index
    %c0_14 = arith.constant 0 : index
    %33 = vector.load %arg7[%c0_12, %c0_13, %c0_14] : memref<2x32x256xf32, #tpu.memory_space<vmem>>, vector<2x32x256xf32>
    tpu.vector_store %arg7[%c0_12, %c0_13, %c0_14], %32 {strides = array<i32>} : memref<2x32x256xf32, #tpu.memory_space<vmem>>, vector<2x32x256xf32>,
    %34 = arith.truncf %31 : vector<512x32xf32> to vector<512x32xbf16>
    %c0_15 = arith.constant 0 : index
    %c0_16 = arith.constant 0 : index
    %35 = vector.load %arg3[%c0_15, %c0_16] : memref<32x96xbf16, #tpu.memory_space<vmem>>, vector<32x96xbf16>
    %cst_17 = arith.constant dense<0.000000e+00> : vector<512x96xf32>
    %36 = tpu.matmul %34, %35, %cst_17 {dimension_numbers = #tpu.dot_dimension_numbers<[1], [0], [0], [1], [0, 0, 1, 1], [], []>} : vector<512x32xbf16>, vector<32x96xbf16>, vector<512x96xf32> -> vector<512x96xf32>
    %c0_18 = arith.constant 0 : index
    %c0_19 = arith.constant 0 : index
    %37 = vector.load %arg6[%c0_18, %c0_19] : memref<1x96xf32, #tpu.memory_space<vmem>>, vector<1x96xf32>
    %38 = vector.broadcast %37 : vector<1x96xf32> to vector<512x96xf32>
    %39 = arith.addf %36, %38 : vector<512x96xf32>
    %40 = vector.extract_strided_slice %39 {offsets = [0, 0], sizes = [512, 32], strides = [1, 1]} : vector<512x96xf32> to vector<512x32xf32>
    %41 = vector.shape_cast %40 : vector<512x32xf32> to vector<2x256x32xf32>
    %42 = arith.truncf %41 : vector<2x256x32xf32> to vector<2x256x32xbf16>
    %43 = vector.extract_strided_slice %39 {offsets = [0, 32], sizes = [512, 32], strides = [1, 1]} : vector<512x96xf32> to vector<512x32xf32>
    %44 = vector.shape_cast %43 : vector<512x32xf32> to vector<2x256x32xf32>
    %45 = arith.truncf %44 : vector<2x256x32xf32> to vector<2x256x32xbf16>
    %46 = vector.extract_strided_slice %39 {offsets = [0, 64], sizes = [512, 32], strides = [1, 1]} : vector<512x96xf32> to vector<512x32xf32>
    %47 = vector.shape_cast %46 : vector<512x32xf32> to vector<2x256x32xf32>
    %48 = arith.truncf %47 : vector<2x256x32xf32> to vector<2x256x32xbf16>
    "tpu.trace_start"() <{level = 10 : i32, message = "bqc,bkc->bqk"}> : () -> ()
    %cst_20 = arith.constant dense<0.000000e+00> : vector<2x256x256xf32>
    %49 = tpu.matmul %42, %45, %cst_20 {dimension_numbers = #tpu.dot_dimension_numbers<[2], [2], [1], [1], [0, 0, 0, 1, 1, 1], [0], [0]>} : vector<2x256x32xbf16>, vector<2x256x32xbf16>, vector<2x256x256xf32> -> vector<2x256x256xf32>
    "tpu.trace_stop"() : () -> ()
    %cst_21 = arith.constant dense<0xFF800000> : vector<2x256xf32>
    %50 = vector.multi_reduction <maximumf>, %49, %cst_21 [2] : vector<2x256x256xf32> to vector<2x256xf32>
    %51 = vector.shape_cast %50 : vector<2x256xf32> to vector<2x256x1xf32>
    %52 = vector.broadcast %51 : vector<2x256x1xf32> to vector<2x256x256xf32>
    %53 = arith.subf %49, %52 : vector<2x256x256xf32>
    %54 = math.exp %53 : vector<2x256x256xf32>
    %cst_22 = arith.constant dense<0.000000e+00> : vector<2x256xf32>
    %55 = vector.multi_reduction <add>, %54, %cst_22 [2] : vector<2x256x256xf32> to vector<2x256xf32>
    %56 = vector.shape_cast %55 : vector<2x256xf32> to vector<2x256x1xf32>
    %57 = arith.truncf %54 : vector<2x256x256xf32> to vector<2x256x256xbf16>
    "tpu.trace_start"() <{level = 10 : i32, message = "bqk,bkc->bqc"}> : () -> ()
    %cst_23 = arith.constant dense<0.000000e+00> : vector<2x256x32xf32>
    %58 = tpu.matmul %57, %48, %cst_23 {dimension_numbers = #tpu.dot_dimension_numbers<[2], [1], [1], [2], [0, 0, 0, 1, 1, 2], [0], [0]>} : vector<2x256x256xbf16>, vector<2x256x32xbf16>, vector<2x256x32xf32> -> vector<2x256x32xf32>
    "tpu.trace_stop"() : () -> ()
    %59 = tpu.reciprocal %56 {approx = true} : vector<2x256x1xf32> -> vector<2x256x1xf32>
    %60 = vector.broadcast %59 : vector<2x256x1xf32> to vector<2x256x32xf32>
    %61 = arith.mulf %58, %60 : vector<2x256x32xf32>
    %62 = vector.shape_cast %61 : vector<2x256x32xf32> to vector<512x32xf32>
    %63 = arith.truncf %62 : vector<512x32xf32> to vector<512x32xbf16>
    %c0_24 = arith.constant 0 : index
    %c0_25 = arith.constant 0 : index
    %64 = vector.load %arg4[%c0_24, %c0_25] : memref<32x32xbf16, #tpu.memory_space<vmem>>, vector<32x32xbf16>
    %cst_26 = arith.constant dense<0.000000e+00> : vector<512x32xf32>
    %65 = tpu.matmul %63, %64, %cst_26 {dimension_numbers = #tpu.dot_dimension_numbers<[1], [0], [0], [1], [0, 0, 1, 1], [], []>} : vector<512x32xbf16>, vector<32x32xbf16>, vector<512x32xf32> -> vector<512x32xf32>
    %66 = vector.broadcast %3 : vector<1x32xf32> to vector<512x32xf32>
    %67 = arith.addf %65, %66 : vector<512x32xf32>
    %68 = vector.shape_cast %67 : vector<512x32xf32> to vector<2x256x32xf32>
    %c0_27 = arith.constant 0 : index
    %c0_28 = arith.constant 0 : index
    %c0_29 = arith.constant 0 : index
    %69 = vector.load %arg7[%c0_27, %c0_28, %c0_29] : memref<2x32x256xf32, #tpu.memory_space<vmem>>, vector<2x32x256xf32>
    %70 = tpu.transpose %68, [0, 2, 1] : vector<2x256x32xf32> -> vector<2x32x256xf32>
    %71 = arith.addf %69, %70 : vector<2x32x256xf32>
    %c0_30 = arith.constant 0 : index
    %c0_31 = arith.constant 0 : index
    %c0_32 = arith.constant 0 : index
    %72 = vector.load %arg7[%c0_30, %c0_31, %c0_32] : memref<2x32x256xf32, #tpu.memory_space<vmem>>, vector<2x32x256xf32>
    tpu.vector_store %arg7[%c0_30, %c0_31, %c0_32], %71 {strides = array<i32>} : memref<2x32x256xf32, #tpu.memory_space<vmem>>, vector<2x32x256xf32>,
    return
  }
  func.func @transform_0(%arg0: i32) -> (i32, i32, i32) {
    %c0_i32 = arith.constant 0 : i32
    %c0_i32_0 = arith.constant 0 : i32
    %c0_i32_1 = arith.constant 0 : i32
    return %arg0, %c0_i32, %c0_i32_0 : i32, i32, i32
  }
  func.func @transform_1(%arg0: i32) -> (i32, i32) {
    %c0_i32 = arith.constant 0 : i32
    %c0_i32_0 = arith.constant 0 : i32
    %c0_i32_1 = arith.constant 0 : i32
    return %c0_i32, %c0_i32_0 : i32, i32
  }
  func.func @transform_2(%arg0: i32) -> (i32, i32) {
    %c0_i32 = arith.constant 0 : i32
    %c0_i32_0 = arith.constant 0 : i32
    %c0_i32_1 = arith.constant 0 : i32
    return %c0_i32, %c0_i32_0 : i32, i32
  }
  func.func @transform_3(%arg0: i32) -> (i32, i32) {
    %c0_i32 = arith.constant 0 : i32
    %c0_i32_0 = arith.constant 0 : i32
    %c0_i32_1 = arith.constant 0 : i32
    return %c0_i32, %c0_i32_0 : i32, i32
  }
  func.func @transform_4(%arg0: i32) -> (i32, i32) {
    %c0_i32 = arith.constant 0 : i32
    %c0_i32_0 = arith.constant 0 : i32
    %c0_i32_1 = arith.constant 0 : i32
    return %c0_i32, %c0_i32_0 : i32, i32
  }
  func.func @transform_5(%arg0: i32) -> (i32, i32) {
    %c0_i32 = arith.constant 0 : i32
    %c0_i32_0 = arith.constant 0 : i32
    %c0_i32_1 = arith.constant 0 : i32
    return %c0_i32, %c0_i32_0 : i32, i32
  }
  func.func @transform_6(%arg0: i32) -> (i32, i32, i32) {
    %c0_i32 = arith.constant 0 : i32
    %c0_i32_0 = arith.constant 0 : i32
    %c0_i32_1 = arith.constant 0 : i32
    return %arg0, %c0_i32, %c0_i32_0 : i32, i32, i32
  }
}

</mosaic_0001>

<bundles_post_ra>
// kernel: tpu_custom_call.1
= control target key start
LH: loop header
LB: loop body
LE: loop exit
PB: predicated region body
PF: predicated region fallthrough
CT: control target
= control target key end

     0   :  { %11 = vsyncpa [#allocation3], 0  ;;  %s8817_s0 = inlined_call_operand.hbm [shape: bf16[2,256,128], index: 0, kind: input, shape index: {}]   ;;  %s8818_s1 = inlined_call_operand.vmem [shape: bf16[128,32], index: 1, kind: input, shape index: {}]   ;;  %s8819_s2 = inlined_call_operand.vmem [shape: bf16[32,96], index: 2, kind: input, shape index: {}]   ;;  %s8820_s3 = inlined_call_operand.vmem [shape: bf16[32,32], index: 3, kind: input, shape index: {}]   ;;  %s8821_s4 = inlined_call_operand.vmem [shape: f32[3,32], index: 4, kind: input, shape index: {}]   ;;  %s8822_s5 = inlined_call_operand.vmem [shape: f32[1,96], index: 5, kind: input, shape index: {}]   ;;  %s8823_s6 = inlined_call_operand.hbm [shape: f32[2,32,256], index: 6, kind: output, shape index: {}]  }
   0x1   :  { %12 = vsyncpa [#allocation4], 0  ;;  %s17_s23 = sshll.u32 %s8817_s0, 4  ;;  %s5574_s24 = smov [#allocation2]   ;;  %s18_s23 = int_to_ptr.hbm [resolvable:$true] %s17_s23 }
   0x2   :  { %s19_s25 = sshll.u32 %s5574_s24, 4  ;;  %s5575_s26 = smov 64   ;;  %s20_s25 = int_to_ptr.vmem [resolvable:$true] %s19_s25 }
   0x3   :  { %s5576_s27 = smov 4  }
   0x4   :  { %25 = dma.hbm_to_vmem [thread:$0]  %s18_s23, 4096, %s20_s25, [#allocation3], %s5575_s26, %s5575_s26, %s5576_s27  }
   0x5   :  { %5570 = dma.done.wait [#allocation3], 4096  }
   0x6   :  { %5571 = vsyncadd [#allocation3], 4294963200  ;;  %v5101_v0 = vld [vmem:[%s8818_s1 + $0x38] sm:$0xff]  ;;  %v5100_v1 = vld [vmem:[%s8818_s1 + $0x30] sm:$0xff]  ;;  %vm725_vm0 = vcmask 261120   ;;  %s5577_s25 = smov 96  }
   0x7   :  { %362 = vmatpush.bf16.msra.mxu0 %v5101_v0  ;;  %5106 = vmatpush.bf16.msra.mxu3 %v5101_v0  ;;  %v5099_v2 = vld [vmem:[%s8818_s1 + $0x28] sm:$0xff]  ;;  %v5098_v3 = vld [vmem:[%s8818_s1 + $0x20] sm:$0xff]  ;;  %v5097_v4 = vld [vmem:[%s8818_s1 + $0x18] sm:$0xff]  ;;  %s4745_s10 = sshll.u32 %s8823_s6, 4  ;;  %s5579_s11 = smov 256   ;;  %s4746_s10 = int_to_ptr.hbm [resolvable:$true] %s4745_s10 }
   0x8   :  { %v5096_v5 = vld [vmem:[%s8818_s1 + $0x10] sm:$0xff]  ;;  %v5095_v6 = vld [vmem:[%s8818_s1 + $0x8] sm:$0xff]  ;;  %v5094_v7 = vld [vmem:[%s8818_s1] sm:$0xff]  ;;  %s5580_s12 = smov 16  }
   0x9   :  { %v5062_v8 = vld [vmem:[#allocation2] sm:$0xff]  ;;  %v5063_v9 = vld [vmem:[#allocation2 + $0x8] sm:$0xff]  ;;  %v5064_v10 = vld [vmem:[#allocation2 + $0x10] sm:$0xff] }
   0xa   :  { %v5065_v11 = vld [vmem:[#allocation2 + $0x18] sm:$0xff]  ;;  %v5066_v12 = vld [vmem:[#allocation2 + $0x20] sm:$0xff]  ;;  %v5067_v13 = vld [vmem:[#allocation2 + $0x28] sm:$0xff] }
   0xb   :  { %363 = vmatpush.bf16.msra.mxu0 %v5100_v1  ;;  %5107 = vmatpush.bf16.msra.mxu3 %v5100_v1  ;;  %v5068_v14 = vld [vmem:[#allocation2 + $0x30] sm:$0xff]  ;;  %v5069_v15 = vld [vmem:[#allocation2 + $0x38] sm:$0xff]  ;;  %v5070_v16 = vld [vmem:[#allocation2 + $0x40] sm:$0xff] }
   0xc   :  { %v5071_v19 = vld [vmem:[#allocation2 + $0x48] sm:$0xff]  ;;  %v5072_v22 = vld [vmem:[#allocation2 + $0x50] sm:$0xff]  ;;  %v5073_v25 = vld [vmem:[#allocation2 + $0x58] sm:$0xff] }
   0xd   :  { %v5074_v28 = vld [vmem:[#allocation2 + $0x60] sm:$0xff]  ;;  %v5075_v31 = vld [vmem:[#allocation2 + $0x68] sm:$0xff]  ;;  %v5076_v34 = vld [vmem:[#allocation2 + $0x70] sm:$0xff] }
   0xe   :  { %v5077_v37 = vld [vmem:[#allocation2 + $0x78] sm:$0xff]  ;;  %v5078_v40 = vld [vmem:[#allocation2 + $0x80] sm:$0xff]  ;;  %v5079_v43 = vld [vmem:[#allocation2 + $0x88] sm:$0xff] }
   0xf   :  { %364 = vmatpush.bf16.msra.mxu0 %v5099_v2  ;;  %5108 = vmatpush.bf16.msra.mxu3 %v5099_v2  ;;  %v5087_v45 = vld [vmem:[#allocation2 + $0xc8] sm:$0xff]  ;;  %v5080_v47 = vld [vmem:[#allocation2 + $0x90] sm:$0xff]  ;;  %v5081_v51 = vld [vmem:[#allocation2 + $0x98] sm:$0xff] }
  0x10   :  { %v5088_v49 = vld [vmem:[#allocation2 + $0xd0] sm:$0xff]  ;;  %v41_v53 = vld [vmem:[%s8821_s4] sm:$0x7]  ;;  %v5089_v55 = vld [vmem:[#allocation2 + $0xd8] sm:$0xff] }
  0x11   :  { %v5680_v54 = vperm.slane %v41_v53, 0  ;;  %v5686_v59 = vperm.slane %v41_v53, 1  ;;  %v5082_v2 = vld [vmem:[#allocation2 + $0xa0] sm:$0xff] }
  0x13   :  { %365 = vmatpush.bf16.msra.mxu0 %v5098_v3  ;;  %5109 = vmatpush.bf16.msra.mxu3 %v5098_v3 }
  0x17   :  { %366 = vmatpush.bf16.msra.mxu0 %v5097_v4  ;;  %5110 = vmatpush.bf16.msra.mxu3 %v5097_v4 }
  0x1b   :  { %367 = vmatpush.bf16.msra.mxu0 %v5096_v5  ;;  %5111 = vmatpush.bf16.msra.mxu3 %v5096_v5 }
  0x1f   :  { %368 = vmatpush.bf16.msra.mxu0 %v5095_v6  ;;  %5112 = vmatpush.bf16.msra.mxu3 %v5095_v6 }
  0x23   :  { %369 = vmatpush.bf16.msra.mxu0 %v5094_v7  ;;  %5113 = vmatpush.bf16.msra.mxu3 %v5094_v7 }
  0x26   :  { %370 = vmatmul.bf16.vlgmr.msra.gmra.mxu0 %v5062_v8  ;;  %495 = vmatmul.bf16.vlgmr.msra.gmra.mxu3 %v5087_v45 }
  0x36   :  { %375 = vmatmul.bf16.gmra.mxu0 %v5063_v9  ;;  %500 = vmatmul.bf16.gmra.mxu3 %v5088_v49 }
  0x46   :  { %380 = vmatmul.bf16.gmra.mxu0 %v5064_v10  ;;  %505 = vmatmul.bf16.gmra.mxu3 %v5089_v55 }
  0x56   :  { %385 = vmatmul.bf16.gmra.mxu0 %v5065_v11 }
  0x66   :  { %390 = vmatmul.bf16.gmra.mxu0 %v5066_v12 }
  0x76   :  { %395 = vmatmul.bf16.gmra.mxu0 %v5067_v13 }
  0x86   :  { %400 = vmatmul.bf16.gmra.mxu0 %v5068_v14 }
  0x96   :  { %405 = vmatmul.bf16.gmra.mxu0 %v5069_v15 }
  0xa3   :  { %v371_v17 = vpop.f32.mrf.mxu0 }
  0xa4   :  { %v532_v58 = vmul.f32 %v5680_v54, %v371_v17 }
  0xa6   :  { %410 = vmatmul.bf16.gmra.mxu0 %v5070_v16  ;;  %v597_v63 = vadd.f32 %v5686_v59, %v532_v58 }
  0xa8   :  { %v5700_v7 = vmax.f32 %v597_v63, 0.0 }
  0xaa   :  { %8943 = vst [vmem:[#allocation9_spill] sm:$0xff] %v5700_v7  ;;  %v726_v15 = vsel %vm725_vm0, %v5700_v7, 0.0 }
  0xab   :  { %v373_v18 = vpop.f32.mrf.mxu0 }
  0xac   :  { %v533_v56 = vmul.f32 %v5680_v54, %v373_v18 }
  0xae   :  { %v598_v61 = vadd.f32 %v5686_v59, %v533_v56  ;;  %v5083_v56 = vld [vmem:[#allocation2 + $0xa8] sm:$0xff] }
  0xb0   :  { %v5694_v3 = vmax.f32 %v598_v61, 0.0 }
  0xb2   :  { %8942 = vst [vmem:[#allocation8_spill] sm:$0xff] %v5694_v3  ;;  %v727_v11 = vsel %vm725_vm0, %v5694_v3, 0.0 }
  0xb3   :  { %v376_v20 = vpop.f32.mrf.mxu0 }
  0xb4   :  { %v534_v60 = vmul.f32 %v5680_v54, %v376_v20  ;;  %v728_v20 = vadd.f32 %v727_v11, %v726_v15 }
  0xb6   :  { %415 = vmatmul.bf16.gmra.mxu0 %v5071_v19  ;;  %v599_v0 = vadd.f32 %v5686_v59, %v534_v60 }
  0xb8   :  { %v5702_v8 = vmax.f32 %v599_v0, 0.0 }
  0xba   :  { %8944 = vst [vmem:[#allocation10_spill] sm:$0xff] %v5702_v8  ;;  %v729_v16 = vsel %vm725_vm0, %v5702_v8, 0.0 }
  0xbb   :  { %v378_v21 = vpop.f32.mrf.mxu0 }
  0xbc   :  { %v535_v62 = vmul.f32 %v5680_v54, %v378_v21  ;;  %v5090_v21 = vld [vmem:[#allocation2 + $0xe0] sm:$0xff] }
  0xbd   :  { %510 = vmatmul.bf16.gmra.mxu3 %v5090_v21 }
  0xbe   :  { %v600_v4 = vadd.f32 %v5686_v59, %v535_v62 }
  0xc0   :  { %v5708_v12 = vmax.f32 %v600_v4, 0.0 }
  0xc2   :  { %8945 = vst [vmem:[#allocation11_spill] sm:$0xff] %v5708_v12 }
  0xc3   :  { %v381_v23 = vpop.f32.mrf.mxu0 }
  0xc4   :  { %v536_v1 = vmul.f32 %v5680_v54, %v381_v23 }
  0xc6   :  { %420 = vmatmul.bf16.gmra.mxu0 %v5072_v22  ;;  %v601_v9 = vadd.f32 %v5686_v59, %v536_v1  ;;  %v731_v22 = vsel %vm725_vm0, %v5708_v12, 0.0 }
  0xc8   :  { %v5717_v17 = vmax.f32 %v601_v9, 0.0 }
  0xca   :  { %8946 = vst [vmem:[#allocation12_spill] sm:$0xff] %v5717_v17 }
  0xcb   :  { %v383_v24 = vpop.f32.mrf.mxu0 }
  0xcc   :  { %v537_v5 = vmul.f32 %v5680_v54, %v383_v24 }
  0xce   :  { %v602_v13 = vadd.f32 %v5686_v59, %v537_v5 }
  0xd0   :  { %v5724_v23 = vmax.f32 %v602_v13, 0.0 }
  0xd2   :  { %8947 = vst [vmem:[#allocation13_spill] sm:$0xff] %v5724_v23 }
  0xd3   :  { %v386_v26 = vpop.f32.mrf.mxu0 }
  0xd4   :  { %v538_v10 = vmul.f32 %v5680_v54, %v386_v26 }
  0xd6   :  { %425 = vmatmul.bf16.gmra.mxu0 %v5073_v25  ;;  %v603_v18 = vadd.f32 %v5686_v59, %v538_v10 }
  0xdb   :  { %v5645_v27 = vpop.f32.mrf.mxu0 }
  0xdc   :  { %v539_v14 = vmul.f32 %v5680_v54, %v5645_v27  ;;  %v730_v27 = vadd.f32 %v729_v16, %v728_v20 }
  0xde   :  { %v604_v24 = vadd.f32 %v5686_v59, %v539_v14 }
  0xe3   :  { %v5647_v29 = vpop.f32.mrf.mxu0 }
  0xe4   :  { %v540_v19 = vmul.f32 %v5680_v54, %v5647_v29  ;;  %v5733_v29 = vmax.f32 %v603_v18, 0.0 }
  0xe6   :  { %430 = vmatmul.bf16.gmra.mxu0 %v5074_v28  ;;  %v733_v28 = vsel %vm725_vm0, %v5717_v17, 0.0  ;;  %8948 = vst [vmem:[#allocation14_spill] sm:$0xff] %v5733_v29  ;;  %v737_v49 = vsel %vm725_vm0, %v5733_v29, 0.0 }
  0xeb   :  { %v5649_v30 = vpop.f32.mrf.mxu0 }
  0xec   :  { %v541_v25 = vmul.f32 %v5680_v54, %v5649_v30 }
  0xee   :  { %v606_v30 = vadd.f32 %v5686_v59, %v541_v25 }
  0xf0   :  { %v5754_v60 = vmax.f32 %v606_v30, 0.0 }
  0xf2   :  { %8951 = vst [vmem:[#allocation17_spill] sm:$0xff] %v5754_v60  ;;  %v743_v5 = vsel %vm725_vm0, %v5754_v60, 0.0 }
  0xf3   :  { %v5651_v32 = vpop.f32.mrf.mxu0 }
  0xf6   :  { %435 = vmatmul.bf16.gmra.mxu0 %v5075_v31  ;;  %v605_v31 = vadd.f32 %v5686_v59, %v540_v19 }
  0xfb   :  { %v5653_v33 = vpop.f32.mrf.mxu0 }
  0xfc   :  { %v543_v45 = vmul.f32 %v5680_v54, %v5653_v33 }
  0xfe   :  { %v608_v33 = vadd.f32 %v5686_v59, %v543_v45 }
 0x100   :  { %v5770_v9 = vmax.f32 %v608_v33, 0.0 }
 0x102   :  { %8953 = vst [vmem:[#allocation19_spill] sm:$0xff] %v5770_v9  ;;  %v747_v18 = vsel %vm725_vm0, %v5770_v9, 0.0 }
 0x103   :  { %v5655_v35 = vpop.f32.mrf.mxu0 }
 0x106   :  { %440 = vmatmul.bf16.gmra.mxu0 %v5076_v34  ;;  %v542_v34 = vmul.f32 %v5680_v54, %v5651_v32  ;;  %v544_v32 = vmul.f32 %v5680_v54, %v5655_v35 }
 0x108   :  { %v607_v53 = vadd.f32 %v5686_v59, %v542_v34  ;;  %v609_v35 = vadd.f32 %v5686_v59, %v544_v32  ;;  %v5091_v32 = vld [vmem:[#allocation2 + $0xe8] sm:$0xff] }
 0x109   :  { %515 = vmatmul.bf16.gmra.mxu3 %v5091_v32 }
 0x10a   :  { %v5763_v1 = vmax.f32 %v607_v53, 0.0  ;;  %v5777_v14 = vmax.f32 %v609_v35, 0.0  ;;  %v5084_v53 = vld [vmem:[#allocation2 + $0xb0] sm:$0xff] }
 0x10b   :  { %v5657_v36 = vpop.f32.mrf.mxu0 }
 0x10c   :  { %v545_v61 = vmul.f32 %v5680_v54, %v5657_v36  ;;  %8952 = vst [vmem:[#allocation18_spill] sm:$0xff] %v5763_v1  ;;  %v745_v13 = vsel %vm725_vm0, %v5763_v1, 0.0 }
 0x10d   :  { %8954 = vst [vmem:[#allocation20_spill] sm:$0xff] %v5777_v14 }
 0x10e   :  { %v610_v36 = vadd.f32 %v5686_v59, %v545_v61 }
 0x110   :  { %v5784_v19 = vmax.f32 %v610_v36, 0.0 }
 0x112   :  { %8955 = vst [vmem:[#allocation21_spill] sm:$0xff] %v5784_v19 }
 0x113   :  { %v5659_v38 = vpop.f32.mrf.mxu0 }
 0x116   :  { %445 = vmatmul.bf16.gmra.mxu0 %v5077_v37  ;;  %v732_v37 = vadd.f32 %v731_v22, %v730_v27 }
 0x11b   :  { %v5661_v39 = vpop.f32.mrf.mxu0 }
 0x11c   :  { %v547_v10 = vmul.f32 %v5680_v54, %v5661_v39 }
 0x11e   :  { %v612_v20 = vadd.f32 %v5686_v59, %v547_v10 }
 0x120   :  { %v5798_v34 = vmax.f32 %v612_v20, 0.0 }
 0x122   :  { %8957 = vst [vmem:[#allocation23_spill] sm:$0xff] %v5798_v34 }
 0x123   :  { %v5663_v41 = vpop.f32.mrf.mxu0 }
 0x124   :  { %v548_v15 = vmul.f32 %v5680_v54, %v5663_v41 }
 0x126   :  { %450 = vmatmul.bf16.gmra.mxu0 %v5078_v40  ;;  %v735_v40 = vsel %vm725_vm0, %v5724_v23, 0.0  ;;  %v613_v41 = vadd.f32 %v5686_v59, %v548_v15 }
 0x128   :  { %v5805_v45 = vmax.f32 %v613_v41, 0.0 }
 0x12a   :  { %8958 = vst [vmem:[#allocation24_spill] sm:$0xff] %v5805_v45 }
 0x12b   :  { %v5665_v42 = vpop.f32.mrf.mxu0 }
 0x12c   :  { %v549_v39 = vmul.f32 %v5680_v54, %v5665_v42 }
 0x12e   :  { %v614_v42 = vadd.f32 %v5686_v59, %v549_v39 }
 0x133   :  { %v5667_v44 = vpop.f32.mrf.mxu0 }
 0x134   :  { %v550_v27 = vmul.f32 %v5680_v54, %v5667_v44 }
 0x136   :  { %455 = vmatmul.bf16.gmra.mxu0 %v5079_v43  ;;  %v5740_v43 = vmax.f32 %v604_v24, 0.0  ;;  %v749_v24 = vsel %vm725_vm0, %v5777_v14, 0.0 }
 0x138   :  { %8949 = vst [vmem:[#allocation15_spill] sm:$0xff] %v5740_v43  ;;  %v739_v58 = vsel %vm725_vm0, %v5740_v43, 0.0 }
 0x13b   :  { %v5669_v46 = vpop.f32.mrf.mxu0 }
 0x143   :  { %v5671_v48 = vpop.f32.mrf.mxu0 }
 0x144   :  { %v552_v44 = vmul.f32 %v5680_v54, %v5671_v48 }
 0x146   :  { %460 = vmatmul.bf16.gmra.mxu0 %v5080_v47  ;;  %v734_v47 = vadd.f32 %v733_v28, %v732_v37  ;;  %v551_v37 = vmul.f32 %v5680_v54, %v5669_v46 }
 0x148   :  { %v736_v55 = vadd.f32 %v735_v40, %v734_v47  ;;  %v615_v47 = vadd.f32 %v5686_v59, %v550_v27  ;;  %v616_v46 = vadd.f32 %v5686_v59, %v551_v37 }
 0x14a   :  { %v738_v63 = vadd.f32 %v737_v49, %v736_v55  ;;  %v755_v55 = vsel %vm725_vm0, %v5798_v34, 0.0  ;;  %v5819_v48 = vmax.f32 %v615_v47, 0.0 }
 0x14b   :  { %v5673_v50 = vpop.f32.mrf.mxu0 }
 0x14c   :  { %v740_v4 = vadd.f32 %v739_v58, %v738_v63  ;;  %v553_v58 = vmul.f32 %v5680_v54, %v5673_v50  ;;  %v757_v63 = vsel %vm725_vm0, %v5805_v45, 0.0  ;;  %8960 = vst [vmem:[#allocation26_spill] sm:$0xff] %v5819_v48 }
 0x14e   :  { %v618_v50 = vadd.f32 %v5686_v59, %v553_v58 }
 0x153   :  { %v5675_v52 = vpop.f32.mrf.mxu0 }
 0x154   :  { %v554_v35 = vmul.f32 %v5680_v54, %v5675_v52 }
 0x156   :  { %465 = vmatmul.bf16.gmra.mxu0 %v5081_v51  ;;  %v5747_v51 = vmax.f32 %v605_v31, 0.0  ;;  %v751_v31 = vsel %vm725_vm0, %v5784_v19, 0.0  ;;  %v619_v52 = vadd.f32 %v5686_v59, %v554_v35 }
 0x158   :  { %8950 = vst [vmem:[#allocation16_spill] sm:$0xff] %v5747_v51  ;;  %v741_v0 = vsel %vm725_vm0, %v5747_v51, 0.0  ;;  %v5847_v41 = vmax.f32 %v619_v52, 0.0 }
 0x159   :  { %v742_v11 = vadd.f32 %v741_v0, %v740_v4  ;;  %v617_v0 = vadd.f32 %v5686_v59, %v552_v44 }
 0x15a   :  { %8964 = vst [vmem:[#allocation30_spill] sm:$0xff] %v5847_v41 }
 0x15b   :  { %v5683_v57 = vpop.f32.mrf.mxu0  ;;  %v744_v16 = vadd.f32 %v743_v5, %v742_v11  ;;  %v5826_v5 = vmax.f32 %v616_v46, 0.0  ;;  %v761_v11 = vsel %vm725_vm0, %v5819_v48, 0.0 }
 0x15c   :  { %v555_v36 = vmul.f32 %v5680_v54, %v5683_v57 }
 0x15d   :  { %v746_v22 = vadd.f32 %v745_v13, %v744_v16  ;;  %8961 = vst [vmem:[#allocation27_spill] sm:$0xff] %v5826_v5  ;;  %v5833_v13 = vmax.f32 %v617_v0, 0.0  ;;  %v763_v16 = vsel %vm725_vm0, %v5826_v5, 0.0 }
 0x15e   :  { %v620_v20 = vadd.f32 %v5686_v59, %v555_v36 }
 0x15f   :  { %v748_v28 = vadd.f32 %v747_v18, %v746_v22  ;;  %8962 = vst [vmem:[#allocation28_spill] sm:$0xff] %v5833_v13  ;;  %v5840_v18 = vmax.f32 %v618_v50, 0.0 }
 0x161   :  { %v750_v40 = vadd.f32 %v749_v24, %v748_v28  ;;  %8963 = vst [vmem:[#allocation29_spill] sm:$0xff] %v5840_v18  ;;  %v765_v24 = vsel %vm725_vm0, %v5833_v13, 0.0 }
 0x163   :  { %v5698_v6 = vpop.f32.mrf.mxu0  ;;  %v752_v49 = vadd.f32 %v751_v31, %v750_v40  ;;  %v767_v31 = vsel %vm725_vm0, %v5840_v18, 0.0 }
 0x166   :  { %470 = vmatmul.bf16.gmra.mxu0 %v5082_v2  ;;  %v546_v2 = vmul.f32 %v5680_v54, %v5659_v38 }
 0x168   :  { %v611_v38 = vadd.f32 %v5686_v59, %v546_v2 }
 0x16a   :  { %v5791_v25 = vmax.f32 %v611_v38, 0.0  ;;  %v556_v38 = vmul.f32 %v5680_v54, %v5698_v6 }
 0x16b   :  { %v5729_v26 = vpop.f32.mrf.mxu0 }
 0x16c   :  { %8956 = vst [vmem:[#allocation22_spill] sm:$0xff] %v5791_v25  ;;  %v753_v30 = vsel %vm725_vm0, %v5791_v25, 0.0  ;;  %v557_v57 = vmul.f32 %v5680_v54, %v5729_v26  ;;  %v621_v6 = vadd.f32 %v5686_v59, %v556_v38 }
 0x16d   :  { %v754_v61 = vadd.f32 %v753_v30, %v752_v49  ;;  %v769_v30 = vsel %vm725_vm0, %v5847_v41, 0.0 }
 0x16e   :  { %v622_v26 = vadd.f32 %v5686_v59, %v557_v57  ;;  %v5860_v47 = vmax.f32 %v621_v6, 0.0 }
 0x16f   :  { %v756_v2 = vadd.f32 %v755_v55, %v754_v61 }
 0x170   :  { %8966 = vst [vmem:[#allocation32_spill] sm:$0xff] %v5860_v47  ;;  %v5866_v55 = vmax.f32 %v622_v26, 0.0 }
 0x171   :  { %v758_v10 = vadd.f32 %v757_v63, %v756_v2  ;;  %v773_v63 = vsel %vm725_vm0, %v5860_v47, 0.0 }
 0x172   :  { %8967 = vst [vmem:[#allocation33_spill] sm:$0xff] %v5866_v55 }
 0x173   :  { %v5759_v62 = vpop.f32.mrf.mxu0 }
 0x174   :  { %v558_v27 = vmul.f32 %v5680_v54, %v5759_v62 }
 0x176   :  { %475 = vmatmul.bf16.gmra.mxu0 %v5083_v56  ;;  %v5812_v56 = vmax.f32 %v614_v42, 0.0  ;;  %v5854_v42 = vmax.f32 %v620_v20, 0.0  ;;  %v623_v44 = vadd.f32 %v5686_v59, %v558_v27  ;;  %v5092_v27 = vld [vmem:[#allocation2 + $0xf0] sm:$0xff] }
 0x177   :  { %520 = vmatmul.bf16.gmra.mxu3 %v5092_v27 }
 0x178   :  { %8959 = vst [vmem:[#allocation25_spill] sm:$0xff] %v5812_v56  ;;  %v759_v4 = vsel %vm725_vm0, %v5812_v56, 0.0  ;;  %v771_v32 = vsel %vm725_vm0, %v5854_v42, 0.0  ;;  %v5872_v0 = vmax.f32 %v623_v44, 0.0 }
 0x179   :  { %v760_v15 = vadd.f32 %v759_v4, %v758_v10  ;;  %8965 = vst [vmem:[#allocation31_spill] sm:$0xff] %v5854_v42  ;;  %v775_v4 = vsel %vm725_vm0, %v5866_v55, 0.0 }
 0x17a   :  { %8968 = vst [vmem:[#allocation34_spill] sm:$0xff] %v5872_v0 }
 0x17b   :  { %v438_v21 = vpop.f32.mrf.mxu0  ;;  %v762_v22 = vadd.f32 %v761_v11, %v760_v15  ;;  %v777_v11 = vsel %vm725_vm0, %v5872_v0, 0.0 }
 0x17c   :  { %v559_v37 = vmul.f32 %v5680_v54, %v438_v21 }
 0x17d   :  { %v764_v28 = vadd.f32 %v763_v16, %v762_v22 }
 0x17e   :  { %v624_v46 = vadd.f32 %v5686_v59, %v559_v37 }
 0x17f   :  { %v766_v40 = vadd.f32 %v765_v24, %v764_v28 }
 0x180   :  { %v5878_v50 = vmax.f32 %v624_v46, 0.0 }
 0x181   :  { %v768_v49 = vadd.f32 %v767_v31, %v766_v40 }
 0x182   :  { %8969 = vst [vmem:[#allocation35_spill] sm:$0xff] %v5878_v50  ;;  %v779_v16 = vsel %vm725_vm0, %v5878_v50, 0.0 }
 0x183   :  { %v441_v33 = vpop.f32.mrf.mxu0  ;;  %v770_v61 = vadd.f32 %v769_v30, %v768_v49 }
 0x184   :  { %v560_v62 = vmul.f32 %v5680_v54, %v441_v33 }
 0x185   :  { %v772_v2 = vadd.f32 %v771_v32, %v770_v61  ;;  %v5093_v61 = vld [vmem:[#allocation2 + $0xf8] sm:$0xff] }
 0x186   :  { %480 = vmatmul.bf16.gmra.mxu0 %v5084_v53  ;;  %v5085_v53 = vld [vmem:[#allocation2 + $0xb8] sm:$0xff]  ;;  %v625_v33 = vadd.f32 %v5686_v59, %v560_v62  ;;  %v5086_v62 = vld [vmem:[#allocation2 + $0xc0] sm:$0xff] }
 0x187   :  { %v774_v10 = vadd.f32 %v773_v63, %v772_v2  ;;  %525 = vmatmul.bf16.gmra.mxu3 %v5093_v61 }
 0x188   :  { %v5883_v52 = vmax.f32 %v625_v33, 0.0 }
 0x189   :  { %v776_v15 = vadd.f32 %v775_v4, %v774_v10 }
 0x18a   :  { %8970 = vst [vmem:[#allocation36_spill] sm:$0xff] %v5883_v52  ;;  %v781_v24 = vsel %vm725_vm0, %v5883_v52, 0.0 }
 0x18b   :  { %v443_v39 = vpop.f32.mrf.mxu0 }
 0x18c   :  { %v561_v21 = vmul.f32 %v5680_v54, %v443_v39  ;;  %v778_v39 = vadd.f32 %v777_v11, %v776_v15  ;;  %v5916_v15 = vpop.f32.mrf.mxu3 }
 0x18e   :  { %v626_v36 = vadd.f32 %v5686_v59, %v561_v21  ;;  %v780_v28 = vadd.f32 %v779_v16, %v778_v39 }
 0x190   :  { %v5888_v20 = vmax.f32 %v626_v36, 0.0  ;;  %v782_v37 = vadd.f32 %v781_v24, %v780_v28 }
 0x192   :  { %8971 = vst [vmem:[#allocation37_spill] sm:$0xff] %v5888_v20  ;;  %v783_v26 = vsel %vm725_vm0, %v5888_v20, 0.0 }
 0x193   :  { %v446_v58 = vpop.f32.mrf.mxu0  ;;  %v784_v44 = vadd.f32 %v783_v26, %v782_v37 }
 0x194   :  { %v562_v35 = vmul.f32 %v5680_v54, %v446_v58 }
 0x196   :  { %485 = vmatmul.bf16.gmra.mxu0 %v5085_v53  ;;  %v627_v38 = vadd.f32 %v5686_v59, %v562_v35 }
 0x198   :  { %v5893_v6 = vmax.f32 %v627_v38, 0.0 }
 0x19a   :  { %8972 = vst [vmem:[#allocation38_spill] sm:$0xff] %v5893_v6  ;;  %v785_v30 = vsel %vm725_vm0, %v5893_v6, 0.0 }
 0x19b   :  { %v448_v57 = vpop.f32.mrf.mxu0  ;;  %v786_v32 = vadd.f32 %v785_v30, %v784_v44  ;;  %v5947_v30 = vpop.f32.mrf.mxu3 }
 0x19c   :  { %v563_v22 = vmul.f32 %v5680_v54, %v448_v57 }
 0x19e   :  { %v628_v31 = vadd.f32 %v5686_v59, %v563_v22 }
 0x1a0   :  { %v5898_v40 = vmax.f32 %v628_v31, 0.0 }
 0x1a2   :  { %8973 = vst [vmem:[#allocation39_spill] sm:$0xff] %v5898_v40  ;;  %v787_v49 = vsel %vm725_vm0, %v5898_v40, 0.0 }
 0x1a3   :  { %v5904_v53 = vpop.f32.mrf.mxu0  ;;  %v788_v46 = vadd.f32 %v787_v49, %v786_v32 }
 0x1a5   :  { %v789_v21 = vrot.slane %v788_v46, 4 }
 0x1a6   :  { %490 = vmatmul.bf16.gmra.mxu0 %v5086_v62 }
 0x1a7   :  { %v790_v63 = vadd.f32 %v789_v21, %v788_v46 }
 0x1a9   :  { %v791_v33 = vrot.slane %v790_v63, 2 }
 0x1ab   :  { %v5906_v58 = vpop.f32.mrf.mxu0  ;;  %v792_v2 = vadd.f32 %v791_v33, %v790_v63 }
 0x1ad   :  { %v793_v4 = vrot.slane %v792_v2, 1 }
 0x1af   :  { %v794_v10 = vadd.f32 %v793_v4, %v792_v2 }
 0x1b1   :  { %v5912_v11 = vmul.f32 0.00390625, %v794_v10 }
 0x1b3   :  { %v5908_v35 = vpop.f32.mrf.mxu0  ;;  %v5920_v16 = vsub.f32 %v5700_v7, %v5912_v11  ;;  %v5924_v57 = vsub.f32 %v5702_v8, %v5912_v11  ;;  %v5932_v24 = vsub.f32 %v5694_v3, %v5912_v11  ;;  %v5936_v27 = vsub.f32 %v5708_v12, %v5912_v11 }
 0x1b4   :  { %v5942_v31 = vsub.f32 %v5717_v17, %v5912_v11  ;;  %v5952_v62 = vsub.f32 %v5724_v23, %v5912_v11  ;;  %v5958_v46 = vsub.f32 %v5733_v29, %v5912_v11  ;;  %v5967_v2 = vsub.f32 %v5740_v43, %v5912_v11 }
 0x1b5   :  { %v930_v39 = vmul.f32 %v5920_v16, %v5920_v16  ;;  %v931_v28 = vmul.f32 %v5932_v24, %v5932_v24  ;;  %v932_v26 = vmul.f32 %v5924_v57, %v5924_v57  ;;  %v933_v49 = vmul.f32 %v5936_v27, %v5936_v27 }
 0x1b6   :  { %v934_v21 = vmul.f32 %v5942_v31, %v5942_v31  ;;  %v935_v4 = vmul.f32 %v5952_v62, %v5952_v62  ;;  %v5999_v43 = vsub.f32 %v5770_v9, %v5912_v11  ;;  %v6051_v12 = vsub.f32 %v5812_v56, %v5912_v11 }
 0x1b7   :  { %v994_v37 = vsel %vm725_vm0, %v930_v39, 0.0  ;;  %v995_v44 = vsel %vm725_vm0, %v931_v28, 0.0  ;;  %v997_v61 = vsel %vm725_vm0, %v932_v26, 0.0  ;;  %v999_v10 = vsel %vm725_vm0, %v933_v49, 0.0 }
 0x1b8   :  { %v996_v32 = vadd.f32 %v995_v44, %v994_v37  ;;  %v5974_v28 = vsub.f32 %v5747_v51, %v5912_v11  ;;  %v936_v26 = vmul.f32 %v5958_v46, %v5958_v46  ;;  %v1001_v37 = vsel %vm725_vm0, %v934_v21, 0.0  ;;  %8974 = vst [vmem:[#allocation40_spill] sm:$0xff] %v6051_v12 }
 0x1b9   :  { %v1003_v49 = vsel %vm725_vm0, %v935_v4, 0.0  ;;  %v5990_v51 = vsub.f32 %v5763_v1, %v5912_v11  ;;  %v6006_v1 = vsub.f32 %v5777_v14, %v5912_v11  ;;  %v941_v9 = vmul.f32 %v5999_v43, %v5999_v43 }
 0x1ba   :  { %v998_v33 = vadd.f32 %v997_v61, %v996_v32  ;;  %v5981_v32 = vsub.f32 %v5754_v60, %v5912_v11  ;;  %v937_v61 = vmul.f32 %v5967_v2, %v5967_v2  ;;  %v938_v21 = vmul.f32 %v5974_v28, %v5974_v28 }
 0x1bb   :  { %v5910_v36 = vpop.f32.mrf.mxu0  ;;  %v942_v14 = vmul.f32 %v6006_v1, %v6006_v1 }
 0x1bc   :  { %v1000_v39 = vadd.f32 %v999_v10, %v998_v33  ;;  %v5986_v33 = vpop.f32.mrf.mxu3  ;;  %v939_v4 = vmul.f32 %v5981_v32, %v5981_v32  ;;  %v1009_v29 = vsel %vm725_vm0, %v938_v21, 0.0 }
 0x1be   :  { %v1002_v44 = vadd.f32 %v1001_v37, %v1000_v39  ;;  %v1005_v39 = vsel %vm725_vm0, %v936_v26, 0.0  ;;  %v940_v26 = vmul.f32 %v5990_v51, %v5990_v51 }
 0x1c0   :  { %v1004_v10 = vadd.f32 %v1003_v49, %v1002_v44  ;;  %v1007_v44 = vsel %vm725_vm0, %v937_v61, 0.0  ;;  %v1011_v61 = vsel %vm725_vm0, %v939_v4, 0.0  ;;  %v1013_v21 = vsel %vm725_vm0, %v940_v26, 0.0 }
 0x1c1   :  { %v6042_v26 = vsub.f32 %v5805_v45, %v5912_v11 }
 0x1c2   :  { %v1006_v60 = vadd.f32 %v1005_v39, %v1004_v10  ;;  %v6013_v39 = vsub.f32 %v5784_v19, %v5912_v11 }
 0x1c3   :  { %v5914_v38 = vpop.f32.mrf.mxu0 }
 0x1c4   :  { %v1008_v49 = vadd.f32 %v1007_v44, %v1006_v60  ;;  %v6020_v44 = vsub.f32 %v5791_v25, %v5912_v11  ;;  %v6031_v23 = vpop.f32.mrf.mxu3  ;;  %v1015_v25 = vsel %vm725_vm0, %v941_v9, 0.0 }
 0x1c6   :  { %v1010_v10 = vadd.f32 %v1009_v29, %v1008_v49  ;;  %v564_v29 = vmul.f32 %v5680_v54, %v5904_v53  ;;  %v565_v49 = vmul.f32 %v5680_v54, %v5906_v58  ;;  %v944_v58 = vmul.f32 %v6020_v44, %v6020_v44 }
 0x1c8   :  { %v1012_v60 = vadd.f32 %v1011_v61, %v1010_v10  ;;  %v6035_v10 = vsub.f32 %v5798_v34, %v5912_v11  ;;  %v943_v61 = vmul.f32 %v6013_v39, %v6013_v39  ;;  %v629_v17 = vadd.f32 %v5686_v59, %v564_v29 }
 0x1c9   :  { %v6060_v29 = vsub.f32 %v5819_v48, %v5912_v11 }
 0x1ca   :  { %v1014_v4 = vadd.f32 %v1013_v21, %v1012_v60  ;;  %v1017_v60 = vsel %vm725_vm0, %v942_v14, 0.0  ;;  %v630_v21 = vadd.f32 %v5686_v59, %v565_v49  ;;  %v945_v9 = vmul.f32 %v6035_v10, %v6035_v10 }
 0x1cb   :  { %v5928_v22 = vpop.f32.mrf.mxu0  ;;  %8975 = vst [vmem:[#allocation41_spill] sm:$0xff] %v6060_v29  ;;  %v946_v14 = vmul.f32 %v6042_v26, %v6042_v26  ;;  %v6064_v49 = vmax.f32 %v629_v17, 0.0  ;;  %v567_v17 = vmul.f32 %v5680_v54, %v5910_v36 }
 0x1cc   :  { %v1016_v53 = vadd.f32 %v1015_v25, %v1014_v4  ;;  %v1019_v25 = vsel %vm725_vm0, %v943_v61, 0.0  ;;  %v566_v4 = vmul.f32 %v5680_v54, %v5908_v35  ;;  %v6071_v61 = vmax.f32 %v630_v21, 0.0 }
 0x1cd   :  { %8976 = vst [vmem:[#allocation42_spill] sm:$0xff] %v6064_v49  ;;  %v947_v35 = vmul.f32 %v6051_v12, %v6051_v12  ;;  %v6085_v21 = vsub.f32 %v5833_v13, %v5912_v11  ;;  %v632_v3 = vadd.f32 %v5686_v59, %v567_v17 }
 0x1ce   :  { %v1018_v34 = vadd.f32 %v1017_v60, %v1016_v53  ;;  %v1021_v53 = vsel %vm725_vm0, %v944_v58, 0.0  ;;  %v6069_v60 = vsub.f32 %v5826_v5, %v5912_v11  ;;  %8978 = vst [vmem:[#allocation44_spill] sm:$0xff] %v6071_v61  ;;  %v631_v48 = vadd.f32 %v5686_v59, %v566_v4  ;;  %v6081_v58 = vpop.f32.mrf.mxu3 }
 0x1cf   :  { %8979 = vst [vmem:[#allocation45_spill] sm:$0xff] %v6085_v21  ;;  %v6094_v4 = vsub.f32 %v5840_v18, %v5912_v11  ;;  %v1027_v13 = vsel %vm725_vm0, %v947_v35, 0.0  ;;  %v6108_v18 = vsub.f32 %v5847_v41, %v5912_v11  ;;  %v6124_v41 = vmax.f32 %v632_v3, 0.0 }
 0x1d0   :  { %v1020_v45 = vadd.f32 %v1019_v25, %v1018_v34  ;;  %8977 = vst [vmem:[#allocation43_spill] sm:$0xff] %v6069_v60  ;;  %v1023_v25 = vsel %vm725_vm0, %v945_v9, 0.0  ;;  %v1025_v9 = vsel %vm725_vm0, %v946_v14, 0.0  ;;  %v949_v36 = vmul.f32 %v6069_v60, %v6069_v60 }
 0x1d1   :  { %8980 = vst [vmem:[#allocation46_spill] sm:$0xff] %v6094_v4  ;;  %v6101_v5 = vmax.f32 %v631_v48, 0.0  ;;  %v568_v14 = vmul.f32 %v5680_v54, %v5914_v38  ;;  %v6112_v60 = vsub.f32 %v5854_v42, %v5912_v11  ;;  %v951_v35 = vmul.f32 %v6094_v4, %v6094_v4 }
 0x1d2   :  { %v1022_v34 = vadd.f32 %v1021_v53, %v1020_v45  ;;  %v948_v45 = vmul.f32 %v6060_v29, %v6060_v29  ;;  %v795_v53 = vsel %vm725_vm0, %v6064_v49, 0.0  ;;  %8982 = vst [vmem:[#allocation48_spill] sm:$0xff] %v6108_v18  ;;  %v1031_v17 = vsel %vm725_vm0, %v949_v36, 0.0 }
 0x1d3   :  { %v5963_v63 = vpop.f32.mrf.mxu0  ;;  %8981 = vst [vmem:[#allocation47_spill] sm:$0xff] %v6101_v5  ;;  %v633_v42 = vadd.f32 %v5686_v59, %v568_v14  ;;  %v6131_v4 = vsub.f32 %v5860_v47, %v5912_v11  ;;  %v953_v36 = vmul.f32 %v6112_v60, %v6112_v60 }
 0x1d4   :  { %v1024_v8 = vadd.f32 %v1023_v25, %v1022_v34  ;;  %v796_v34 = vsel %vm725_vm0, %v6071_v61, 0.0  ;;  %8983 = vst [vmem:[#allocation49_spill] sm:$0xff] %v6112_v60  ;;  %v1029_v48 = vsel %vm725_vm0, %v948_v45, 0.0  ;;  %v570_v47 = vmul.f32 %v5680_v54, %v5963_v63 }
 0x1d5   :  { %v797_v38 = vadd.f32 %v796_v34, %v795_v53  ;;  %8984 = vst [vmem:[#allocation50_spill] sm:$0xff] %v6124_v41  ;;  %v6135_v53 = vsub.f32 %v5866_v55, %v5912_v11  ;;  %v1035_v34 = vsel %vm725_vm0, %v951_v35, 0.0  ;;  %v6154_v60 = vsub.f32 %v5872_v0, %v5912_v11 }
 0x1d6   :  { %v1026_v25 = vadd.f32 %v1025_v9, %v1024_v8  ;;  %v950_v8 = vmul.f32 %v6085_v21, %v6085_v21  ;;  %v569_v21 = vmul.f32 %v5680_v54, %v5928_v22  ;;  %8985 = vst [vmem:[#allocation51_spill] sm:$0xff] %v6131_v4  ;;  %v6143_v14 = vpop.f32.mrf.mxu3  ;;  %v6158_v35 = vsub.f32 %v5878_v50, %v5912_v11 }
 0x1d7   :  { %8986 = vst [vmem:[#allocation52_spill] sm:$0xff] %v6135_v53  ;;  %v635_v0 = vadd.f32 %v5686_v59, %v570_v47  ;;  %v956_v47 = vmul.f32 %v6154_v60, %v6154_v60 }
 0x1d8   :  { %v1028_v7 = vadd.f32 %v1027_v13, %v1026_v25  ;;  %v798_v25 = vsel %vm725_vm0, %v6101_v5, 0.0  ;;  %v1033_v3 = vsel %vm725_vm0, %v950_v8, 0.0  ;;  %v634_v55 = vadd.f32 %v5686_v59, %v569_v21  ;;  %8988 = vst [vmem:[#allocation54_spill] sm:$0xff] %v6154_v60 }
 0x1d9   :  { %v799_v22 = vadd.f32 %v798_v25, %v797_v38  ;;  %8989 = vst [vmem:[#allocation55_spill] sm:$0xff] %v6158_v35  ;;  %v954_v38 = vmul.f32 %v6131_v4, %v6131_v4  ;;  %v955_v21 = vmul.f32 %v6135_v53, %v6135_v53  ;;  %v1039_v25 = vsel %vm725_vm0, %v953_v36, 0.0  ;;  %v5102_v36 = vld [vmem:[%s8819_s2] sm:$0xff] }
 0x1da   :  { %v1030_v9 = vadd.f32 %v1029_v48, %v1028_v7  ;;  %v952_v7 = vmul.f32 %v6108_v18, %v6108_v18  ;;  %v6171_v50 = vmax.f32 %v634_v55, 0.0  ;;  %v6185_v55 = vsub.f32 %v5888_v20, %v5912_v11 }
 0x1db   :  { %v5995_v37 = vpop.f32.mrf.mxu0  ;;  %v584_v4 = vmul.f32 %v5680_v54, %v5986_v33 }
 0x1dc   :  { %v1032_v45 = vadd.f32 %v1031_v17, %v1030_v9  ;;  %v800_v17 = vsel %vm725_vm0, %v6124_v41, 0.0  ;;  %v6147_v9 = vmax.f32 %v633_v42, 0.0  ;;  %v1037_v42 = vsel %vm725_vm0, %v952_v7, 0.0  ;;  %8990 = vst [vmem:[#allocation56_spill] sm:$0xff] %v6171_v50 }
 0x1dd   :  { %v801_v63 = vadd.f32 %v800_v17, %v799_v22  ;;  %v571_v7 = vmul.f32 %v5680_v54, %v5995_v37  ;;  %v6181_v17 = vsub.f32 %v5883_v52, %v5912_v11  ;;  %8992 = vst [vmem:[#allocation58_spill] sm:$0xff] %v6185_v55  ;;  %v1041_v37 = vsel %vm725_vm0, %v954_v38, 0.0 }
 0x1de   :  { %v1034_v48 = vadd.f32 %v1033_v3, %v1032_v45  ;;  %8987 = vst [vmem:[#allocation53_spill] sm:$0xff] %v6147_v9  ;;  %v5103_v3 = vld [vmem:[%s8819_s2 + $0x8] sm:$0xff]  ;;  %v6195_v52 = vmax.f32 %v635_v0, 0.0  ;;  %v6200_v60 = vpop.f32.mrf.mxu3 }
 0x1df   :  { %1518 = vmatpush.bf16.msra.mxu1 %v5103_v3  ;;  %5114 = vmatpush.bf16.msra.mxu2 %v5103_v3  ;;  %8991 = vst [vmem:[#allocation57_spill] sm:$0xff] %v6181_v17  ;;  %v636_v20 = vadd.f32 %v5686_v59, %v571_v7  ;;  %v958_v0 = vmul.f32 %v6181_v17, %v6181_v17 }
 0x1e0   :  { %v1036_v8 = vadd.f32 %v1035_v34, %v1034_v48  ;;  %v802_v48 = vsel %vm725_vm0, %v6147_v9, 0.0  ;;  %8993 = vst [vmem:[#allocation59_spill] sm:$0xff] %v6195_v52 }
 0x1e2   :  { %v1038_v34 = vadd.f32 %v1037_v42, %v1036_v8  ;;  %v957_v8 = vmul.f32 %v6158_v35, %v6158_v35  ;;  %v1043_v42 = vsel %vm725_vm0, %v955_v21, 0.0  ;;  %v6204_v21 = vsub.f32 %v5898_v40, %v5912_v11 }
 0x1e3   :  { %v6029_v19 = vpop.f32.mrf.mxu0  ;;  %1519 = vmatpush.bf16.msra.mxu1 %v5102_v36  ;;  %5115 = vmatpush.bf16.msra.mxu2 %v5102_v36 }
 0x1e4   :  { %v1040_v22 = vadd.f32 %v1039_v25, %v1038_v34  ;;  %v803_v25 = vadd.f32 %v802_v48, %v801_v63  ;;  %v804_v34 = vsel %vm725_vm0, %v6171_v50, 0.0  ;;  %v572_v53 = vmul.f32 %v5680_v54, %v6029_v19  ;;  %8994 = vst [vmem:[#allocation60_spill] sm:$0xff] %v6204_v21 }
 0x1e5   :  { %v6208_v63 = vsub.f32 %v5893_v6, %v5912_v11  ;;  %v1045_v48 = vsel %vm725_vm0, %v956_v47, 0.0  ;;  %v959_v19 = vmul.f32 %v6185_v55, %v6185_v55  ;;  %v1047_v7 = vsel %vm725_vm0, %v957_v8, 0.0 }
 0x1e6   :  { %v1042_v3 = vadd.f32 %v1041_v37, %v1040_v22  ;;  %v805_v22 = vadd.f32 %v804_v34, %v803_v25  ;;  %v637_v11 = vadd.f32 %v5686_v59, %v572_v53  ;;  %v1049_v55 = vsel %vm725_vm0, %v958_v0, 0.0 }
 0x1e7   :  { %8995 = vst [vmem:[#allocation61_spill] sm:$0xff] %v6208_v63  ;;  %v960_v47 = vmul.f32 %v6208_v63, %v6208_v63  ;;  %v961_v8 = vmul.f32 %v6204_v21, %v6204_v21  ;;  %v1051_v25 = vsel %vm725_vm0, %v959_v19, 0.0  ;;  %v6238_v19 = vpop.f32.mrf.mxu3 }
 0x1e8   :  { %v1044_v38 = vadd.f32 %v1043_v42, %v1042_v3  ;;  %v806_v42 = vsel %vm725_vm0, %v6195_v52, 0.0  ;;  %v6218_v3 = vmax.f32 %v636_v20, 0.0  ;;  %v6231_v53 = vmax.f32 %v637_v11, 0.0 }
 0x1e9   :  { %v807_v34 = vadd.f32 %v806_v42, %v805_v22  ;;  %v1053_v0 = vsel %vm725_vm0, %v960_v47, 0.0 }
 0x1ea   :  { %v1046_v37 = vadd.f32 %v1045_v48, %v1044_v38  ;;  %8996 = vst [vmem:[#allocation62_spill] sm:$0xff] %v6218_v3  ;;  %v808_v20 = vsel %vm725_vm0, %v6218_v3, 0.0 }
 0x1eb   :  { %v6073_v56 = vpop.f32.mrf.mxu0  ;;  %8997 = vst [vmem:[#allocation63_spill] sm:$0xff] %v6231_v53  ;;  %v809_v21 = vadd.f32 %v808_v20, %v807_v34 }
 0x1ec   :  { %v573_v40 = vmul.f32 %v5680_v54, %v6073_v56  ;;  %v1048_v6 = vadd.f32 %v1047_v7, %v1046_v37  ;;  %v1055_v37 = vsel %vm725_vm0, %v961_v8, 0.0 }
 0x1ee   :  { %v1050_v38 = vadd.f32 %v1049_v55, %v1048_v6  ;;  %v638_v56 = vadd.f32 %v5686_v59, %v573_v40  ;;  %v810_v55 = vsel %vm725_vm0, %v6231_v53, 0.0 }
 0x1ef   :  { %v811_v11 = vadd.f32 %v810_v55, %v809_v21  ;;  %v6258_v55 = vpop.f32.mrf.mxu3 }
 0x1f0   :  { %v1052_v7 = vadd.f32 %v1051_v25, %v1050_v38  ;;  %v6242_v22 = vmax.f32 %v638_v56, 0.0 }
 0x1f2   :  { %v1054_v6 = vadd.f32 %v1053_v0, %v1052_v7  ;;  %8998 = vst [vmem:[#allocation64_spill] sm:$0xff] %v6242_v22  ;;  %v812_v47 = vsel %vm725_vm0, %v6242_v22, 0.0 }
 0x1f3   :  { %v6120_v13 = vpop.f32.mrf.mxu0  ;;  %v813_v7 = vadd.f32 %v812_v47, %v811_v11 }
 0x1f4   :  { %v574_v48 = vmul.f32 %v5680_v54, %v6120_v13  ;;  %v1056_v13 = vadd.f32 %v1055_v37, %v1054_v6 }
 0x1f6   :  { %v639_v40 = vadd.f32 %v5686_v59, %v574_v48  ;;  %v1057_v25 = vrot.slane %v1056_v13, 4 }
 0x1f8   :  { %v6248_v8 = vmax.f32 %v639_v40, 0.0  ;;  %v1058_v20 = vadd.f32 %v1057_v25, %v1056_v13 }
 0x1fa   :  { %8999 = vst [vmem:[#allocation65_spill] sm:$0xff] %v6248_v8  ;;  %v1059_v0 = vrot.slane %v1058_v20, 2  ;;  %v814_v48 = vsel %vm725_vm0, %v6248_v8, 0.0 }
 0x1fb   :  { %v478_v45 = vpop.f32.mrf.mxu0  ;;  %v815_v40 = vadd.f32 %v814_v48, %v813_v7 }
 0x1fc   :  { %v575_v42 = vmul.f32 %v5680_v54, %v478_v45  ;;  %v1060_v6 = vadd.f32 %v1059_v0, %v1058_v20 }
 0x1fe   :  { %v640_v34 = vadd.f32 %v5686_v59, %v575_v42  ;;  %v1061_v42 = vrot.slane %v1060_v6, 1 }
 0x200   :  { %v6254_v45 = vmax.f32 %v640_v34, 0.0  ;;  %v1062_v47 = vadd.f32 %v1061_v42, %v1060_v6 }
 0x202   :  { %9000 = vst [vmem:[#allocation66_spill] sm:$0xff] %v6254_v45 }
 0x203   :  { %v481_v36 = vpop.f32.mrf.mxu0 }
 0x204   :  { %v576_v38 = vmul.f32 %v5680_v54, %v481_v36  ;;  %v816_v36 = vsel %vm725_vm0, %v6254_v45, 0.0 }
 0x205   :  { %v817_v34 = vadd.f32 %v816_v36, %v815_v40 }
 0x206   :  { %v641_v21 = vadd.f32 %v5686_v59, %v576_v38  ;;  %v1132_v38 = vmul.f32 0.00390625, %v1062_v47  ;;  %v582_v47 = vmul.f32 %v5680_v54, %v5916_v15 }
 0x208   :  { %v6262_v13 = vmax.f32 %v641_v21, 0.0  ;;  %v1134_v48 = vadd.f32 1e-06, %v1132_v38  ;;  %v6272_v21 = vpop.f32.mrf.mxu3 }
 0x20a   :  { %9001 = vst [vmem:[#allocation67_spill] sm:$0xff] %v6262_v13  ;;  %5132 = vrsqrt.f32 %v1134_v48  ;;  %vm1142_vm2 = vweird.f32 %v1134_v48 }
 0x20b   :  { %v483_v63 = vpop.f32.mrf.mxu0 }
 0x20c   :  { %v577_v37 = vmul.f32 %v5680_v54, %v483_v63  ;;  %v818_v63 = vsel %vm725_vm0, %v6262_v13, 0.0 }
 0x20d   :  { %v819_v35 = vadd.f32 %v818_v63, %v817_v34 }
 0x20e   :  { %v642_v11 = vadd.f32 %v5686_v59, %v577_v37 }
 0x210   :  { %v6268_v20 = vmax.f32 %v642_v11, 0.0  ;;  %v521_v34 = vpop.f32.mrf.mxu3 }
 0x212   :  { %9002 = vst [vmem:[#allocation68_spill] sm:$0xff] %v6268_v20 }
 0x213   :  { %v486_v56 = vpop.f32.mrf.mxu0 }
 0x214   :  { %v578_v25 = vmul.f32 %v5680_v54, %v486_v56  ;;  %v820_v56 = vsel %vm725_vm0, %v6268_v20, 0.0 }
 0x215   :  { %v821_v40 = vadd.f32 %v820_v56, %v819_v35 }
 0x216   :  { %v643_v7 = vadd.f32 %v5686_v59, %v578_v25  ;;  %v5133_v25 = vpop.eup %5132 }
 0x217   :  { %v1137_v38 = vmul.f32 %v5133_v25, %v1134_v48  ;;  %vm1143_vm1 = vweird.f32 %v5133_v25 }
 0x218   :  { %v6276_v37 = vmax.f32 %v643_v7, 0.0  ;;  %v583_v7 = vmul.f32 %v5680_v54, %v5947_v30  ;;  %v523_v33 = vpop.f32.mrf.mxu3  ;;  %vm1144_vm3 = vmor %vm1142_vm2, %vm1143_vm1 }
 0x219   :  { %v1138_v56 = vmul.f32 %v5133_v25, %v1137_v38 }
 0x21a   :  { %9003 = vst [vmem:[#allocation69_spill] sm:$0xff] %v6276_v37  ;;  %v822_v36 = vsel %vm725_vm0, %v6276_v37, 0.0  ;;  %v648_v18 = vadd.f32 %v5686_v59, %v583_v7  ;;  %v586_v7 = vmul.f32 %v5680_v54, %v6081_v58 }
 0x21b   :  { %v488_v17 = vpop.f32.mrf.mxu0  ;;  %v823_v35 = vadd.f32 %v822_v36, %v821_v40  ;;  %v1139_v15 = vmul.f32 0.5, %v1138_v56 }
 0x21c   :  { %v579_v0 = vmul.f32 %v5680_v54, %v488_v17 }
 0x21d   :  { %v1140_v40 = vsub.f32 1.5, %v1139_v15 }
 0x21e   :  { %v644_v6 = vadd.f32 %v5686_v59, %v579_v0 }
 0x21f   :  { %v1141_v56 = vmul.f32 %v5133_v25, %v1140_v40 }
 0x220   :  { %v6281_v11 = vmax.f32 %v644_v6, 0.0 }
 0x222   :  { %9004 = vst [vmem:[#allocation70_spill] sm:$0xff] %v6281_v11  ;;  %v824_v0 = vsel %vm725_vm0, %v6281_v11, 0.0 }
 0x223   :  { %v491_v42 = vpop.f32.mrf.mxu0  ;;  %v825_v29 = vadd.f32 %v824_v0, %v823_v35  ;;  %v6308_v35 = vmax.f32 %v648_v18, 0.0 }
 0x224   :  { %v580_v17 = vmul.f32 %v5680_v54, %v491_v42  ;;  %v647_v42 = vadd.f32 %v5686_v59, %v582_v47  ;;  %v649_v47 = vadd.f32 %v5686_v59, %v584_v4 }
 0x225   :  { %9007 = vst [vmem:[#allocation73_spill] sm:$0xff] %v6308_v35 }
 0x226   :  { %v645_v63 = vadd.f32 %v5686_v59, %v580_v17  ;;  %v585_v17 = vmul.f32 %v5680_v54, %v6031_v23  ;;  %v6323_v40 = vmax.f32 %v649_v47, 0.0 }
 0x228   :  { %v6291_v6 = vmax.f32 %v645_v63, 0.0  ;;  %v6302_v63 = vmax.f32 %v647_v42, 0.0  ;;  %v650_v15 = vadd.f32 %v5686_v59, %v585_v17  ;;  %v587_v42 = vmul.f32 %v5680_v54, %v6143_v14  ;;  %9009 = vst [vmem:[#allocation75_spill] sm:$0xff] %v6323_v40 }
 0x229   :  { %v588_v14 = vmul.f32 %v5680_v54, %v6200_v60  ;;  %v834_v60 = vsel %vm725_vm0, %v6323_v40, 0.0 }
 0x22a   :  { %9005 = vst [vmem:[#allocation71_spill] sm:$0xff] %v6291_v6  ;;  %v826_v36 = vsel %vm725_vm0, %v6291_v6, 0.0  ;;  %v830_v58 = vsel %vm725_vm0, %v6302_v63, 0.0 }
 0x22b   :  { %v493_v30 = vpop.f32.mrf.mxu0  ;;  %9006 = vst [vmem:[#allocation72_spill] sm:$0xff] %v6302_v63  ;;  %v827_v0 = vadd.f32 %v826_v36, %v825_v29  ;;  %v651_v29 = vadd.f32 %v5686_v59, %v586_v7  ;;  %v526_v7 = vpop.f32.mrf.mxu3 }
 0x22c   :  { %v581_v38 = vmul.f32 %v5680_v54, %v493_v30  ;;  %v6313_v30 = vsel %vm1144_vm3, %v5133_v25, %v1141_v56  ;;  %v6332_v56 = vmax.f32 %v650_v15, 0.0  ;;  %v590_v15 = vmul.f32 %v5680_v54, %v6258_v55 }
 0x22d   :  { %v1156_v48 = vmul.f32 %v6313_v30, %v5920_v16  ;;  %v1157_v18 = vmul.f32 %v6313_v30, %v5932_v24  ;;  %v652_v16 = vadd.f32 %v5686_v59, %v587_v42  ;;  %v589_v24 = vmul.f32 %v5680_v54, %v6238_v19 }
 0x22e   :  { %v646_v23 = vadd.f32 %v5686_v59, %v581_v38  ;;  %v832_v38 = vsel %vm725_vm0, %v6308_v35, 0.0  ;;  %9010 = vst [vmem:[#allocation76_spill] sm:$0xff] %v6332_v56  ;;  %v836_v42 = vsel %vm725_vm0, %v6332_v56, 0.0  ;;  %v592_v55 = vmul.f32 %v5680_v54, %v521_v34 }
 0x22f   :  { %v1364_v17 = vpack.c.bf16 %v1157_v18, %v1156_v48  ;;  %v6347_v18 = vmax.f32 %v652_v16, 0.0  ;;  %v654_v19 = vadd.f32 %v5686_v59, %v589_v24  ;;  %v594_v34 = vmul.f32 %v5680_v54, %v526_v7 }
 0x230   :  { %v6315_v4 = vmax.f32 %v646_v23, 0.0  ;;  %v6340_v23 = vmax.f32 %v651_v29, 0.0 }
 0x231   :  { %4926 = vmatmul.msk.bf16.vlgmr.msra.gmra.mxu1 %vm725_vm0, %v1364_v17  ;;  %9012 = vst [vmem:[#allocation78_spill] sm:$0xff] %v6347_v18  ;;  %v6360_v16 = vmax.f32 %v654_v19, 0.0  ;;  %v1159_v19 = vmul.f32 %v6313_v30, %v5936_v27 }
 0x232   :  { %9008 = vst [vmem:[#allocation74_spill] sm:$0xff] %v6315_v4  ;;  %v828_v25 = vsel %vm725_vm0, %v6315_v4, 0.0  ;;  %v838_v29 = vsel %vm725_vm0, %v6340_v23, 0.0 }
 0x233   :  { %v829_v36 = vadd.f32 %v828_v25, %v827_v0  ;;  %9011 = vst [vmem:[#allocation77_spill] sm:$0xff] %v6340_v23  ;;  %v653_v0 = vadd.f32 %v5686_v59, %v588_v14  ;;  %v655_v14 = vadd.f32 %v5686_v59, %v590_v15  ;;  %v657_v15 = vadd.f32 %v5686_v59, %v592_v55 }
 0x234   :  { %9014 = vst [vmem:[#allocation80_spill] sm:$0xff] %v6360_v16 }
 0x235   :  { %v831_v47 = vadd.f32 %v830_v58, %v829_v36  ;;  %v591_v58 = vmul.f32 %v5680_v54, %v6272_v21  ;;  %v6354_v17 = vmax.f32 %v653_v0, 0.0  ;;  %v593_v21 = vmul.f32 %v5680_v54, %v523_v33 }
 0x236   :  { %v844_v33 = vsel %vm725_vm0, %v6360_v16, 0.0  ;;  %v6382_v55 = vmax.f32 %v657_v15, 0.0 }
 0x237   :  { %v833_v48 = vadd.f32 %v832_v38, %v831_v47  ;;  %9013 = vst [vmem:[#allocation79_spill] sm:$0xff] %v6354_v17  ;;  %v840_v38 = vsel %vm725_vm0, %v6347_v18, 0.0  ;;  %v656_v24 = vadd.f32 %v5686_v59, %v591_v58  ;;  %v842_v0 = vsel %vm725_vm0, %v6354_v17, 0.0 }
 0x238   :  { %9017 = vst [vmem:[#allocation83_spill] sm:$0xff] %v6382_v55 }
 0x239   :  { %v835_v25 = vadd.f32 %v834_v60, %v833_v48  ;;  %v528_v60 = vpop.f32.mrf.mxu3  ;;  %v6366_v48 = vmax.f32 %v655_v14, 0.0 }
 0x23a   :  { %v595_v14 = vmul.f32 %v5680_v54, %v528_v60 }
 0x23b   :  { %v837_v36 = vadd.f32 %v836_v42, %v835_v25  ;;  %9015 = vst [vmem:[#allocation81_spill] sm:$0xff] %v6366_v48  ;;  %v1158_v42 = vmul.f32 %v6313_v30, %v5924_v57  ;;  %v6376_v25 = vmax.f32 %v656_v24, 0.0  ;;  %v846_v7 = vsel %vm725_vm0, %v6366_v48, 0.0 }
 0x23c   :  { %v659_v57 = vadd.f32 %v5686_v59, %v594_v34  ;;  %v660_v24 = vadd.f32 %v5686_v59, %v595_v14 }
 0x23d   :  { %v839_v47 = vadd.f32 %v838_v29, %v837_v36  ;;  %9016 = vst [vmem:[#allocation82_spill] sm:$0xff] %v6376_v25  ;;  %v658_v29 = vadd.f32 %v5686_v59, %v593_v21  ;;  %v1365_v12 = vpack.c.bf16 %v1159_v19, %v1158_v42  ;;  %v850_v21 = vsel %vm725_vm0, %v6382_v55, 0.0 }
 0x23e   :  { %v6393_v60 = vmax.f32 %v659_v57, 0.0  ;;  %v6397_v34 = vmax.f32 %v660_v24, 0.0 }
 0x23f   :  { %v841_v58 = vadd.f32 %v840_v38, %v839_v47  ;;  %v848_v38 = vsel %vm725_vm0, %v6376_v25, 0.0  ;;  %v6387_v47 = vmax.f32 %v658_v29, 0.0  ;;  %v1161_v29 = vmul.f32 %v6313_v30, %v5952_v62 }
 0x240   :  { %9019 = vst [vmem:[#allocation85_spill] sm:$0xff] %v6393_v60  ;;  %v854_v19 = vsel %vm725_vm0, %v6393_v60, 0.0  ;;  %v856_v59 = vsel %vm725_vm0, %v6397_v34, 0.0 }
 0x241   :  { %v843_v36 = vadd.f32 %v842_v0, %v841_v58  ;;  %9018 = vst [vmem:[#allocation84_spill] sm:$0xff] %v6387_v47  ;;  %4927 = vmatmul.msk.bf16.gmra.mxu1 %vm725_vm0, %v1365_v12  ;;  %v852_v15 = vsel %vm725_vm0, %v6387_v47, 0.0 }
 0x242   :  { %9020 = vst [vmem:[#allocation86_spill] sm:$0xff] %v6397_v34 }
 0x243   :  { %v845_v27 = vadd.f32 %v844_v33, %v843_v36  ;;  %v1160_v33 = vmul.f32 %v6313_v30, %v5942_v31 }
 0x245   :  { %v847_v54 = vadd.f32 %v846_v7, %v845_v27  ;;  %v1366_v7 = vpack.c.bf16 %v1161_v29, %v1160_v33 }
 0x247   :  { %v849_v0 = vadd.f32 %v848_v38, %v847_v54  ;;  %v1162_v54 = vmul.f32 %v6313_v30, %v5958_v46 }
 0x249   :  { %v851_v42 = vadd.f32 %v850_v21, %v849_v0  ;;  %v1163_v21 = vmul.f32 %v6313_v30, %v5967_v2  ;;  %v1164_v2 = vmul.f32 %v6313_v30, %v5974_v28 }
 0x24b   :  { %v853_v58 = vadd.f32 %v852_v15, %v851_v42  ;;  %v1367_v31 = vpack.c.bf16 %v1163_v21, %v1162_v54 }
 0x24d   :  { %v855_v12 = vadd.f32 %v854_v19, %v853_v58  ;;  %v1165_v19 = vmul.f32 %v6313_v30, %v5981_v32 }
 0x24f   :  { %v857_v14 = vadd.f32 %v856_v59, %v855_v12  ;;  %v1368_v29 = vpack.c.bf16 %v1165_v19, %v1164_v2 }
 0x251   :  { %v858_v36 = vrot.slane %v857_v14, 4  ;;  %4928 = vmatmul.msk.bf16.gmra.mxu1 %vm725_vm0, %v1366_v7 }
 0x253   :  { %v859_v57 = vadd.f32 %v858_v36, %v857_v14 }
 0x255   :  { %v860_v27 = vrot.slane %v859_v57, 2 }
 0x257   :  { %v861_v38 = vadd.f32 %v860_v27, %v859_v57 }
 0x259   :  { %v862_v24 = vrot.slane %v861_v38, 1 }
 0x25b   :  { %v863_v0 = vadd.f32 %v862_v24, %v861_v38 }
 0x25d   :  { %v6413_v62 = vmul.f32 0.00390625, %v863_v0 }
 0x25f   :  { %v6417_v15 = vsub.f32 %v6064_v49, %v6413_v62  ;;  %v6421_v42 = vsub.f32 %v6071_v61, %v6413_v62  ;;  %v6425_v46 = vsub.f32 %v6101_v5, %v6413_v62  ;;  %v6433_v58 = vsub.f32 %v6124_v41, %v6413_v62 }
 0x260   :  { %v6441_v33 = vsub.f32 %v6147_v9, %v6413_v62  ;;  %v6447_v32 = vsub.f32 %v6171_v50, %v6413_v62  ;;  %v6455_v57 = vsub.f32 %v6195_v52, %v6413_v62  ;;  %v6463_v54 = vsub.f32 %v6218_v3, %v6413_v62  ;;  %v7110_v9 = vld [vmem:[%s8822_s5] ss:$0 sm:$0xff] }
 0x261   :  { %4929 = vmatmul.msk.bf16.gmra.mxu1 %vm725_vm0, %v1367_v31  ;;  %v962_v59 = vmul.f32 %v6417_v15, %v6417_v15  ;;  %v963_v12 = vmul.f32 %v6421_v42, %v6421_v42  ;;  %v964_v28 = vmul.f32 %v6425_v46, %v6425_v46  ;;  %v965_v14 = vmul.f32 %v6433_v58, %v6433_v58 }
 0x262   :  { %v966_v27 = vmul.f32 %v6441_v33, %v6441_v33  ;;  %v967_v21 = vmul.f32 %v6447_v32, %v6447_v32  ;;  %v6470_v2 = vsub.f32 %v6231_v53, %v6413_v62  ;;  %v968_v19 = vmul.f32 %v6455_v57, %v6455_v57 }
 0x263   :  { %v1063_v36 = vsel %vm725_vm0, %v962_v59, 0.0  ;;  %v1064_v7 = vsel %vm725_vm0, %v963_v12, 0.0  ;;  %v1066_v38 = vsel %vm725_vm0, %v964_v28, 0.0  ;;  %v1068_v0 = vsel %vm725_vm0, %v965_v14, 0.0 }
 0x264   :  { %v1065_v24 = vadd.f32 %v1064_v7, %v1063_v36  ;;  %v1070_v59 = vsel %vm725_vm0, %v966_v27, 0.0  ;;  %v6477_v28 = vsub.f32 %v6242_v22, %v6413_v62  ;;  %v1072_v14 = vsel %vm725_vm0, %v967_v21, 0.0 }
 0x265   :  { %v6484_v7 = vsub.f32 %v6248_v8, %v6413_v62  ;;  %v1074_v27 = vsel %vm725_vm0, %v968_v19, 0.0  ;;  %v6502_v19 = vsub.f32 %v6262_v13, %v6413_v62  ;;  %v6516_v13 = vsub.f32 %v6276_v37, %v6413_v62 }
 0x266   :  { %v1067_v31 = vadd.f32 %v1066_v38, %v1065_v24  ;;  %v970_v38 = vmul.f32 %v6470_v2, %v6470_v2  ;;  %v1166_v24 = vmul.f32 %v6313_v30, %v5990_v51  ;;  %v971_v21 = vmul.f32 %v6477_v28, %v6477_v28 }
 0x267   :  { %v972_v51 = vmul.f32 %v6484_v7, %v6484_v7  ;;  %v974_v22 = vmul.f32 %v6502_v19, %v6502_v19 }
 0x268   :  { %v1069_v12 = vadd.f32 %v1068_v0, %v1067_v31  ;;  %v6493_v31 = vsub.f32 %v6254_v45, %v6413_v62  ;;  %v6509_v45 = vsub.f32 %v6268_v20, %v6413_v62 }
 0x26a   :  { %v1071_v36 = vadd.f32 %v1070_v59, %v1069_v12  ;;  %v1167_v12 = vmul.f32 %v6313_v30, %v5999_v43  ;;  %v1080_v43 = vsel %vm725_vm0, %v971_v21, 0.0 }
 0x26c   :  { %v1073_v0 = vadd.f32 %v1072_v14, %v1071_v36  ;;  %v1078_v14 = vsel %vm725_vm0, %v970_v38, 0.0 }
 0x26e   :  { %v1075_v8 = vadd.f32 %v1074_v27, %v1073_v0  ;;  %v1369_v27 = vpack.c.bf16 %v1167_v12, %v1166_v24  ;;  %v975_v24 = vmul.f32 %v6509_v45, %v6509_v45 }
 0x271   :  { %4930 = vmatmul.msk.bf16.gmra.mxu1 %vm725_vm0, %v1368_v29  ;;  %v969_v29 = vmul.f32 %v6463_v54, %v6463_v54 }
 0x273   :  { %v1076_v59 = vsel %vm725_vm0, %v969_v29, 0.0  ;;  %v973_v29 = vmul.f32 %v6493_v31, %v6493_v31 }
 0x274   :  { %v1077_v36 = vadd.f32 %v1076_v59, %v1075_v8  ;;  %v1082_v8 = vsel %vm725_vm0, %v972_v51, 0.0  ;;  %v6524_v59 = vsub.f32 %v6281_v11, %v6413_v62  ;;  %v976_v51 = vmul.f32 %v6516_v13, %v6516_v13 }
 0x275   :  { %v1084_v21 = vsel %vm725_vm0, %v973_v29, 0.0  ;;  %v1088_v29 = vsel %vm725_vm0, %v975_v24, 0.0  ;;  %v1169_v24 = vmul.f32 %v6313_v30, %v6013_v39 }
 0x276   :  { %v1079_v0 = vadd.f32 %v1078_v14, %v1077_v36  ;;  %v6531_v14 = vsub.f32 %v6291_v6, %v6413_v62  ;;  %v1086_v36 = vsel %vm725_vm0, %v974_v22, 0.0  ;;  %v1090_v22 = vsel %vm725_vm0, %v976_v51, 0.0 }
 0x277   :  { %v6563_v51 = vsub.f32 %v6323_v40, %v6413_v62  ;;  %v6577_v40 = vsub.f32 %v6340_v23, %v6413_v62 }
 0x278   :  { %v1081_v38 = vadd.f32 %v1080_v43, %v1079_v0  ;;  %v977_v0 = vmul.f32 %v6524_v59, %v6524_v59  ;;  %v978_v6 = vmul.f32 %v6531_v14, %v6531_v14 }
 0x27a   :  { %v1083_v12 = vadd.f32 %v1082_v8, %v1081_v38  ;;  %v6545_v38 = vsub.f32 %v6302_v63, %v6413_v62  ;;  %v1092_v11 = vsel %vm725_vm0, %v977_v0, 0.0  ;;  %v6570_v0 = vsub.f32 %v6332_v56, %v6413_v62  ;;  %v9022_v56 = vld [vmem:[#allocation41_spill] sm:$0xff] }
 0x27c   :  { %v1085_v43 = vadd.f32 %v1084_v21, %v1083_v12  ;;  %v1168_v21 = vmul.f32 %v6313_v30, %v6006_v1  ;;  %v980_v1 = vmul.f32 %v6545_v38, %v6545_v38 }
 0x27e   :  { %v1087_v8 = vadd.f32 %v1086_v36, %v1085_v43  ;;  %v6559_v36 = vsub.f32 %v6308_v35, %v6413_v62  ;;  %v1370_v63 = vpack.c.bf16 %v1169_v24, %v1168_v21  ;;  %v982_v35 = vmul.f32 %v6563_v51, %v6563_v51 }
 0x27f   :  { %v983_v21 = vmul.f32 %v6570_v0, %v6570_v0 }
 0x280   :  { %v1089_v12 = vadd.f32 %v1088_v29, %v1087_v8  ;;  %v1094_v29 = vsel %vm725_vm0, %v978_v6, 0.0 }
 0x281   :  { %4931 = vmatmul.msk.bf16.gmra.mxu1 %vm725_vm0, %v1369_v27  ;;  %v6538_v27 = vsub.f32 %v6315_v4, %v6413_v62 }
 0x282   :  { %v1091_v43 = vadd.f32 %v1090_v22, %v1089_v12  ;;  %v981_v22 = vmul.f32 %v6559_v36, %v6559_v36 }
 0x283   :  { %v979_v4 = vmul.f32 %v6538_v27, %v6538_v27 }
 0x284   :  { %v1093_v8 = vadd.f32 %v1092_v11, %v1091_v43  ;;  %v1098_v11 = vsel %vm725_vm0, %v980_v1, 0.0  ;;  %v1100_v24 = vsel %vm725_vm0, %v981_v22, 0.0  ;;  %v984_v1 = vmul.f32 %v6577_v40, %v6577_v40 }
 0x285   :  { %v1096_v39 = vsel %vm725_vm0, %v979_v4, 0.0  ;;  %v6585_v4 = vsub.f32 %v6347_v18, %v6413_v62  ;;  %v1104_v22 = vsel %vm725_vm0, %v983_v21, 0.0 }
 0x286   :  { %v1095_v12 = vadd.f32 %v1094_v29, %v1093_v8  ;;  %v6592_v29 = vsub.f32 %v6354_v17, %v6413_v62 }
 0x288   :  { %v1097_v6 = vadd.f32 %v1096_v39, %v1095_v12  ;;  %v6599_v39 = vsub.f32 %v6360_v16, %v6413_v62  ;;  %v985_v12 = vmul.f32 %v6585_v4, %v6585_v4  ;;  %v986_v17 = vmul.f32 %v6592_v29, %v6592_v29 }
 0x289   :  { %v6615_v16 = vsub.f32 %v6376_v25, %v6413_v62  ;;  %v6631_v25 = vsub.f32 %v6387_v47, %v6413_v62 }
 0x28a   :  { %v1099_v43 = vadd.f32 %v1098_v11, %v1097_v6  ;;  %v6606_v6 = vsub.f32 %v6366_v48, %v6413_v62  ;;  %v987_v21 = vmul.f32 %v6599_v39, %v6599_v39 }
 0x28c   :  { %v1101_v8 = vadd.f32 %v1100_v24, %v1099_v43  ;;  %v1170_v24 = vmul.f32 %v6313_v30, %v6020_v44  ;;  %v988_v44 = vmul.f32 %v6606_v6, %v6606_v6 }
 0x291   :  { %4932 = vmatmul.msk.bf16.gmra.mxu1 %vm725_vm0, %v1370_v63  ;;  %v1102_v63 = vsel %vm725_vm0, %v982_v35, 0.0  ;;  %v1106_v35 = vsel %vm725_vm0, %v984_v1, 0.0  ;;  %v6624_v1 = vsub.f32 %v6382_v55, %v6413_v62  ;;  %v6638_v55 = vsub.f32 %v6393_v60, %v6413_v62 }
 0x292   :  { %v1103_v11 = vadd.f32 %v1102_v63, %v1101_v8  ;;  %v1108_v63 = vsel %vm725_vm0, %v985_v12, 0.0  ;;  %v1171_v8 = vmul.f32 %v6313_v30, %v6035_v10  ;;  %v989_v12 = vmul.f32 %v6615_v16, %v6615_v16 }
 0x293   :  { %v1112_v10 = vsel %vm725_vm0, %v987_v21, 0.0  ;;  %v990_v18 = vmul.f32 %v6624_v1, %v6624_v1 }
 0x294   :  { %v1105_v43 = vadd.f32 %v1104_v22, %v1103_v11  ;;  %v1110_v22 = vsel %vm725_vm0, %v986_v17, 0.0  ;;  %v1114_v17 = vsel %vm725_vm0, %v988_v44, 0.0  ;;  %v1116_v21 = vsel %vm725_vm0, %v989_v12, 0.0 }
 0x295   :  { %v1172_v12 = vmul.f32 %v6313_v30, %v6042_v26 }
 0x296   :  { %v1107_v48 = vadd.f32 %v1106_v35, %v1105_v43  ;;  %v1371_v35 = vpack.c.bf16 %v1171_v8, %v1170_v24  ;;  %v991_v24 = vmul.f32 %v6631_v25, %v6631_v25 }
 0x298   :  { %v1109_v11 = vadd.f32 %v1108_v63, %v1107_v48  ;;  %v6646_v63 = vsub.f32 %v6397_v34, %v6413_v62 }
 0x29a   :  { %v1111_v43 = vadd.f32 %v1110_v22, %v1109_v11  ;;  %v992_v22 = vmul.f32 %v6638_v55, %v6638_v55  ;;  %v1118_v11 = vsel %vm725_vm0, %v990_v18, 0.0  ;;  %v993_v44 = vmul.f32 %v6646_v63, %v6646_v63 }
 0x29c   :  { %v1113_v48 = vadd.f32 %v1112_v10, %v1111_v43  ;;  %v1120_v10 = vsel %vm725_vm0, %v991_v24, 0.0  ;;  %v1122_v62 = vsel %vm725_vm0, %v992_v22, 0.0  ;;  %v1124_v34 = vsel %vm725_vm0, %v993_v44, 0.0 }
 0x29e   :  { %v1115_v8 = vadd.f32 %v1114_v17, %v1113_v48  ;;  %v9021_v17 = vld [vmem:[#allocation40_spill] sm:$0xff] }
 0x29f   :  { %v1173_v48 = vmul.f32 %v6313_v30, %v9021_v17 }
 0x2a0   :  { %v1117_v60 = vadd.f32 %v1116_v21, %v1115_v8  ;;  %v6666_v8 = vld [vmem:[%s8822_s5] ss:$0 sm:$0xff] }
 0x2a1   :  { %4933 = vmatmul.msk.bf16.gmra.mxu1 %vm725_vm0, %v1371_v35 }
 0x2a2   :  { %v1119_v35 = vadd.f32 %v1118_v11, %v1117_v60  ;;  %v1372_v60 = vpack.c.bf16 %v1173_v48, %v1172_v12  ;;  %v1174_v12 = vmul.f32 %v6313_v30, %v9022_v56  ;;  %v9023_v48 = vld [vmem:[#allocation43_spill] sm:$0xff] }
 0x2a4   :  { %v1121_v43 = vadd.f32 %v1120_v10, %v1119_v35 }
 0x2a6   :  { %v1123_v47 = vadd.f32 %v1122_v62, %v1121_v43 }
 0x2a8   :  { %v1125_v21 = vadd.f32 %v1124_v34, %v1123_v47 }
 0x2aa   :  { %v1126_v24 = vrot.slane %v1125_v21, 4 }
 0x2ac   :  { %v1127_v22 = vadd.f32 %v1126_v24, %v1125_v21 }
 0x2ae   :  { %v1521_v18 = vpop.f32.mrf.mxu1  ;;  %v1128_v44 = vrot.slane %v1127_v22, 2 }
 0x2af   :  { %v1522_v11 = vadd.f32 %v6666_v8, %v1521_v18 }
 0x2b0   :  { %v1129_v10 = vadd.f32 %v1128_v44, %v1127_v22 }
 0x2b1   :  { %4934 = vmatmul.msk.bf16.gmra.mxu1 %vm725_vm0, %v1372_v60  ;;  %v1681_v35 = vpack.c.bf16 %v1522_v11, %v1522_v11  ;;  %v1175_v60 = vmul.f32 %v6313_v30, %v9023_v48 }
 0x2b2   :  { %v1130_v43 = vrot.slane %v1129_v10, 1 }
 0x2b3   :  { %v1777_v17 = vunpack.c.l.b16 %v1681_v35  ;;  %v1373_v22 = vpack.c.bf16 %v1175_v60, %v1174_v12 }
 0x2b4   :  { %v1131_v34 = vadd.f32 %v1130_v43, %v1129_v10 }
 0x2b6   :  { %v1523_v26 = vpop.f32.mrf.mxu1  ;;  %v1133_v21 = vmul.f32 0.00390625, %v1131_v34  ;;  %v9025_v34 = vld [vmem:[#allocation46_spill] sm:$0xff] }
 0x2b7   :  { %v1524_v62 = vadd.f32 %v6666_v8, %v1523_v26 }
 0x2b8   :  { %v1135_v37 = vadd.f32 1e-06, %v1133_v21 }
 0x2b9   :  { %v1682_v47 = vpack.c.bf16 %v1524_v62, %v1524_v62 }
 0x2ba   :  { %5134 = vrsqrt.f32 %v1135_v37  ;;  %vm1152_vm4 = vweird.f32 %v1135_v37 }
 0x2bb   :  { %v1778_v23 = vunpack.c.l.b16 %v1682_v47  ;;  %v9024_v47 = vld [vmem:[#allocation45_spill] sm:$0xff] }
 0x2bd   :  { %v6675_v24 = vpack.c.b16 %v1778_v23, %v1777_v17  ;;  %v1176_v23 = vmul.f32 %v6313_v30, %v9024_v47  ;;  %v1177_v17 = vmul.f32 %v6313_v30, %v9025_v34 }
 0x2be   :  { %v1526_v18 = vpop.f32.mrf.mxu1 }
 0x2bf   :  { %v1527_v11 = vadd.f32 %v6666_v8, %v1526_v18 }
 0x2c0   :  { %v5135_v44 = vpop.eup %5134 }
 0x2c1   :  { %4935 = vmatmul.msk.bf16.gmra.mxu1 %vm725_vm0, %v1373_v22  ;;  %v1683_v10 = vpack.c.bf16 %v1527_v11, %v1527_v11  ;;  %v1147_v56 = vmul.f32 %v5135_v44, %v1135_v37  ;;  %vm1153_vm5 = vweird.f32 %v5135_v44  ;;  %v1374_v11 = vpack.c.bf16 %v1177_v17, %v1176_v23 }
 0x2c2   :  { %vm1154_vm6 = vmor %vm1152_vm4, %vm1153_vm5 }
 0x2c3   :  { %v1148_v43 = vmul.f32 %v5135_v44, %v1147_v56  ;;  %v1779_v12 = vunpack.c.l.b16 %v1683_v10 }
 0x2c5   :  { %v1149_v60 = vmul.f32 0.5, %v1148_v43 }
 0x2c6   :  { %v1528_v26 = vpop.f32.mrf.mxu1 }
 0x2c7   :  { %v1529_v35 = vadd.f32 %v6666_v8, %v1528_v26  ;;  %v1150_v18 = vsub.f32 1.5, %v1149_v60  ;;  %v9027_v60 = vld [vmem:[#allocation49_spill] sm:$0xff] }
 0x2c9   :  { %v1684_v62 = vpack.c.bf16 %v1529_v35, %v1529_v35  ;;  %v1151_v26 = vmul.f32 %v5135_v44, %v1150_v18 }
 0x2cb   :  { %v1780_v48 = vunpack.c.l.b16 %v1684_v62  ;;  %v6687_v35 = vsel %vm1154_vm6, %v5135_v44, %v1151_v26  ;;  %v9026_v44 = vld [vmem:[#allocation48_spill] sm:$0xff] }
 0x2cc   :  { %v1206_v56 = vmul.f32 %v6687_v35, %v6545_v38  ;;  %v1207_v37 = vmul.f32 %v6687_v35, %v6559_v36  ;;  %v1179_v38 = vmul.f32 %v6313_v30, %v9027_v60 }
 0x2cd   :  { %v6684_v21 = vpack.c.b16 %v1780_v48, %v1779_v12  ;;  %v1178_v48 = vmul.f32 %v6313_v30, %v9026_v44 }
 0x2ce   :  { %v1531_v22 = vpop.f32.mrf.mxu1  ;;  %v1389_v62 = vpack.c.bf16 %v1207_v37, %v1206_v56 }
 0x2cf   :  { %v1532_v10 = vadd.f32 %v6666_v8, %v1531_v22  ;;  %v1208_v22 = vmul.f32 %v6687_v35, %v6563_v51  ;;  %v1375_v26 = vpack.c.bf16 %v1179_v38, %v1178_v48  ;;  %v1210_v38 = vmul.f32 %v6687_v35, %v6577_v40 }
 0x2d0   :  { %4951 = vmatmul.msk.bf16.vlgmr.msra.gmra.mxu2 %vm725_vm0, %v1389_v62  ;;  %v1212_v40 = vmul.f32 %v6687_v35, %v6592_v29 }
 0x2d1   :  { %4936 = vmatmul.msk.bf16.gmra.mxu1 %vm725_vm0, %v1374_v11  ;;  %v1685_v47 = vpack.c.bf16 %v1532_v10, %v1532_v10  ;;  %v1209_v11 = vmul.f32 %v6687_v35, %v6570_v0 }
 0x2d3   :  { %v1781_v17 = vunpack.c.l.b16 %v1685_v47  ;;  %v1390_v56 = vpack.c.bf16 %v1209_v11, %v1208_v22 }
 0x2d6   :  { %v1533_v43 = vpop.f32.mrf.mxu1 }
 0x2d7   :  { %v1534_v23 = vadd.f32 %v6666_v8, %v1533_v43 }
 0x2d9   :  { %v1686_v34 = vpack.c.bf16 %v1534_v23, %v1534_v23 }
 0x2db   :  { %v1782_v12 = vunpack.c.l.b16 %v1686_v34 }
 0x2dd   :  { %v6700_v18 = vpack.c.b16 %v1782_v12, %v1781_v17  ;;  %v9028_v17 = vld [vmem:[#allocation51_spill] sm:$0xff]  ;;  %v9029_v12 = vld [vmem:[#allocation52_spill] sm:$0xff] }
 0x2de   :  { %v1536_v36 = vpop.f32.mrf.mxu1  ;;  %v1180_v51 = vmul.f32 %v6313_v30, %v9028_v17  ;;  %v1181_v0 = vmul.f32 %v6313_v30, %v9029_v12 }
 0x2df   :  { %v1537_v37 = vadd.f32 %v6666_v8, %v1536_v36  ;;  %v1211_v36 = vmul.f32 %v6687_v35, %v6585_v4  ;;  %v1213_v4 = vmul.f32 %v6687_v35, %v6599_v39 }
 0x2e0   :  { %4952 = vmatmul.msk.bf16.gmra.mxu2 %vm725_vm0, %v1390_v56  ;;  %v1376_v60 = vpack.c.bf16 %v1181_v0, %v1180_v51 }
 0x2e1   :  { %4937 = vmatmul.msk.bf16.gmra.mxu1 %vm725_vm0, %v1375_v26  ;;  %v1687_v62 = vpack.c.bf16 %v1537_v37, %v1537_v37  ;;  %v1391_v22 = vpack.c.bf16 %v1211_v36, %v1210_v38  ;;  %v9030_v26 = vld [vmem:[#allocation54_spill] sm:$0xff]  ;;  %v9031_v37 = vld [vmem:[#allocation55_spill] sm:$0xff]  ;;  %v9032_v38 = vld [vmem:[#allocation57_spill] sm:$0xff] }
 0x2e2   :  { %v1182_v56 = vmul.f32 %v6313_v30, %v9030_v26  ;;  %v1184_v29 = vmul.f32 %v6313_v30, %v9032_v38  ;;  %v9033_v36 = vld [vmem:[#allocation58_spill] sm:$0xff]  ;;  %9045 = vst [vmem:[#allocation54_spill] sm:$0xff] %v7110_v9 }
 0x2e3   :  { %v1783_v23 = vunpack.c.l.b16 %v1687_v62  ;;  %v1185_v39 = vmul.f32 %v6313_v30, %v9033_v36  ;;  %v1217_v36 = vmul.f32 %v6687_v35, %v6631_v25 }
 0x2e6   :  { %v1538_v10 = vpop.f32.mrf.mxu1 }
 0x2e7   :  { %v1539_v43 = vadd.f32 %v6666_v8, %v1538_v10  ;;  %v1183_v10 = vmul.f32 %v6313_v30, %v9031_v37  ;;  %v1214_v37 = vmul.f32 %v6687_v35, %v6606_v6 }
 0x2e9   :  { %v1688_v47 = vpack.c.bf16 %v1539_v43, %v1539_v43  ;;  %v1377_v43 = vpack.c.bf16 %v1183_v10, %v1182_v56  ;;  %v1378_v56 = vpack.c.bf16 %v1185_v39, %v1184_v29  ;;  %v1215_v10 = vmul.f32 %v6687_v35, %v6615_v16 }
 0x2ea   :  { %v1216_v29 = vmul.f32 %v6687_v35, %v6624_v1  ;;  %v1188_v1 = vmul.f32 %v6687_v35, %v6417_v15  ;;  %v1219_v15 = vmul.f32 %v6687_v35, %v6646_v63 }
 0x2eb   :  { %v1784_v34 = vunpack.c.l.b16 %v1688_v47 }
 0x2ed   :  { %v6714_v44 = vpack.c.b16 %v1784_v34, %v1783_v23  ;;  %v1392_v23 = vpack.c.bf16 %v1213_v4, %v1212_v40 }
 0x2ee   :  { %v1541_v48 = vpop.f32.mrf.mxu1 }
 0x2f0   :  { %4953 = vmatmul.msk.bf16.gmra.mxu2 %vm725_vm0, %v1391_v22 }
 0x2f1   :  { %4938 = vmatmul.msk.bf16.gmra.mxu1 %vm725_vm0, %v1376_v60 }
 0x2f6   :  { %v1543_v11 = vpop.f32.mrf.mxu1 }
 0x2fe   :  { %v1546_v62 = vpop.f32.mrf.mxu1 }
 0x2ff   :  { %v1547_v47 = vadd.f32 %v6666_v8, %v1546_v62 }
 0x300   :  { %4954 = vmatmul.msk.bf16.gmra.mxu2 %vm725_vm0, %v1392_v23 }
 0x301   :  { %4939 = vmatmul.msk.bf16.gmra.mxu1 %vm725_vm0, %v1377_v43  ;;  %v1691_v17 = vpack.c.bf16 %v1547_v47, %v1547_v47  ;;  %v1393_v43 = vpack.c.bf16 %v1215_v10, %v1214_v37  ;;  %v1544_v10 = vadd.f32 %v6666_v8, %v1543_v11 }
 0x303   :  { %v1787_v0 = vunpack.c.l.b16 %v1691_v17 }
 0x306   :  { %v1548_v34 = vpop.f32.mrf.mxu1 }
 0x307   :  { %v1549_v51 = vadd.f32 %v6666_v8, %v1548_v34 }
 0x309   :  { %v1692_v12 = vpack.c.bf16 %v1549_v51, %v1549_v51  ;;  %v9034_v51 = vld [vmem:[#allocation61_spill] sm:$0xff] }
 0x30a   :  { %v1186_v6 = vmul.f32 %v6313_v30, %v9034_v51  ;;  %v1218_v51 = vmul.f32 %v6687_v35, %v6638_v55 }
 0x30b   :  { %v1788_v60 = vunpack.c.l.b16 %v1692_v12  ;;  %v9035_v12 = vld [vmem:[#allocation60_spill] sm:$0xff] }
 0x30c   :  { %v1187_v16 = vmul.f32 %v6313_v30, %v9035_v12  ;;  %v1395_v12 = vpack.c.bf16 %v1219_v15, %v1218_v51 }
 0x30d   :  { %v6738_v22 = vpack.c.b16 %v1788_v60, %v1787_v0 }
 0x30e   :  { %v1551_v26 = vpop.f32.mrf.mxu1  ;;  %v1379_v38 = vpack.c.bf16 %v1187_v16, %v1186_v6 }
 0x30f   :  { %1835 = vrot.lane.b32.xlu2 %v6738_v22, %s5577_s25  ;;  %v1552_v62 = vadd.f32 %v6666_v8, %v1551_v26  ;;  %v1394_v26 = vpack.c.bf16 %v1217_v36, %v1216_v29 }
 0x310   :  { %4955 = vmatmul.msk.bf16.gmra.mxu2 %vm725_vm0, %v1393_v43  ;;  %v1542_v43 = vadd.f32 %v6666_v8, %v1541_v48 }
 0x311   :  { %4940 = vmatmul.msk.bf16.gmra.mxu1 %vm725_vm0, %v1378_v56  ;;  %v1693_v4 = vpack.c.bf16 %v1552_v62, %v1552_v62 }
 0x313   :  { %v1789_v34 = vunpack.c.l.b16 %v1693_v4  ;;  %v1189_v4 = vmul.f32 %v6687_v35, %v6421_v42 }
 0x315   :  { %v1380_v11 = vpack.c.bf16 %v1189_v4, %v1188_v1 }
 0x316   :  { %v1553_v40 = vpop.f32.mrf.mxu1 }
 0x317   :  { %v1554_v47 = vadd.f32 %v6666_v8, %v1553_v40 }
 0x319   :  { %v1694_v23 = vpack.c.bf16 %v1554_v47, %v1554_v47  ;;  %v1690_v47 = vpack.c.bf16 %v1544_v10, %v1544_v10 }
 0x31b   :  { %v1790_v17 = vunpack.c.l.b16 %v1694_v23  ;;  %v1786_v48 = vunpack.c.l.b16 %v1690_v47 }
 0x31d   :  { %v6754_v0 = vpack.c.b16 %v1790_v17, %v1789_v34  ;;  %v1689_v17 = vpack.c.bf16 %v1542_v43, %v1542_v43 }
 0x31e   :  { %v1556_v60 = vpop.f32.mrf.mxu1 }
 0x31f   :  { %1837 = vrot.lane.b32.xlu1 %v6754_v0, %s5577_s25  ;;  %v1557_v39 = vadd.f32 %v6666_v8, %v1556_v60  ;;  %v1785_v6 = vunpack.c.l.b16 %v1689_v17 }
 0x320   :  { %4956 = vmatmul.msk.bf16.gmra.mxu2 %vm725_vm0, %v1394_v26  ;;  %v1191_v26 = vmul.f32 %v6687_v35, %v6433_v58  ;;  %v1193_v58 = vmul.f32 %v6687_v35, %v6447_v32  ;;  %v1194_v32 = vmul.f32 %v6687_v35, %v6455_v57 }
 0x321   :  { %4941 = vmatmul.msk.bf16.gmra.mxu1 %vm725_vm0, %v1379_v38  ;;  %v1695_v30 = vpack.c.bf16 %v1557_v39, %v1557_v39  ;;  %v6782_v16 = vpack.c.b16 %v1786_v48, %v1785_v6  ;;  %v1190_v39 = vmul.f32 %v6687_v35, %v6425_v46  ;;  %v1192_v46 = vmul.f32 %v6687_v35, %v6441_v33 }
 0x323   :  { %v1791_v25 = vunpack.c.l.b16 %v1695_v30  ;;  %v1382_v17 = vpack.c.bf16 %v1193_v58, %v1192_v46 }
 0x326   :  { %v1558_v56 = vpop.f32.mrf.mxu1 }
 0x327   :  { %v1559_v37 = vadd.f32 %v6666_v8, %v1558_v56 }
 0x329   :  { %v1696_v62 = vpack.c.bf16 %v1559_v37, %v1559_v37  ;;  %v1381_v37 = vpack.c.bf16 %v1191_v26, %v1190_v39 }
 0x32b   :  { %v1792_v40 = vunpack.c.l.b16 %v1696_v62 }
 0x32d   :  { %v6772_v23 = vpack.c.b16 %v1792_v40, %v1791_v25 }
 0x32e   :  { %v1561_v34 = vpop.f32.mrf.mxu1 }
 0x32f   :  { %1839 = vrot.lane.b32.xlu0 %v6772_v23, %s5577_s25  ;;  %v1562_v42 = vadd.f32 %v6666_v8, %v1561_v34 }
 0x330   :  { %4957 = vmatmul.msk.bf16.gmra.mxu2 %vm725_vm0, %v1395_v12 }
 0x331   :  { %4942 = vmatmul.msk.bf16.gmra.mxu1 %vm725_vm0, %v1380_v11  ;;  %v1697_v38 = vpack.c.bf16 %v1562_v42, %v1562_v42 }
 0x333   :  { %v1793_v63 = vunpack.c.l.b16 %v1697_v38 }
 0x336   :  { %v1563_v60 = vpop.f32.mrf.mxu1 }
 0x337   :  { %v1564_v29 = vadd.f32 %v6666_v8, %v1563_v60  ;;  %1833 = vrot.lane.b32.xlu0 %v6782_v16, %s5577_s25  ;;  %v1195_v60 = vmul.f32 %v6687_v35, %v6463_v54  ;;  %v1196_v54 = vmul.f32 %v6687_v35, %v6470_v2  ;;  %v1199_v2 = vmul.f32 %v6687_v35, %v6493_v31 }
 0x338   :  { %v1200_v31 = vmul.f32 %v6687_v35, %v6502_v19 }
 0x339   :  { %v1698_v55 = vpack.c.bf16 %v1564_v29, %v1564_v29 }
 0x33b   :  { %v1794_v36 = vunpack.c.l.b16 %v1698_v55  ;;  %v1383_v55 = vpack.c.bf16 %v1195_v60, %v1194_v32  ;;  %v1201_v60 = vmul.f32 %v6687_v35, %v6509_v45 }
 0x33d   :  { %v6792_v56 = vpack.c.b16 %v1794_v36, %v1793_v63 }
 0x33e   :  { %v1566_v30 = vpop.f32.mrf.mxu1 }
 0x33f   :  { %9036 = vst [vmem:[#allocation40_spill] sm:$0xff] %v6792_v56  ;;  %v1567_v10 = vadd.f32 %v6666_v8, %v1566_v30 }
 0x341   :  { %4943 = vmatmul.msk.bf16.gmra.mxu1 %vm725_vm0, %v1381_v37  ;;  %v1699_v1 = vpack.c.bf16 %v1567_v10, %v1567_v10 }
 0x343   :  { %v1795_v40 = vunpack.c.l.b16 %v1699_v1  ;;  %v1197_v1 = vmul.f32 %v6687_v35, %v6477_v28 }
 0x346   :  { %v1568_v62 = vpop.f32.mrf.mxu1 }
 0x347   :  { %v1569_v43 = vadd.f32 %v6666_v8, %v1568_v62 }
 0x349   :  { %v1700_v25 = vpack.c.bf16 %v1569_v43, %v1569_v43 }
 0x34b   :  { %v1796_v4 = vunpack.c.l.b16 %v1700_v25 }
 0x34d   :  { %v6801_v47 = vpack.c.b16 %v1796_v4, %v1795_v40  ;;  %v1384_v40 = vpack.c.bf16 %v1197_v1, %v1196_v54  ;;  %v1202_v54 = vmul.f32 %v6687_v35, %v6516_v13 }
 0x34e   :  { %v1571_v34 = vpop.f32.mrf.mxu1 }
 0x34f   :  { %9037 = vst [vmem:[#allocation41_spill] sm:$0xff] %v6801_v47  ;;  %v1572_v11 = vadd.f32 %v6666_v8, %v1571_v34  ;;  %v1198_v34 = vmul.f32 %v6687_v35, %v6484_v7 }
 0x351   :  { %4944 = vmatmul.msk.bf16.gmra.mxu1 %vm725_vm0, %v1382_v17  ;;  %v1701_v15 = vpack.c.bf16 %v1572_v11, %v1572_v11  ;;  %v1385_v11 = vpack.c.bf16 %v1199_v2, %v1198_v34  ;;  %v1203_v2 = vmul.f32 %v6687_v35, %v6524_v59 }
 0x353   :  { %v6806_v42 = vpop.f32.mrf.mxu2  ;;  %v1797_v12 = vunpack.c.l.b16 %v1701_v15 }
 0x356   :  { %v1573_v51 = vpop.f32.mrf.mxu1 }
 0x357   :  { %v1574_v48 = vadd.f32 %v6666_v8, %v1573_v51 }
 0x359   :  { %v1702_v6 = vpack.c.bf16 %v1574_v48, %v1574_v48 }
 0x35b   :  { %v1798_v33 = vunpack.c.l.b16 %v1702_v6  ;;  %v6815_v63 = vpop.f32.mrf.mxu2 }
 0x35d   :  { %v6812_v38 = vpack.c.b16 %v1798_v33, %v1797_v12 }
 0x35e   :  { %v1576_v29 = vpop.f32.mrf.mxu1 }
 0x35f   :  { %v1577_v36 = vadd.f32 %v6666_v8, %v1576_v29 }
 0x361   :  { %4945 = vmatmul.msk.bf16.gmra.mxu1 %vm725_vm0, %v1383_v55  ;;  %v1703_v26 = vpack.c.bf16 %v1577_v36, %v1577_v36  ;;  %v1386_v36 = vpack.c.bf16 %v1201_v60, %v1200_v31 }
 0x363   :  { %v6819_v10 = vpop.f32.mrf.mxu2  ;;  %v1799_v57 = vunpack.c.l.b16 %v1703_v26 }
 0x366   :  { %v1578_v39 = vpop.f32.mrf.mxu1 }
 0x367   :  { %v1579_v30 = vadd.f32 %v6666_v8, %v1578_v39 }
 0x369   :  { %v1704_v37 = vpack.c.bf16 %v1579_v30, %v1579_v30 }
 0x36b   :  { %v1800_v62 = vunpack.c.l.b16 %v1704_v37  ;;  %v6828_v4 = vpop.f32.mrf.mxu2 }
 0x36d   :  { %v6825_v43 = vpack.c.b16 %v1800_v62, %v1799_v57 }
 0x36e   :  { %v1581_v25 = vpop.f32.mrf.mxu1 }
 0x36f   :  { %v1582_v1 = vadd.f32 %v6666_v8, %v1581_v25 }
 0x371   :  { %4946 = vmatmul.msk.bf16.gmra.mxu1 %vm725_vm0, %v1384_v40 }
 0x373   :  { %v6830_v58 = vpop.f32.mrf.mxu2 }
 0x376   :  { %v1583_v46 = vpop.f32.mrf.mxu1 }
 0x377   :  { %v1584_v45 = vadd.f32 %v6666_v8, %v1583_v46  ;;  %v1387_v46 = vpack.c.bf16 %v1203_v2, %v1202_v54  ;;  %v1205_v54 = vmul.f32 %v6687_v35, %v6538_v27 }
 0x37b   :  { %v6837_v28 = vpop.f32.mrf.mxu2 }
 0x37e   :  { %v1586_v17 = vpop.f32.mrf.mxu1 }
 0x37f   :  { %v1587_v51 = vadd.f32 %v6666_v8, %v1586_v17  ;;  %v1706_v17 = vpack.c.bf16 %v1584_v45, %v1584_v45 }
 0x381   :  { %4947 = vmatmul.msk.bf16.gmra.mxu1 %vm725_vm0, %v1385_v11  ;;  %v1707_v48 = vpack.c.bf16 %v1587_v51, %v1587_v51  ;;  %v1802_v13 = vunpack.c.l.b16 %v1706_v17  ;;  %v1836_v17 = vpop.permute.xlu2 %1835 }
 0x383   :  { %v6841_v33 = vpop.f32.mrf.mxu2  ;;  %v1803_v32 = vunpack.c.l.b16 %v1707_v48 }
 0x386   :  { %v1588_v15 = vpop.f32.mrf.mxu1 }
 0x387   :  { %v1589_v6 = vadd.f32 %v6666_v8, %v1588_v15  ;;  %v1705_v15 = vpack.c.bf16 %v1582_v1, %v1582_v1 }
 0x389   :  { %v1708_v12 = vpack.c.bf16 %v1589_v6, %v1589_v6  ;;  %v1801_v59 = vunpack.c.l.b16 %v1705_v15 }
 0x38b   :  { %v1804_v7 = vunpack.c.l.b16 %v1708_v12  ;;  %v6852_v39 = vpop.f32.mrf.mxu2 }
 0x38d   :  { %v6847_v29 = vpack.c.b16 %v1804_v7, %v1803_v32  ;;  %v6873_v32 = vpack.c.b16 %v1802_v13, %v1801_v59 }
 0x38e   :  { %v1591_v55 = vpop.f32.mrf.mxu1 }
 0x38f   :  { %1851 = vrot.lane.b32.xlu2 %v6847_v29, %s5577_s25  ;;  %v1592_v26 = vadd.f32 %v6666_v8, %v1591_v55 }
 0x391   :  { %4948 = vmatmul.msk.bf16.gmra.mxu1 %vm725_vm0, %v1386_v36  ;;  %v1709_v37 = vpack.c.bf16 %v1592_v26, %v1592_v26  ;;  %v1838_v31 = vpop.permute.xlu1 %1837 }
 0x393   :  { %v1666_v62 = vpop.f32.mrf.mxu2  ;;  %v1805_v40 = vunpack.c.l.b16 %v1709_v37  ;;  %v1924_v37 = vsel %vm725_vm0, %v1838_v31, 0 }
 0x394   :  { %v1667_v1 = vadd.f32 %v6666_v8, %v1666_v62  ;;  %v1921_v62 = vsel %vm725_vm0, %v1836_v17, 0 }
 0x396   :  { %v1593_v30 = vpop.f32.mrf.mxu1  ;;  %v1739_v15 = vpack.c.bf16 %v1667_v1, %v1667_v1 }
 0x397   :  { %v1594_v19 = vadd.f32 %v6666_v8, %v1593_v30  ;;  %1831 = vrot.lane.b32.xlu2 %v6714_v44, %s5577_s25 }
 0x398   :  { %v2189_v13 = vunpack.c.l.b16 %v1739_v15 }
 0x399   :  { %v1710_v57 = vpack.c.bf16 %v1594_v19, %v1594_v19 }
 0x39b   :  { %v1806_v34 = vunpack.c.l.b16 %v1710_v57  ;;  %v1668_v48 = vpop.f32.mrf.mxu2  ;;  %v1204_v57 = vmul.f32 %v6687_v35, %v6531_v14 }
 0x39c   :  { %v1669_v30 = vadd.f32 %v6666_v8, %v1668_v48 }
 0x39d   :  { %v6864_v11 = vpack.c.b16 %v1806_v34, %v1805_v40 }
 0x39e   :  { %v1596_v51 = vpop.f32.mrf.mxu1  ;;  %v1740_v34 = vpack.c.bf16 %v1669_v30, %v1669_v30 }
 0x39f   :  { %1853 = vrot.lane.b32.xlu1 %v6864_v11, %s5577_s25  ;;  %1845 = vrot.lane.b32.xlu2 %v6812_v38, %s5577_s25  ;;  %v1597_v12 = vadd.f32 %v6666_v8, %v1596_v51  ;;  %v1388_v51 = vpack.c.bf16 %v1205_v54, %v1204_v57 }
 0x3a0   :  { %v2190_v27 = vunpack.c.l.b16 %v1740_v34 }
 0x3a1   :  { %4949 = vmatmul.msk.bf16.gmra.mxu1 %vm725_vm0, %v1387_v46  ;;  %v1840_v25 = vpop.permute.xlu0 %1839  ;;  %v1711_v60 = vpack.c.bf16 %v1597_v12, %v1597_v12 }
 0x3a2   :  { %v1927_v6 = vsel %vm725_vm0, %v1840_v25, 0  ;;  %v6901_v48 = vpack.c.b16 %v2190_v27, %v2189_v13 }
 0x3a3   :  { %1953 = vmatpush.bf16.xpose.msrb.mxu2 %v1927_v6  ;;  %v1671_v26 = vpop.f32.mrf.mxu2  ;;  %v1807_v19 = vunpack.c.l.b16 %v1711_v60 }
 0x3a4   :  { %v1672_v35 = vadd.f32 %v6666_v8, %v1671_v26  ;;  %9038 = vst [vmem:[#allocation43_spill] sm:$0xff] %v6901_v48 }
 0x3a6   :  { %v1598_v7 = vpop.f32.mrf.mxu1  ;;  %v1741_v6 = vpack.c.bf16 %v1672_v35, %v1672_v35 }
 0x3a7   :  { %v1599_v55 = vadd.f32 %v6666_v8, %v1598_v7  ;;  %1849 = vrot.lane.b32.xlu1 %v6873_v32, %s5577_s25  ;;  %1825 = vrot.lane.b32.xlu2 %v6675_v24, %s5577_s25 }
 0x3a8   :  { %v2191_v31 = vunpack.c.l.b16 %v1741_v6 }
 0x3a9   :  { %v1712_v36 = vpack.c.bf16 %v1599_v55, %v1599_v55  ;;  %v1834_v12 = vpop.permute.xlu0 %1833 }
 0x3aa   :  { %v1918_v60 = vsel %vm725_vm0, %v1834_v12, 0 }
 0x3ab   :  { %v1808_v45 = vunpack.c.l.b16 %v1712_v36  ;;  %1954 = vmatpush.bf16.xpose.msrb.mxu2 %v1924_v37  ;;  %v1673_v14 = vpop.f32.mrf.mxu2 }
 0x3ac   :  { %v1674_v46 = vadd.f32 %v6666_v8, %v1673_v14 }
 0x3ad   :  { %v6887_v40 = vpack.c.b16 %v1808_v45, %v1807_v19 }
 0x3ae   :  { %v6889_v2 = vpop.f32.mrf.mxu1  ;;  %v1742_v25 = vpack.c.bf16 %v1674_v46, %v1674_v46 }
 0x3af   :  { %1855 = vrot.lane.b32.xlu0 %v6887_v40, %s5577_s25  ;;  %1829 = vrot.lane.b32.xlu1 %v6700_v18, %s5577_s25 }
 0x3b0   :  { %3521 = vrot.lane.b32.xlu2 %v6754_v0, %s5575_s26  ;;  %v2192_v7 = vunpack.c.l.b16 %v1742_v25 }
 0x3b1   :  { %4950 = vmatmul.msk.bf16.gmra.mxu1 %vm725_vm0, %v1388_v51 }
 0x3b2   :  { %v6912_v55 = vpack.c.b16 %v2192_v7, %v2191_v31 }
 0x3b3   :  { %1955 = vmatpush.bf16.xpose.msrb.mxu2 %v1921_v62  ;;  %v1676_v36 = vpop.f32.mrf.mxu2 }
 0x3b4   :  { %9039 = vst [vmem:[#allocation45_spill] sm:$0xff] %v6912_v55  ;;  %v1677_v45 = vadd.f32 %v6666_v8, %v1676_v36 }
 0x3b6   :  { %v6903_v59 = vpop.f32.mrf.mxu1  ;;  %v1743_v1 = vpack.c.bf16 %v1677_v45, %v1677_v45 }
 0x3b7   :  { %1847 = vrot.lane.b32.xlu0 %v6825_v43, %s5577_s25  ;;  %1843 = vrot.lane.b32.xlu1 %v6801_v47, %s5577_s25 }
 0x3b8   :  { %2237 = vrot.lane.b32.xlu2 %v6901_v48, %s5577_s25  ;;  %v2193_v17 = vunpack.c.l.b16 %v1743_v1 }
 0x3bb   :  { %1956 = vmatpush.bf16.xpose.msrb.mxu2 %v1918_v60  ;;  %v1678_v37 = vpop.f32.mrf.mxu2 }
 0x3bc   :  { %v1679_v19 = vadd.f32 %v6666_v8, %v1678_v37 }
 0x3be   :  { %v6914_v26 = vpop.f32.mrf.mxu1  ;;  %v1744_v57 = vpack.c.bf16 %v1679_v19, %v1679_v19 }
 0x3bf   :  { %3523 = vrot.lane.b32.xlu1 %v6772_v23, %s5575_s26  ;;  %1827 = vrot.lane.b32.xlu0 %v6684_v21, %s5577_s25 }
 0x3c0   :  { %2239 = vrot.lane.b32.xlu2 %v6912_v55, %s5577_s25  ;;  %v2194_v34 = vunpack.c.l.b16 %v1744_v57 }
 0x3c2   :  { %v6936_v51 = vpack.c.b16 %v2194_v34, %v2193_v17 }
 0x3c4   :  { %9040 = vst [vmem:[#allocation46_spill] sm:$0xff] %v6936_v51 }
 0x3c6   :  { %v6922_v30 = vpop.f32.mrf.mxu1 }
 0x3c7   :  { %3517 = vrot.lane.b32.xlu1 %v6782_v16, %s5575_s26  ;;  %1841 = vrot.lane.b32.xlu0 %v6792_v56, %s5577_s25 }
 0x3ce   :  { %v6930_v54 = vpop.f32.mrf.mxu1 }
 0x3cf   :  { %3515 = vrot.lane.b32.xlu1 %v6714_v44, %s5575_s26  ;;  %3519 = vrot.lane.b32.xlu0 %v6738_v22, %s5575_s26 }
 0x3d6   :  { %v6938_v15 = vpop.f32.mrf.mxu1 }
 0x3d7   :  { %3513 = vrot.lane.b32.xlu1 %v6700_v18, %s5575_s26  ;;  %2241 = vrot.lane.b32.xlu0 %v6936_v51, %s5577_s25 }
 0x3de   :  { %v1616_v14 = vpop.f32.mrf.mxu1 }
 0x3df   :  { %3511 = vrot.lane.b32.xlu1 %v6684_v21, %s5575_s26  ;;  %v1617_v27 = vadd.f32 %v6666_v8, %v1616_v14 }
 0x3e1   :  { %v1719_v62 = vpack.c.bf16 %v1617_v27, %v1617_v27 }
 0x3e3   :  { %v2169_v6 = vunpack.c.l.b16 %v1719_v62 }
 0x3e6   :  { %v1618_v35 = vpop.f32.mrf.mxu1 }
 0x3e7   :  { %v1619_v46 = vadd.f32 %v6666_v8, %v1618_v35  ;;  %3509 = vrot.lane.b32.xlu1 %v6675_v24, %s5575_s26 }
 0x3e9   :  { %v1720_v13 = vpack.c.bf16 %v1619_v46, %v1619_v46  ;;  %v6950_v25 = vpop.permute.xlu2 %1851 }
 0x3eb   :  { %v2170_v12 = vunpack.c.l.b16 %v1720_v13 }
 0x3ed   :  { %v6952_v7 = vpack.c.b16 %v2170_v12, %v2169_v6 }
 0x3ee   :  { %v1621_v31 = vpop.f32.mrf.mxu1 }
 0x3ef   :  { %2217 = vrot.lane.b32.xlu2 %v6952_v7, %s5577_s25  ;;  %v1622_v37 = vadd.f32 %v6666_v8, %v1621_v31 }
 0x3f1   :  { %v1832_v60 = vpop.permute.xlu2 %1831  ;;  %v1721_v45 = vpack.c.bf16 %v1622_v37, %v1622_v37 }
 0x3f2   :  { %v1915_v36 = vsel %vm725_vm0, %v1832_v60, 0 }
 0x3f3   :  { %1957 = vmatpush.bf16.xpose.msrb.mxu2 %v1915_v36  ;;  %v2171_v34 = vunpack.c.l.b16 %v1721_v45 }
 0x3f6   :  { %v1623_v19 = vpop.f32.mrf.mxu1 }
 0x3f7   :  { %v1624_v57 = vadd.f32 %v6666_v8, %v1623_v19 }
 0x3f9   :  { %v1722_v1 = vpack.c.bf16 %v1624_v57, %v1624_v57 }
 0x3fb   :  { %v2172_v17 = vunpack.c.l.b16 %v1722_v1 }
 0x3fd   :  { %v6959_v14 = vpack.c.b16 %v2172_v17, %v2171_v34 }
 0x3fe   :  { %v1626_v27 = vpop.f32.mrf.mxu1 }
 0x3ff   :  { %9041 = vst [vmem:[#allocation48_spill] sm:$0xff] %v6959_v14  ;;  %2219 = vrot.lane.b32.xlu2 %v6959_v14, %s5577_s25  ;;  %v1627_v35 = vadd.f32 %v6666_v8, %v1626_v27 }
 0x401   :  { %v1723_v46 = vpack.c.bf16 %v1627_v35, %v1627_v35 }
 0x403   :  { %v2173_v12 = vunpack.c.l.b16 %v1723_v46 }
 0x406   :  { %v1628_v62 = vpop.f32.mrf.mxu1 }
 0x407   :  { %v1629_v13 = vadd.f32 %v6666_v8, %v1628_v62 }
 0x409   :  { %v1724_v6 = vpack.c.bf16 %v1629_v13, %v1629_v13  ;;  %v1846_v13 = vpop.permute.xlu2 %1845 }
 0x40b   :  { %v2174_v31 = vunpack.c.l.b16 %v1724_v6 }
 0x40d   :  { %v6965_v60 = vpack.c.b16 %v2174_v31, %v2173_v12 }
 0x40e   :  { %v1631_v36 = vpop.f32.mrf.mxu1 }
 0x40f   :  { %9042 = vst [vmem:[#allocation49_spill] sm:$0xff] %v6965_v60  ;;  %2221 = vrot.lane.b32.xlu2 %v6965_v60, %s5577_s25  ;;  %v1632_v19 = vadd.f32 %v6666_v8, %v1631_v36 }
 0x411   :  { %v1854_v37 = vpop.permute.xlu1 %1853  ;;  %v1725_v57 = vpack.c.bf16 %v1632_v19, %v1632_v19  ;;  %v1826_v53 = vpop.permute.xlu2 %1825 }
 0x412   :  { %v1948_v20 = vsel %vm725_vm0, %v1854_v37, 0 }
 0x413   :  { %v2175_v27 = vunpack.c.l.b16 %v1725_v57 }
 0x416   :  { %v1633_v45 = vpop.f32.mrf.mxu1 }
 0x417   :  { %v1634_v1 = vadd.f32 %v6666_v8, %v1633_v45 }
 0x419   :  { %v1726_v34 = vpack.c.bf16 %v1634_v1, %v1634_v1  ;;  %v1850_v17 = vpop.permute.xlu1 %1849  ;;  %v6990_v37 = vpop.permute.xlu2 %3521 }
 0x41b   :  { %v2176_v35 = vunpack.c.l.b16 %v1726_v34 }
 0x41d   :  { %v6971_v62 = vpack.c.b16 %v2176_v35, %v2175_v27 }
 0x41e   :  { %v1636_v46 = vpop.f32.mrf.mxu1 }
 0x41f   :  { %9043 = vst [vmem:[#allocation51_spill] sm:$0xff] %v6971_v62  ;;  %2223 = vrot.lane.b32.xlu1 %v6971_v62, %s5577_s25  ;;  %v1637_v19 = vadd.f32 %v6666_v8, %v1636_v46 }
 0x421   :  { %v1856_v6 = vpop.permute.xlu0 %1855  ;;  %v1830_v12 = vpop.permute.xlu1 %1829  ;;  %v1727_v57 = vpack.c.bf16 %v1637_v19, %v1637_v19  ;;  %v1942_v19 = vsel %vm725_vm0, %v1850_v17, 0 }
 0x422   :  { %v1912_v31 = vsel %vm725_vm0, %v1830_v12, 0  ;;  %v1951_v36 = vsel %vm725_vm0, %v1856_v6, 0 }
 0x423   :  { %1958 = vmatpush.bf16.xpose.msrb.mxu2 %v1912_v31  ;;  %2042 = vmatpush.bf16.xpose.msrb.mxu3 %v1951_v36  ;;  %v2177_v3 = vunpack.c.l.b16 %v1727_v57  ;;  %v1945_v36 = vsel %vm725_vm0, %v6950_v25, 0 }
 0x426   :  { %v1638_v45 = vpop.f32.mrf.mxu1 }
 0x427   :  { %v1639_v1 = vadd.f32 %v6666_v8, %v1638_v45 }
 0x429   :  { %v1728_v34 = vpack.c.bf16 %v1639_v1, %v1639_v1  ;;  %v1848_v27 = vpop.permute.xlu0 %1847  ;;  %v1844_v35 = vpop.permute.xlu1 %1843 }
 0x42a   :  { %v1939_v25 = vsel %vm725_vm0, %v1848_v27, 0  ;;  %v2238_v27 = vpop.permute.xlu2 %2237 }
 0x42b   :  { %v2178_v52 = vunpack.c.l.b16 %v1728_v34  ;;  %2043 = vmatpush.bf16.xpose.msrb.mxu3 %v1948_v20  ;;  %v1906_v20 = vsel %vm725_vm0, %v1826_v53, 0  ;;  %v1936_v53 = vsel %vm725_vm0, %v1846_v13, 0  ;;  %v1933_v34 = vsel %vm725_vm0, %v1844_v35, 0 }
 0x42d   :  { %v6980_v12 = vpack.c.b16 %v2178_v52, %v2177_v3 }
 0x42f   :  { %9044 = vst [vmem:[#allocation52_spill] sm:$0xff] %v6980_v12  ;;  %2225 = vrot.lane.b32.xlu0 %v6980_v12, %s5577_s25 }
 0x431   :  { %v6984_v46 = vpop.permute.xlu1 %3523  ;;  %v1828_v6 = vpop.permute.xlu0 %1827 }
 0x432   :  { %3557 = vmatpush.bf16.msrb.mxu0 %v6984_v46  ;;  %v1909_v31 = vsel %vm725_vm0, %v1828_v6, 0 }
 0x433   :  { %1959 = vmatpush.bf16.xpose.msrb.mxu2 %v1909_v31  ;;  %2044 = vmatpush.bf16.xpose.msrb.mxu3 %v1945_v36 }
 0x436   :  { %3558 = vmatpush.bf16.msrb.mxu0 %v6990_v37 }
 0x439   :  { %v6993_v52 = vpop.permute.xlu1 %3517  ;;  %v1842_v3 = vpop.permute.xlu0 %1841 }
 0x43a   :  { %v1930_v13 = vsel %vm725_vm0, %v1842_v3, 0 }
 0x43b   :  { %1960 = vmatpush.bf16.xpose.msrb.mxu2 %v1906_v20  ;;  %2045 = vmatpush.bf16.xpose.msrb.mxu3 %v1942_v19  ;;  %v2240_v20 = vpop.permute.xlu2 %2239  ;;  %v2331_v19 = vsel %vm725_vm0, %v2238_v27, 0 }
 0x43c   :  { %v2334_v35 = vsel %vm725_vm0, %v2240_v20, 0 }
 0x441   :  { %v6997_v45 = vpop.permute.xlu1 %3515  ;;  %v6999_v57 = vpop.permute.xlu0 %3519 }
 0x442   :  { %4958 = vmatmul.msk.bf16.vlgmr.msrb.gmra.mxu2 %vm725_vm0, %v6675_v24  ;;  %3559 = vmatpush.bf16.msrb.mxu0 %v6999_v57 }
 0x443   :  { %2046 = vmatpush.bf16.xpose.msrb.mxu3 %v1939_v25 }
 0x446   :  { %3560 = vmatpush.bf16.msrb.mxu0 %v6993_v52 }
 0x449   :  { %v7006_v1 = vpop.permute.xlu1 %3513  ;;  %v2242_v6 = vpop.permute.xlu0 %2241 }
 0x44a   :  { %3561 = vmatpush.bf16.msrb.mxu0 %v6997_v45  ;;  %v2337_v36 = vsel %vm725_vm0, %v2242_v6, 0 }
 0x44b   :  { %2047 = vmatpush.bf16.xpose.msrb.mxu3 %v1936_v53 }
 0x44e   :  { %3562 = vmatpush.bf16.msrb.mxu0 %v7006_v1 }
 0x451   :  { %v7011_v17 = vpop.permute.xlu1 %3511 }
 0x452   :  { %4959 = vmatmul.msk.bf16.gmra.mxu2 %vm725_vm0, %v6684_v21  ;;  %3563 = vmatpush.bf16.msrb.mxu0 %v7011_v17 }
 0x453   :  { %2048 = vmatpush.bf16.xpose.msrb.mxu3 %v1933_v34 }
 0x459   :  { %v7017_v31 = vpop.permute.xlu1 %3509 }
 0x45a   :  { %3564 = vmatpush.bf16.msrb.mxu0 %v7017_v31 }
 0x45b   :  { %2049 = vmatpush.bf16.xpose.msrb.mxu3 %v1930_v13 }
 0x462   :  { %4960 = vmatmul.msk.bf16.gmra.mxu2 %vm725_vm0, %v6700_v18  ;;  %4974 = vmatmul.msk.bf16.vlgmr.msrb.gmra.mxu3 %vm725_vm0, %v6675_v24  ;;  %v2218_v24 = vpop.permute.xlu2 %2217 }
 0x463   :  { %2428 = vmatpush.bf16.xpose.msra.mxu3 %v2337_v36 }
 0x46b   :  { %2429 = vmatpush.bf16.xpose.msra.mxu3 %v2334_v35 }
 0x472   :  { %4961 = vmatmul.msk.bf16.gmra.mxu2 %vm725_vm0, %v6714_v44  ;;  %4975 = vmatmul.msk.bf16.gmra.mxu3 %vm725_vm0, %v6684_v21  ;;  %v2220_v21 = vpop.permute.xlu2 %2219 }
 0x473   :  { %2430 = vmatpush.bf16.xpose.msra.mxu3 %v2331_v19  ;;  %v2304_v27 = vsel %vm725_vm0, %v2220_v21, 0  ;;  %v1664_v21 = vadd.f32 %v6666_v8, %v6852_v39 }
 0x47a   :  { %v2222_v34 = vpop.permute.xlu2 %2221 }
 0x482   :  { %4962 = vmatmul.msk.bf16.gmra.mxu2 %vm725_vm0, %v6782_v16  ;;  %4976 = vmatmul.msk.bf16.gmra.mxu3 %vm725_vm0, %v6700_v18 }
 0x491   :  { %v2224_v53 = vpop.permute.xlu1 %2223 }
 0x492   :  { %4963 = vmatmul.msk.bf16.gmra.mxu2 %vm725_vm0, %v6738_v22  ;;  %4977 = vmatmul.msk.bf16.gmra.mxu3 %vm725_vm0, %v6714_v44  ;;  %v2310_v18 = vsel %vm725_vm0, %v2224_v53, 0  ;;  %v2307_v44 = vsel %vm725_vm0, %v2222_v34, 0  ;;  %v1738_v34 = vpack.c.bf16 %v1664_v21, %v1664_v21 }
 0x494   :  { %v2188_v39 = vunpack.c.l.b16 %v1738_v34 }
 0x4a1   :  { %v2226_v3 = vpop.permute.xlu0 %2225 }
 0x4a2   :  { %v2313_v25 = vsel %vm725_vm0, %v2226_v3, 0  ;;  %4964 = vmatmul.msk.bf16.gmra.mxu2 %vm725_vm0, %v6754_v0  ;;  %4978 = vmatmul.msk.bf16.gmra.mxu3 %vm725_vm0, %v6782_v16  ;;  %v2301_v16 = vsel %vm725_vm0, %v2218_v24, 0 }
 0x4a3   :  { %2339 = vmatpush.bf16.xpose.msra.mxu2 %v2313_v25 }
 0x4ab   :  { %2340 = vmatpush.bf16.xpose.msra.mxu2 %v2310_v18  ;;  %v1662_v18 = vadd.f32 %v6666_v8, %v6841_v33  ;;  %v1609_v33 = vadd.f32 %v7110_v9, %v6922_v30  ;;  %v1614_v30 = vadd.f32 %v7110_v9, %v6938_v15 }
 0x4ad   :  { %v1716_v34 = vpack.c.bf16 %v1609_v33, %v1609_v33  ;;  %v1718_v15 = vpack.c.bf16 %v1614_v30, %v1614_v30 }
 0x4af   :  { %v2168_v61 = vunpack.c.l.b16 %v1718_v15 }
 0x4b2   :  { %4965 = vmatmul.msk.bf16.gmra.mxu2 %vm725_vm0, %v6772_v23  ;;  %4979 = vmatmul.msk.bf16.gmra.mxu3 %vm725_vm0, %v6738_v22 }
 0x4b3   :  { %2341 = vmatpush.bf16.xpose.msra.mxu2 %v2307_v44  ;;  %v1604_v44 = vadd.f32 %v6666_v8, %v6903_v59 }
 0x4b5   :  { %v1714_v50 = vpack.c.bf16 %v1604_v44, %v1604_v44 }
 0x4bb   :  { %2342 = vmatpush.bf16.xpose.msra.mxu2 %v2304_v27  ;;  %v1737_v27 = vpack.c.bf16 %v1662_v18, %v1662_v18  ;;  %v2164_v18 = vunpack.c.l.b16 %v1714_v50  ;;  %v1612_v50 = vadd.f32 %v7110_v9, %v6930_v54  ;;  %v1659_v54 = vadd.f32 %v7110_v9, %v6837_v28 }
 0x4bd   :  { %v2187_v21 = vunpack.c.l.b16 %v1737_v27 }
 0x4c2   :  { %4966 = vmatmul.msk.bf16.gmra.mxu2 %vm725_vm0, %v6792_v56  ;;  %4980 = vmatmul.msk.bf16.gmra.mxu3 %vm725_vm0, %v6754_v0 }
 0x4c3   :  { %2343 = vmatpush.bf16.xpose.msra.mxu2 %v2301_v16  ;;  %v1602_v16 = vadd.f32 %v6666_v8, %v6889_v2  ;;  %v1654_v8 = vadd.f32 %v7110_v9, %v6828_v4  ;;  %v7120_v2 = vpack.c.b16 %v2188_v39, %v2187_v21  ;;  %v2166_v21 = vunpack.c.l.b16 %v1716_v34 }
 0x4c5   :  { %v7057_v6 = vpop.f32.mrf.mxu2  ;;  %v1713_v59 = vpack.c.bf16 %v1602_v16, %v1602_v16  ;;  %9046 = vst [vmem:[#allocation55_spill] sm:$0xff] %v7120_v2  ;;  %v1734_v39 = vpack.c.bf16 %v1654_v8, %v1654_v8  ;;  %v1657_v8 = vadd.f32 %v7110_v9, %v6830_v58 }
 0x4c7   :  { %v2163_v44 = vunpack.c.l.b16 %v1713_v59  ;;  %v2184_v59 = vunpack.c.l.b16 %v1734_v39 }
 0x4c9   :  { %v7138_v33 = vpack.c.b16 %v2164_v18, %v2163_v44 }
 0x4cd   :  { %v7059_v13 = vpop.f32.mrf.mxu2 }
 0x4d2   :  { %4967 = vmatmul.msk.bf16.gmra.mxu2 %vm725_vm0, %v6801_v47  ;;  %4981 = vmatmul.msk.bf16.gmra.mxu3 %vm725_vm0, %v6772_v23 }
 0x4d5   :  { %v7065_v22 = vpop.f32.mrf.mxu2 }
 0x4dd   :  { %v7067_v36 = vpop.f32.mrf.mxu2 }
 0x4e2   :  { %4968 = vmatmul.msk.bf16.gmra.mxu2 %vm725_vm0, %v6812_v38  ;;  %4982 = vmatmul.msk.bf16.gmra.mxu3 %vm725_vm0, %v6792_v56 }
 0x4e5   :  { %v7073_v0 = vpop.f32.mrf.mxu2  ;;  %v7075_v20 = vpop.f32.mrf.mxu3 }
 0x4e6   :  { %v2517_v35 = vmax.f32 %v7057_v6, %v7075_v20 }
 0x4e8   :  { %2518 = vmax.xlane.f32.xlu2 %v2517_v35 }
 0x4ed   :  { %v7079_v19 = vpop.f32.mrf.mxu2  ;;  %v7081_v23 = vpop.f32.mrf.mxu3 }
 0x4ee   :  { %v2520_v24 = vmax.f32 %v7059_v13, %v7081_v23 }
 0x4f0   :  { %2521 = vmax.xlane.f32.xlu0 %v2520_v24 }
 0x4f2   :  { %4969 = vmatmul.msk.bf16.gmra.mxu2 %vm725_vm0, %v6825_v43  ;;  %4983 = vmatmul.msk.bf16.gmra.mxu3 %vm725_vm0, %v6801_v47 }
 0x4f5   :  { %v7089_v3 = vpop.f32.mrf.mxu2  ;;  %v7091_v25 = vpop.f32.mrf.mxu3 }
 0x4f6   :  { %v2523_v53 = vmax.f32 %v7065_v22, %v7091_v25 }
 0x4f8   :  { %2524 = vmax.xlane.f32.xlu1 %v2523_v53  ;;  %v1607_v53 = vadd.f32 %v7110_v9, %v6914_v26  ;;  %v1652_v26 = vadd.f32 %v7110_v9, %v6819_v10  ;;  %v1717_v10 = vpack.c.bf16 %v1612_v50, %v1612_v50 }
 0x4fa   :  { %v1715_v27 = vpack.c.bf16 %v1607_v53, %v1607_v53  ;;  %v1733_v41 = vpack.c.bf16 %v1652_v26, %v1652_v26  ;;  %v2167_v18 = vunpack.c.l.b16 %v1717_v10 }
 0x4fc   :  { %v2165_v5 = vunpack.c.l.b16 %v1715_v27  ;;  %v2183_v49 = vunpack.c.l.b16 %v1733_v41  ;;  %v7156_v44 = vpack.c.b16 %v2168_v61, %v2167_v18  ;;  %v1735_v41 = vpack.c.bf16 %v1657_v8, %v1657_v8 }
 0x4fd   :  { %v7103_v35 = vpop.f32.mrf.mxu2  ;;  %v7105_v24 = vpop.f32.mrf.mxu3 }
 0x4fe   :  { %v7142_v53 = vpack.c.b16 %v2166_v21, %v2165_v5  ;;  %v7154_v26 = vpack.c.b16 %v2184_v59, %v2183_v49  ;;  %v1736_v5 = vpack.c.bf16 %v1659_v54, %v1659_v54  ;;  %9048 = vst [vmem:[#allocation58_spill] sm:$0xff] %v7156_v44  ;;  %v2185_v49 = vunpack.c.l.b16 %v1735_v41 }
 0x4ff   :  { %v2526_v8 = vmax.f32 %v7067_v36, %v7105_v24 }
 0x500   :  { %3539 = vrot.lane.b32.xlu2 %v6887_v40, %s5575_s26  ;;  %9047 = vst [vmem:[#allocation57_spill] sm:$0xff] %v7154_v26  ;;  %v2186_v58 = vunpack.c.l.b16 %v1736_v5 }
 0x502   :  { %4970 = vmatmul.msk.bf16.gmra.mxu2 %vm725_vm0, %v6873_v32  ;;  %4984 = vmatmul.msk.bf16.gmra.mxu3 %vm725_vm0, %v6812_v38  ;;  %v7170_v28 = vpack.c.b16 %v2186_v58, %v2185_v49 }
 0x504   :  { %2235 = vrot.lane.b32.xlu0 %v7120_v2, %s5577_s25  ;;  %9049 = vst [vmem:[#allocation61_spill] sm:$0xff] %v7170_v28 }
 0x505   :  { %v7134_v4 = vpop.f32.mrf.mxu2  ;;  %v7136_v16 = vpop.f32.mrf.mxu3 }
 0x506   :  { %v2529_v58 = vmax.f32 %v7073_v0, %v7136_v16 }
 0x508   :  { %2211 = vrot.lane.b32.xlu2 %v7138_v33, %s5577_s25 }
 0x50c   :  { %2213 = vrot.lane.b32.xlu0 %v7142_v53, %s5577_s25 }
 0x50d   :  { %v7150_v34 = vpop.f32.mrf.mxu2  ;;  %v7152_v30 = vpop.f32.mrf.mxu3 }
 0x50e   :  { %v2532_v18 = vmax.f32 %v7079_v19, %v7152_v30 }
 0x510   :  { %2231 = vrot.lane.b32.xlu2 %v7154_v26, %s5577_s25 }
 0x511   :  { %2215 = vrot.lane.b32.xlu1 %v7156_v44, %s5577_s25 }
 0x512   :  { %4971 = vmatmul.msk.bf16.gmra.mxu2 %vm725_vm0, %v6847_v29  ;;  %4985 = vmatmul.msk.bf16.gmra.mxu3 %vm725_vm0, %v6825_v43 }
 0x514   :  { %3537 = vrot.lane.b32.xlu0 %v6864_v11, %s5575_s26 }
 0x515   :  { %v7168_v61 = vpop.f32.mrf.mxu3  ;;  %v7172_v27 = vpop.f32.mrf.mxu2 }
 0x519   :  { %2233 = vrot.lane.b32.xlu1 %v7170_v28, %s5577_s25 }
 0x51d   :  { %v7176_v50 = vpop.f32.mrf.mxu3  ;;  %v7178_v39 = vpop.f32.mrf.mxu2 }
 0x521   :  { %3535 = vrot.lane.b32.xlu1 %v6847_v29, %s5575_s26 }
 0x522   :  { %4972 = vmatmul.msk.bf16.gmra.mxu2 %vm725_vm0, %v6864_v11  ;;  %4986 = vmatmul.msk.bf16.gmra.mxu3 %vm725_vm0, %v6873_v32 }
 0x525   :  { %v7186_v21 = vpop.f32.mrf.mxu3  ;;  %v7188_v15 = vpop.f32.mrf.mxu2 }
 0x52d   :  { %v7190_v10 = vpop.f32.mrf.mxu3  ;;  %v7196_v59 = vpop.f32.mrf.mxu2 }
 0x532   :  { %4973 = vmatmul.msk.bf16.gmra.mxu2 %vm725_vm0, %v6887_v40  ;;  %4987 = vmatmul.msk.bf16.gmra.mxu3 %vm725_vm0, %v6847_v29  ;;  %v2538_v29 = vmax.f32 %v7103_v35, %v7176_v50 }
 0x535   :  { %v7198_v54 = vpop.f32.mrf.mxu3  ;;  %v7206_v41 = vpop.f32.mrf.mxu2 }
 0x539   :  { %2527 = vmax.xlane.f32.xlu2 %v2526_v8  ;;  %v2535_v8 = vmax.f32 %v7089_v3, %v7168_v61 }
 0x53d   :  { %v7204_v5 = vpop.f32.mrf.mxu3  ;;  %v7218_v55 = vpop.f32.mrf.mxu2 }
 0x53e   :  { %2533 = vmax.xlane.f32.xlu0 %v2532_v18  ;;  %v2544_v18 = vmax.f32 %v7150_v34, %v7190_v10 }
 0x541   :  { %2530 = vmax.xlane.f32.xlu2 %v2529_v58 }
 0x542   :  { %4988 = vmatmul.msk.bf16.gmra.mxu3 %vm725_vm0, %v6864_v11  ;;  %v2541_v11 = vmax.f32 %v7134_v4, %v7186_v21 }
 0x545   :  { %v7214_v49 = vpop.f32.mrf.mxu3  ;;  %v7228_v58 = vpop.f32.mrf.mxu2 }
 0x546   :  { %2539 = vmax.xlane.f32.xlu0 %v2538_v29  ;;  %v2550_v29 = vmax.f32 %v7178_v39, %v7204_v5  ;;  %v2553_v62 = vmax.f32 %v7188_v15, %v7214_v49 }
 0x549   :  { %2536 = vmax.xlane.f32.xlu2 %v2535_v8 }
 0x54d   :  { %v7222_v48 = vpop.f32.mrf.mxu3  ;;  %v7242_v26 = vpop.f32.mrf.mxu2 }
 0x54e   :  { %2545 = vmax.xlane.f32.xlu0 %v2544_v18  ;;  %v2547_v18 = vmax.f32 %v7172_v27, %v7198_v54  ;;  %v2556_v51 = vmax.f32 %v7196_v59, %v7222_v48 }
 0x551   :  { %2542 = vmax.xlane.f32.xlu2 %v2541_v11 }
 0x552   :  { %4989 = vmatmul.msk.bf16.gmra.mxu3 %vm725_vm0, %v6887_v40 }
 0x555   :  { %v7232_v2 = vpop.f32.mrf.mxu3  ;;  %v7254_v47 = vpop.f32.mrf.mxu2 }
 0x556   :  { %2551 = vmax.xlane.f32.xlu0 %v2550_v29  ;;  %v2559_v8 = vmax.f32 %v7206_v41, %v7232_v2 }
 0x558   :  { %2560 = vmax.xlane.f32.xlu1 %v2559_v8 }
 0x559   :  { %2548 = vmax.xlane.f32.xlu2 %v2547_v18 }
 0x55b   :  { %v2519_v11 = vpop.xlane.xlu2 %2518 }
 0x55c   :  { %v2709_v28 = vsub.f32 %v7057_v6, %v2519_v11  ;;  %v2710_v40 = vsub.f32 %v7075_v20, %v2519_v11 }
 0x55d   :  { %v7244_v56 = vpop.f32.mrf.mxu3 }
 0x55e   :  { %9050 = vst [vmem:[#allocation60_spill] sm:$0xff] %v7244_v56  ;;  %v2837_v29 = vmul.f32 1.442695, %v2709_v28  ;;  %v2839_v12 = vmul.f32 1.442695, %v2710_v40  ;;  %2557 = vmax.xlane.f32.xlu0 %v2556_v51 }
 0x560   :  { %5136 = vpow2.f32 %v2837_v29 }
 0x561   :  { %5138 = vpow2.f32 %v2839_v12  ;;  %2554 = vmax.xlane.f32.xlu2 %v2553_v62  ;;  %v2562_v62 = vmax.f32 %v7218_v55, %v7244_v56 }
 0x563   :  { %v3540_v8 = vpop.permute.xlu2 %3539  ;;  %v2522_v6 = vpop.xlane.xlu0 %2521 }
 0x564   :  { %v2711_v20 = vsub.f32 %v7059_v13, %v2522_v6  ;;  %v2712_v18 = vsub.f32 %v7081_v23, %v2522_v6  ;;  %3646 = vmatpush.bf16.msra.mxu0 %v3540_v8 }
 0x565   :  { %v7250_v11 = vpop.f32.mrf.mxu3 }
 0x566   :  { %9051 = vst [vmem:[#allocation87_spill] sm:$0xff] %v7250_v11  ;;  %v5137_v60 = vpop.eup %5136  ;;  %v2841_v14 = vmul.f32 1.442695, %v2711_v20  ;;  %v2843_v28 = vmul.f32 1.442695, %v2712_v18  ;;  %v2565_v51 = vmax.f32 %v7228_v58, %v7250_v11 }
 0x567   :  { %v5139_v40 = vpop.eup %5138 }
 0x568   :  { %5140 = vpow2.f32 %v2841_v14  ;;  %2566 = vmax.xlane.f32.xlu0 %v2565_v51  ;;  %v7258_v12 = vadd.f32 %v5139_v40, %v5137_v60  ;;  %v3285_v56 = vpack.c.bf16 %v5139_v40, %v5137_v60 }
 0x569   :  { %5142 = vpow2.f32 %v2843_v28  ;;  %2563 = vmax.xlane.f32.xlu2 %v2562_v62  ;;  %v7268_v62 = vpop.f32.mrf.mxu2 }
 0x56a   :  { %9052 = vst [vmem:[#allocation88_spill] sm:$0xff] %v7258_v12 }
 0x56b   :  { %v2525_v13 = vpop.xlane.xlu1 %2524 }
 0x56c   :  { %v2713_v23 = vsub.f32 %v7065_v22, %v2525_v13  ;;  %v2714_v29 = vsub.f32 %v7091_v25, %v2525_v13  ;;  %v3381_v22 = vunpack.c.l.b16 %v3285_v56  ;;  %v3382_v25 = vunpack.c.h.b16 %v3285_v56 }
 0x56d   :  { %v7262_v8 = vpop.f32.mrf.mxu3 }
 0x56e   :  { %v5141_v6 = vpop.eup %5140  ;;  %v2845_v20 = vmul.f32 1.442695, %v2713_v23  ;;  %v2847_v18 = vmul.f32 1.442695, %v2714_v29  ;;  %v2568_v11 = vmax.f32 %v7242_v26, %v7262_v8  ;;  %v1647_v23 = vadd.f32 %v7110_v9, %v6806_v42 }
 0x56f   :  { %v5143_v14 = vpop.eup %5142  ;;  %v1649_v29 = vadd.f32 %v7110_v9, %v6815_v63 }
 0x570   :  { %5144 = vpow2.f32 %v2845_v20  ;;  %2569 = vmax.xlane.f32.xlu1 %v2568_v11  ;;  %v3286_v51 = vpack.c.bf16 %v5143_v14, %v5141_v6  ;;  %v7266_v28 = vadd.f32 %v5143_v14, %v5141_v6  ;;  %v1731_v56 = vpack.c.bf16 %v1647_v23, %v1647_v23 }
 0x571   :  { %5146 = vpow2.f32 %v2847_v18  ;;  %v1732_v14 = vpack.c.bf16 %v1649_v29, %v1649_v29 }
 0x572   :  { %9053 = vst [vmem:[#allocation89_spill] sm:$0xff] %v7266_v28  ;;  %v3383_v13 = vunpack.c.l.b16 %v3286_v51  ;;  %v3384_v12 = vunpack.c.h.b16 %v3286_v51  ;;  %v2181_v63 = vunpack.c.l.b16 %v1731_v56 }
 0x574   :  { %v3445_v60 = vpack.c.b16 %v3383_v13, %v3381_v22  ;;  %v7274_v40 = vpack.c.b16 %v3384_v12, %v3382_v25  ;;  %v2182_v12 = vunpack.c.l.b16 %v1732_v14  ;;  %v7287_v22 = vpop.f32.mrf.mxu2 }
 0x575   :  { %v7276_v11 = vpop.f32.mrf.mxu3 }
 0x576   :  { %9054 = vst [vmem:[#allocation90_spill] sm:$0xff] %v7274_v40  ;;  %v7278_v6 = vpop.eup %5144  ;;  %3565 = vmatmul.bf16.vlgmr.msrb.gmra.mxu0 %v3445_v60  ;;  %v2236_v20 = vpop.permute.xlu0 %2235  ;;  %v7293_v40 = vpack.c.b16 %v2182_v12, %v2181_v63 }
 0x577   :  { %v7280_v18 = vpop.eup %5146  ;;  %v2328_v51 = vsel %vm725_vm0, %v2236_v20, 0 }
 0x578   :  { %2431 = vmatpush.bf16.xpose.msra.mxu3 %v2328_v51  ;;  %v7285_v42 = vadd.f32 %v7280_v18, %v7278_v6  ;;  %9056 = vst [vmem:[#allocation92_spill] sm:$0xff] %v7293_v40 }
 0x57a   :  { %9055 = vst [vmem:[#allocation91_spill] sm:$0xff] %v7285_v42  ;;  %v2212_v42 = vpop.permute.xlu2 %2211 }
 0x57c   :  { %v7298_v20 = vpop.f32.mrf.mxu2 }
 0x57d   :  { %v7289_v25 = vpop.f32.mrf.mxu3 }
 0x57e   :  { %v2214_v13 = vpop.permute.xlu0 %2213  ;;  %v2574_v60 = vmax.f32 %v7268_v62, %v7289_v25 }
 0x57f   :  { %v2295_v12 = vsel %vm725_vm0, %v2214_v13, 0 }
 0x580   :  { %2575 = vmax.xlane.f32.xlu0 %v2574_v60 }
 0x581   :  { %2229 = vrot.lane.b32.xlu2 %v7293_v40, %s5577_s25 }
 0x582   :  { %v2232_v9 = vpop.permute.xlu2 %2231 }
 0x583   :  { %v2216_v23 = vpop.permute.xlu1 %2215 }
 0x584   :  { %v2298_v29 = vsel %vm725_vm0, %v2216_v23, 0  ;;  %v7308_v23 = vpop.f32.mrf.mxu2 }
 0x585   :  { %v7300_v56 = vpop.f32.mrf.mxu3  ;;  %2344 = vmatpush.bf16.xpose.msra.mxu2 %v2298_v29 }
 0x586   :  { %v3538_v14 = vpop.permute.xlu0 %3537  ;;  %v2577_v51 = vmax.f32 %v7287_v22, %v7300_v56 }
 0x587   :  { %3647 = vmatpush.bf16.msra.mxu0 %v3538_v14  ;;  %v2292_v14 = vsel %vm725_vm0, %v2212_v42, 0  ;;  %v2571_v42 = vmax.f32 %v7254_v47, %v7276_v11 }
 0x588   :  { %2578 = vmax.xlane.f32.xlu1 %v2577_v51  ;;  %v2322_v51 = vsel %vm725_vm0, %v2232_v9, 0 }
 0x58b   :  { %v2234_v63 = vpop.permute.xlu1 %2233 }
 0x58c   :  { %v2325_v60 = vsel %vm725_vm0, %v2234_v63, 0  ;;  %v7319_v63 = vpop.f32.mrf.mxu2 }
 0x58d   :  { %v7306_v40 = vpop.f32.mrf.mxu3  ;;  %2345 = vmatpush.bf16.xpose.msra.mxu2 %v2295_v12  ;;  %2432 = vmatpush.bf16.xpose.msra.mxu3 %v2325_v60 }
 0x593   :  { %v3536_v29 = vpop.permute.xlu1 %3535 }
 0x594   :  { %3648 = vmatpush.bf16.msra.mxu0 %v3536_v29  ;;  %3531 = vrot.lane.b32.xlu0 %v6825_v43, %s5575_s26  ;;  %v7328_v9 = vpop.f32.mrf.mxu2 }
 0x595   :  { %v7314_v28 = vpop.f32.mrf.mxu3  ;;  %2346 = vmatpush.bf16.xpose.msra.mxu2 %v2292_v14  ;;  %2433 = vmatpush.bf16.xpose.msra.mxu3 %v2322_v51  ;;  %v2580_v14 = vmax.f32 %v7298_v20, %v7306_v40 }
 0x596   :  { %v2583_v13 = vmax.f32 %v7308_v23, %v7314_v28 }
 0x598   :  { %2584 = vmax.xlane.f32.xlu1 %v2583_v13 }
 0x59c   :  { %4990 = vmatmul.msk.bf16.vlgmr.msra.gmra.mxu2 %vm725_vm0, %v7138_v33  ;;  %v7338_v12 = vpop.f32.mrf.mxu2 }
 0x59d   :  { %5116 = vmatpush.bf16.msrb.mxu2 %v6984_v46  ;;  %v7324_v43 = vpop.f32.mrf.mxu3 }
 0x5a1   :  { %5117 = vmatpush.bf16.msrb.mxu2 %v6990_v37 }
 0x5a5   :  { %5118 = vmatpush.bf16.msrb.mxu2 %v6999_v57  ;;  %v7330_v46 = vpop.f32.mrf.mxu3 }
 0x5a9   :  { %5119 = vmatpush.bf16.msrb.mxu2 %v6993_v52 }
 0x5aa   :  { %2572 = vmax.xlane.f32.xlu2 %v2571_v42 }
 0x5ac   :  { %4991 = vmatmul.msk.bf16.gmra.mxu2 %vm725_vm0, %v7142_v53  ;;  %v2528_v37 = vpop.xlane.xlu2 %2527 }
 0x5ad   :  { %5120 = vmatpush.bf16.msrb.mxu2 %v6997_v45  ;;  %v2715_v52 = vsub.f32 %v7067_v36, %v2528_v37  ;;  %v2716_v57 = vsub.f32 %v7105_v24, %v2528_v37  ;;  %v7342_v60 = vpop.f32.mrf.mxu3 }
 0x5ae   :  { %v2592_v45 = vmax.f32 %v7338_v12, %v7342_v60 }
 0x5af   :  { %v2849_v29 = vmul.f32 1.442695, %v2715_v52 }
 0x5b0   :  { %2593 = vmax.xlane.f32.xlu1 %v2592_v45 }
 0x5b1   :  { %5121 = vmatpush.bf16.msrb.mxu2 %v7006_v1  ;;  %v2851_v1 = vmul.f32 1.442695, %v2716_v57  ;;  %5148 = vpow2.f32 %v2849_v29  ;;  %v2534_v51 = vpop.xlane.xlu0 %2533 }
 0x5b2   :  { %v2719_v36 = vsub.f32 %v7079_v19, %v2534_v51  ;;  %v2720_v24 = vsub.f32 %v7152_v30, %v2534_v51  ;;  %2581 = vmax.xlane.f32.xlu2 %v2580_v14  ;;  %v3287_v19 = vpack.c.bf16 %v7280_v18, %v7278_v6 }
 0x5b3   :  { %5150 = vpow2.f32 %v2851_v1 }
 0x5b4   :  { %v2859_v13 = vmul.f32 1.442695, %v2720_v24  ;;  %v2531_v42 = vpop.xlane.xlu2 %2530 }
 0x5b5   :  { %5122 = vmatpush.bf16.msrb.mxu2 %v7011_v17  ;;  %v2857_v17 = vmul.f32 1.442695, %v2719_v36  ;;  %v2717_v37 = vsub.f32 %v7073_v0, %v2531_v42  ;;  %v2718_v52 = vsub.f32 %v7136_v16, %v2531_v42  ;;  %v3385_v36 = vunpack.c.l.b16 %v3287_v19 }
 0x5b7   :  { %5152 = vpow2.f32 %v2857_v17  ;;  %v5149_v57 = vpop.eup %5148  ;;  %v2853_v45 = vmul.f32 1.442695, %v2717_v37  ;;  %v2855_v29 = vmul.f32 1.442695, %v2718_v52  ;;  %v3386_v17 = vunpack.c.h.b16 %v3287_v19 }
 0x5b8   :  { %5154 = vpow2.f32 %v2859_v13  ;;  %v2589_v52 = vmax.f32 %v7328_v9, %v7330_v46 }
 0x5b9   :  { %5123 = vmatpush.bf16.msrb.mxu2 %v7017_v31  ;;  %v5151_v1 = vpop.eup %5150  ;;  %v2586_v31 = vmax.f32 %v7319_v63, %v7324_v43  ;;  %5156 = vpow2.f32 %v2853_v45  ;;  %v2540_v30 = vpop.xlane.xlu0 %2539 }
 0x5ba   :  { %v3288_v14 = vpack.c.bf16 %v5151_v1, %v5149_v57  ;;  %v7358_v51 = vadd.f32 %v5151_v1, %v5149_v57  ;;  %5158 = vpow2.f32 %v2855_v29  ;;  %v2723_v0 = vsub.f32 %v7103_v35, %v2540_v30 }
 0x5bb   :  { %v2724_v16 = vsub.f32 %v7176_v50, %v2540_v30  ;;  %2587 = vmax.xlane.f32.xlu2 %v2586_v31 }
 0x5bc   :  { %v3387_v24 = vunpack.c.l.b16 %v3288_v14  ;;  %v3388_v13 = vunpack.c.h.b16 %v3288_v14  ;;  %v2865_v18 = vmul.f32 1.442695, %v2723_v0  ;;  %4992 = vmatmul.msk.bf16.gmra.mxu2 %vm725_vm0, %v7156_v44  ;;  %v2537_v37 = vpop.xlane.xlu2 %2536 }
 0x5bd   :  { %v5153_v6 = vpop.eup %5152  ;;  %v2867_v42 = vmul.f32 1.442695, %v2724_v16  ;;  %v2721_v35 = vsub.f32 %v7089_v3, %v2537_v37  ;;  %v2722_v50 = vsub.f32 %v7168_v61, %v2537_v37  ;;  %v7372_v16 = vpop.f32.mrf.mxu3 }
 0x5be   :  { %v5155_v57 = vpop.eup %5154  ;;  %v3447_v45 = vpack.c.b16 %v3387_v24, %v3385_v36  ;;  %v7368_v29 = vpack.c.b16 %v3388_v13, %v3386_v17  ;;  %5160 = vpow2.f32 %v2865_v18  ;;  %2590 = vmax.xlane.f32.xlu0 %v2589_v52  ;;  %v7378_v17 = vpop.f32.mrf.mxu2 }
 0x5bf   :  { %v7370_v19 = vadd.f32 %v5155_v57, %v5153_v6  ;;  %v5157_v1 = vpop.eup %5156  ;;  %5162 = vpow2.f32 %v2867_v42  ;;  %v2861_v31 = vmul.f32 1.442695, %v2721_v35  ;;  %v2863_v30 = vmul.f32 1.442695, %v2722_v50 }
 0x5c0   :  { %9057 = vst [vmem:[#allocation93_spill] sm:$0xff] %v7368_v29  ;;  %3570 = vmatmul.bf16.gmra.mxu0 %v3447_v45  ;;  %v3290_v14 = vpack.c.bf16 %v5155_v57, %v5153_v6  ;;  %v5159_v0 = vpop.eup %5158  ;;  %v2595_v57 = vmax.f32 %v7378_v17, %v7372_v16 }
 0x5c1   :  { %5164 = vpow2.f32 %v2861_v31  ;;  %v2546_v3 = vpop.xlane.xlu0 %2545  ;;  %v3289_v44 = vpack.c.bf16 %v5159_v0, %v5157_v1  ;;  %v7374_v61 = vadd.f32 %v5159_v0, %v5157_v1 }
 0x5c2   :  { %5166 = vpow2.f32 %v2863_v30  ;;  %v2727_v36 = vsub.f32 %v7150_v34, %v2546_v3  ;;  %v2728_v24 = vsub.f32 %v7190_v10, %v2546_v3  ;;  %v3392_v18 = vunpack.c.h.b16 %v3290_v14 }
 0x5c3   :  { %v3390_v13 = vunpack.c.h.b16 %v3289_v44 }
 0x5c4   :  { %v5161_v42 = vpop.eup %5160  ;;  %v2873_v37 = vmul.f32 1.442695, %v2727_v36  ;;  %v2875_v6 = vmul.f32 1.442695, %v2728_v24  ;;  %v2543_v52 = vpop.xlane.xlu2 %2542 }
 0x5c5   :  { %v5163_v35 = vpop.eup %5162  ;;  %v2725_v50 = vsub.f32 %v7134_v4, %v2543_v52  ;;  %v2726_v45 = vsub.f32 %v7186_v21, %v2543_v52  ;;  %v7384_v1 = vpack.c.b16 %v3392_v18, %v3390_v13  ;;  %v3389_v4 = vunpack.c.l.b16 %v3289_v44 }
 0x5c6   :  { %5168 = vpow2.f32 %v2873_v37  ;;  %2596 = vmax.xlane.f32.xlu0 %v2595_v57  ;;  %v7386_v34 = vadd.f32 %v5163_v35, %v5161_v42  ;;  %v7388_v0 = vpack.c.bf16 %v5163_v35, %v5161_v42 }
 0x5c7   :  { %9058 = vst [vmem:[#allocation94_spill] sm:$0xff] %v7384_v1  ;;  %v5165_v10 = vpop.eup %5164  ;;  %5170 = vpow2.f32 %v2875_v6  ;;  %v2869_v31 = vmul.f32 1.442695, %v2725_v50  ;;  %v2871_v30 = vmul.f32 1.442695, %v2726_v45  ;;  %v3391_v6 = vunpack.c.l.b16 %v3290_v14 }
 0x5c8   :  { %v5167_v3 = vpop.eup %5166  ;;  %v3396_v52 = vunpack.c.h.b16 %v7388_v0 }
 0x5c9   :  { %5172 = vpow2.f32 %v2869_v31  ;;  %v2552_v36 = vpop.xlane.xlu0 %2551  ;;  %3529 = vrot.lane.b32.xlu1 %v6812_v38, %s5575_s26  ;;  %v7392_v21 = vpack.c.bf16 %v5167_v3, %v5165_v10  ;;  %v7394_v24 = vadd.f32 %v5167_v3, %v5165_v10  ;;  %v3449_v10 = vpack.c.b16 %v3391_v6, %v3389_v4 }
 0x5ca   :  { %5174 = vpow2.f32 %v2871_v30  ;;  %v2731_v13 = vsub.f32 %v7178_v39, %v2552_v36  ;;  %v2732_v18 = vsub.f32 %v7204_v5, %v2552_v36 }
 0x5cb   :  { %v2561_v37 = vpop.xlane.xlu1 %2560  ;;  %v3394_v42 = vunpack.c.h.b16 %v7392_v21 }
 0x5cc   :  { %v7400_v57 = vpop.eup %5168  ;;  %v2881_v35 = vmul.f32 1.442695, %v2731_v13  ;;  %v2883_v38 = vmul.f32 1.442695, %v2732_v18  ;;  %v2737_v44 = vsub.f32 %v7206_v41, %v2561_v37  ;;  %v2738_v50 = vsub.f32 %v7232_v2, %v2561_v37  ;;  %4993 = vmatmul.msk.bf16.gmra.mxu2 %vm725_vm0, %v6952_v7  ;;  %v2549_v39 = vpop.xlane.xlu2 %2548 }
 0x5cd   :  { %v7406_v45 = vpop.eup %5170  ;;  %v2729_v5 = vsub.f32 %v7172_v27, %v2549_v39  ;;  %v2730_v14 = vsub.f32 %v7198_v54, %v2549_v39  ;;  %v7410_v31 = vpack.c.b16 %v3396_v52, %v3394_v42 }
 0x5ce   :  { %5176 = vpow2.f32 %v2881_v35  ;;  %v2893_v30 = vmul.f32 1.442695, %v2737_v44  ;;  %v2895_v3 = vmul.f32 1.442695, %v2738_v50  ;;  %v7414_v13 = vpack.c.bf16 %v7406_v45, %v7400_v57 }
 0x5cf   :  { %9059 = vst [vmem:[#allocation95_spill] sm:$0xff] %v7410_v31  ;;  %v5173_v36 = vpop.eup %5172  ;;  %5178 = vpow2.f32 %v2883_v38  ;;  %v2877_v41 = vmul.f32 1.442695, %v2729_v5  ;;  %v2879_v2 = vmul.f32 1.442695, %v2730_v14 }
 0x5d0   :  { %3575 = vmatmul.bf16.gmra.mxu0 %v3449_v10  ;;  %v5175_v18 = vpop.eup %5174  ;;  %5180 = vpow2.f32 %v2893_v30  ;;  %v3400_v52 = vunpack.c.h.b16 %v7414_v13 }
 0x5d1   :  { %5182 = vpow2.f32 %v2895_v3  ;;  %v2558_v27 = vpop.xlane.xlu0 %2557  ;;  %v7416_v54 = vpack.c.bf16 %v5175_v18, %v5173_v36  ;;  %v7418_v4 = vadd.f32 %v5175_v18, %v5173_v36 }
 0x5d2   :  { %5184 = vpow2.f32 %v2877_v41  ;;  %v2735_v37 = vsub.f32 %v7196_v59, %v2558_v27  ;;  %v2736_v6 = vsub.f32 %v7222_v48, %v2558_v27 }
 0x5d3   :  { %3533 = vrot.lane.b32.xlu2 %v6873_v32, %s5575_s26  ;;  %5186 = vpow2.f32 %v2879_v2  ;;  %v3398_v42 = vunpack.c.h.b16 %v7416_v54  ;;  %v3393_v2 = vunpack.c.l.b16 %v7392_v21 }
 0x5d4   :  { %v7426_v35 = vpop.eup %5176  ;;  %v2889_v38 = vmul.f32 1.442695, %v2735_v37  ;;  %v2891_v44 = vmul.f32 1.442695, %v2736_v6  ;;  %v2555_v50 = vpop.xlane.xlu2 %2554  ;;  %v3395_v6 = vunpack.c.l.b16 %v7388_v0 }
 0x5d5   :  { %v7428_v39 = vpop.eup %5178  ;;  %v2733_v5 = vsub.f32 %v7188_v15, %v2555_v50  ;;  %v2734_v59 = vsub.f32 %v7214_v49, %v2555_v50  ;;  %v7432_v48 = vpack.c.b16 %v3400_v52, %v3398_v42  ;;  %v9062_v15 = vld [vmem:[#allocation41_spill] sm:$0xff] }
 0x5d6   :  { %v5181_v14 = vpop.eup %5180  ;;  %5188 = vpow2.f32 %v2889_v38  ;;  %v7443_v18 = vpack.c.bf16 %v7428_v39, %v7426_v35  ;;  %v9063_v38 = vld [vmem:[#allocation87_spill] sm:$0xff] }
 0x5d7   :  { %9060 = vst [vmem:[#allocation96_spill] sm:$0xff] %v7432_v48  ;;  %v5183_v32 = vpop.eup %5182  ;;  %5190 = vpow2.f32 %v2891_v44  ;;  %v2885_v10 = vmul.f32 1.442695, %v2733_v5  ;;  %v2887_v30 = vmul.f32 1.442695, %v2734_v59  ;;  %v9064_v44 = vld [vmem:[#allocation48_spill] sm:$0xff] }
 0x5d8   :  { %v5185_v3 = vpop.eup %5184  ;;  %v7434_v36 = vadd.f32 %v5183_v32, %v5181_v14  ;;  %v3404_v0 = vunpack.c.h.b16 %v7443_v18 }
 0x5d9   :  { %v5187_v41 = vpop.eup %5186  ;;  %5192 = vpow2.f32 %v2885_v10 }
 0x5da   :  { %9061 = vst [vmem:[#allocation97_spill] sm:$0xff] %v7434_v36  ;;  %5194 = vpow2.f32 %v2887_v30  ;;  %3527 = vrot.lane.b32.xlu0 %v9062_v15, %s5575_s26  ;;  %v7439_v49 = vpack.c.bf16 %v5187_v41, %v5185_v3  ;;  %v7445_v27 = vadd.f32 %v5187_v41, %v5185_v3  ;;  %v9065_v30 = vld [vmem:[#allocation60_spill] sm:$0xff]  ;;  %v3451_v41 = vpack.c.b16 %v3395_v6, %v3393_v2 }
 0x5db   :  { %v2567_v37 = vpop.xlane.xlu0 %2566 }
 0x5dc   :  { %v5189_v42 = vpop.eup %5188  ;;  %v2741_v52 = vsub.f32 %v7228_v58, %v2567_v37  ;;  %v2742_v21 = vsub.f32 %v9063_v38, %v2567_v37  ;;  %4994 = vmatmul.msk.bf16.gmra.mxu2 %vm725_vm0, %v9064_v44  ;;  %v2564_v50 = vpop.xlane.xlu2 %2563  ;;  %v3402_v5 = vunpack.c.h.b16 %v7439_v49 }
 0x5dd   :  { %v5191_v59 = vpop.eup %5190  ;;  %v2739_v10 = vsub.f32 %v7218_v55, %v2564_v50  ;;  %v2740_v3 = vsub.f32 %v9065_v30, %v2564_v50 }
 0x5de   :  { %v2901_v15 = vmul.f32 1.442695, %v2741_v52  ;;  %v2903_v48 = vmul.f32 1.442695, %v2742_v21  ;;  %v7456_v37 = vpack.c.bf16 %v5191_v59, %v5189_v42  ;;  %v7458_v38 = vadd.f32 %v5191_v59, %v5189_v42 }
 0x5df   :  { %v5193_v31 = vpop.eup %5192  ;;  %v2897_v58 = vmul.f32 1.442695, %v2739_v10  ;;  %v2899_v36 = vmul.f32 1.442695, %v2740_v3  ;;  %v7460_v29 = vpack.c.b16 %v3404_v0, %v3402_v5  ;;  %v7473_v3 = vpack.c.bf16 %v5183_v32, %v5181_v14 }
 0x5e0   :  { %3580 = vmatmul.bf16.gmra.mxu0 %v3451_v41  ;;  %v5195_v1 = vpop.eup %5194  ;;  %5196 = vpow2.f32 %v2901_v15  ;;  %v3408_v21 = vunpack.c.h.b16 %v7456_v37 }
 0x5e1   :  { %5198 = vpow2.f32 %v2903_v48  ;;  %v7462_v55 = vpack.c.bf16 %v5195_v1, %v5193_v31  ;;  %v7464_v2 = vadd.f32 %v5195_v1, %v5193_v31  ;;  %v3410_v14 = vunpack.c.h.b16 %v7473_v3 }
 0x5e2   :  { %5200 = vpow2.f32 %v2897_v58 }
 0x5e3   :  { %5202 = vpow2.f32 %v2899_v36  ;;  %v2570_v6 = vpop.xlane.xlu1 %2569  ;;  %v3406_v52 = vunpack.c.h.b16 %v7462_v55 }
 0x5e4   :  { %v2743_v50 = vsub.f32 %v7242_v26, %v2570_v6  ;;  %v2744_v42 = vsub.f32 %v7262_v8, %v2570_v6  ;;  %v2230_v59 = vpop.permute.xlu2 %2229  ;;  %v3397_v26 = vunpack.c.l.b16 %v7416_v54  ;;  %v7478_v8 = vpop.f32.mrf.mxu3  ;;  %v3399_v6 = vunpack.c.l.b16 %v7414_v13 }
 0x5e5   :  { %v2319_v5 = vsel %vm725_vm0, %v2230_v59, 0  ;;  %v7471_v10 = vpack.c.b16 %v3408_v21, %v3406_v52  ;;  %v7485_v52 = vpop.f32.mrf.mxu2  ;;  %v9068_v21 = vld [vmem:[#allocation49_spill] sm:$0xff] }
 0x5e6   :  { %v5197_v48 = vpop.eup %5196  ;;  %v2905_v30 = vmul.f32 1.442695, %v2743_v50  ;;  %v2907_v1 = vmul.f32 1.442695, %v2744_v42  ;;  %2434 = vmatpush.bf16.xpose.msra.mxu3 %v2319_v5  ;;  %v3453_v50 = vpack.c.b16 %v3399_v6, %v3397_v26 }
 0x5e7   :  { %9066 = vst [vmem:[#allocation41_spill] sm:$0xff] %v7471_v10  ;;  %v5199_v31 = vpop.eup %5198 }
 0x5e8   :  { %v5201_v36 = vpop.eup %5200  ;;  %5204 = vpow2.f32 %v2905_v30  ;;  %v7475_v41 = vadd.f32 %v5199_v31, %v5197_v48  ;;  %v7491_v54 = vpack.c.bf16 %v5199_v31, %v5197_v48 }
 0x5e9   :  { %v5203_v15 = vpop.eup %5202  ;;  %5206 = vpow2.f32 %v2907_v1 }
 0x5ea   :  { %9067 = vst [vmem:[#allocation87_spill] sm:$0xff] %v7475_v41  ;;  %v7480_v0 = vpack.c.bf16 %v5203_v15, %v5201_v36  ;;  %v7482_v58 = vadd.f32 %v5203_v15, %v5201_v36  ;;  %v3414_v1 = vunpack.c.h.b16 %v7491_v54  ;;  %v9071_v41 = vld [vmem:[#allocation88_spill] sm:$0xff] }
 0x5ec   :  { %4995 = vmatmul.msk.bf16.gmra.mxu2 %vm725_vm0, %v9068_v21  ;;  %v3412_v32 = vunpack.c.h.b16 %v7480_v0  ;;  %v7502_v10 = vpop.f32.mrf.mxu3 }
 0x5ed   :  { %v7508_v6 = vpop.f32.mrf.mxu2 }
 0x5ee   :  { %v5205_v42 = vpop.eup %5204  ;;  %v7493_v59 = vpack.c.b16 %v3412_v32, %v3410_v14 }
 0x5ef   :  { %v5207_v5 = vpop.eup %5206 }
 0x5f0   :  { %9069 = vst [vmem:[#allocation48_spill] sm:$0xff] %v7493_v59  ;;  %3585 = vmatmul.bf16.gmra.mxu0 %v3453_v50  ;;  %v7495_v30 = vpack.c.bf16 %v5207_v5, %v5205_v42  ;;  %v7497_v13 = vadd.f32 %v5207_v5, %v5205_v42  ;;  %v1641_v50 = vpop.f32.mrf.mxu1  ;;  %v2598_v42 = vmax.f32 %v7485_v52, %v7478_v8 }
 0x5f2   :  { %9070 = vst [vmem:[#allocation60_spill] sm:$0xff] %v7497_v13  ;;  %v3416_v36 = vunpack.c.h.b16 %v7495_v30 }
 0x5f3   :  { %v2576_v15 = vpop.xlane.xlu0 %2575  ;;  %3094 = vadd.xlane.f32.xlu1 %v9071_v41  ;;  %v3401_v41 = vunpack.c.l.b16 %v7439_v49 }
 0x5f4   :  { %v2747_v48 = vsub.f32 %v7268_v62, %v2576_v15  ;;  %v2748_v31 = vsub.f32 %v7289_v25, %v2576_v15  ;;  %v7506_v26 = vpack.c.b16 %v3416_v36, %v3414_v1  ;;  %v3403_v62 = vunpack.c.l.b16 %v7443_v18  ;;  %v9073_v36 = vld [vmem:[#allocation51_spill] sm:$0xff] }
 0x5f6   :  { %9072 = vst [vmem:[#allocation49_spill] sm:$0xff] %v7506_v26  ;;  %v2913_v14 = vmul.f32 1.442695, %v2747_v48  ;;  %v2915_v32 = vmul.f32 1.442695, %v2748_v31  ;;  %v3455_v15 = vpack.c.b16 %v3403_v62, %v3401_v41  ;;  %v7521_v31 = vpop.f32.mrf.mxu3  ;;  %v9076_v41 = vld [vmem:[#allocation54_spill] sm:$0xff] }
 0x5f7   :  { %v9078_v26 = vld [vmem:[#allocation52_spill] sm:$0xff] }
 0x5f8   :  { %5208 = vpow2.f32 %v2913_v14  ;;  %v1643_v18 = vpop.f32.mrf.mxu1 }
 0x5f9   :  { %5210 = vpow2.f32 %v2915_v32 }
 0x5fb   :  { %v2579_v5 = vpop.xlane.xlu1 %2578  ;;  %3103 = vadd.xlane.f32.xlu1 %v7358_v51  ;;  %v7525_v51 = vpop.f32.mrf.mxu2 }
 0x5fc   :  { %2599 = vmax.xlane.f32.xlu2 %v2598_v42  ;;  %v2749_v25 = vsub.f32 %v7287_v22, %v2579_v5  ;;  %v2750_v1 = vsub.f32 %v7300_v56, %v2579_v5  ;;  %4996 = vmatmul.msk.bf16.gmra.mxu2 %vm725_vm0, %v9073_v36  ;;  %v2604_v56 = vmax.f32 %v7525_v51, %v7521_v31  ;;  %v9075_v42 = vld [vmem:[#allocation89_spill] sm:$0xff] }
 0x5fd   :  { %v1644_v5 = vadd.f32 %v9076_v41, %v1643_v18 }
 0x5fe   :  { %v7519_v48 = vpop.eup %5208  ;;  %v2917_v14 = vmul.f32 1.442695, %v2749_v25  ;;  %v2919_v49 = vmul.f32 1.442695, %v2750_v1  ;;  %v1642_v1 = vadd.f32 %v9076_v41, %v1641_v50 }
 0x5ff   :  { %v7523_v32 = vpop.eup %5210 }
 0x600   :  { %3590 = vmatmul.bf16.gmra.mxu0 %v3455_v15  ;;  %5212 = vpow2.f32 %v2917_v14  ;;  %v7529_v22 = vadd.f32 %v7523_v32, %v7519_v48  ;;  %v1730_v14 = vpack.c.bf16 %v1644_v5, %v1644_v5  ;;  %v1729_v13 = vpack.c.bf16 %v1642_v1, %v1642_v1 }
 0x601   :  { %5214 = vpow2.f32 %v2919_v49  ;;  %v3405_v49 = vunpack.c.l.b16 %v7462_v55 }
 0x602   :  { %9074 = vst [vmem:[#allocation88_spill] sm:$0xff] %v7529_v22  ;;  %v2180_v50 = vunpack.c.l.b16 %v1730_v14  ;;  %v2179_v5 = vunpack.c.l.b16 %v1729_v13  ;;  %v9080_v13 = vld [vmem:[#allocation40_spill] sm:$0xff] }
 0x603   :  { %2605 = vmax.xlane.f32.xlu1 %v2604_v56  ;;  %v3407_v56 = vunpack.c.l.b16 %v7456_v37 }
 0x604   :  { %3097 = vadd.xlane.f32.xlu0 %v9075_v42  ;;  %v7551_v55 = vpack.c.b16 %v2180_v50, %v2179_v5 }
 0x605   :  { %v3457_v41 = vpack.c.b16 %v3407_v56, %v3405_v49 }
 0x606   :  { %v7535_v62 = vpop.eup %5212 }
 0x607   :  { %v7537_v25 = vpop.eup %5214 }
 0x608   :  { %v7542_v15 = vadd.f32 %v7537_v25, %v7535_v62 }
 0x60a   :  { %9077 = vst [vmem:[#allocation51_spill] sm:$0xff] %v7542_v15 }
 0x60b   :  { %v2585_v22 = vpop.xlane.xlu1 %2584 }
 0x60c   :  { %v2753_v42 = vsub.f32 %v7308_v23, %v2585_v22  ;;  %v2754_v18 = vsub.f32 %v7314_v28, %v2585_v22  ;;  %4997 = vmatmul.msk.bf16.gmra.mxu2 %vm725_vm0, %v9078_v26  ;;  %3109 = vadd.xlane.f32.xlu0 %v7370_v19  ;;  %v2601_v23 = vmax.f32 %v7508_v6, %v7502_v10  ;;  %v3409_v22 = vunpack.c.l.b16 %v7473_v3 }
 0x60e   :  { %v2925_v59 = vmul.f32 1.442695, %v2753_v42  ;;  %v2927_v15 = vmul.f32 1.442695, %v2754_v18 }
 0x610   :  { %3595 = vmatmul.bf16.gmra.mxu0 %v3457_v41  ;;  %5216 = vpow2.f32 %v2925_v59  ;;  %v3411_v59 = vunpack.c.l.b16 %v7480_v0  ;;  %v3120_v0 = vadd.f32 %v7406_v45, %v7400_v57  ;;  %v7582_v57 = vpack.c.bf16 %v7523_v32, %v7519_v48  ;;  %v9081_v48 = vld [vmem:[#allocation92_spill] sm:$0xff] }
 0x611   :  { %5218 = vpow2.f32 %v2927_v15 }
 0x612   :  { %v3459_v15 = vpack.c.b16 %v3411_v59, %v3409_v22  ;;  %v7585_v22 = vpop.f32.mrf.mxu0 }
 0x614   :  { %2227 = vrot.lane.b32.xlu2 %v7551_v55, %s5577_s25  ;;  %2602 = vmax.xlane.f32.xlu0 %v2601_v23 }
 0x616   :  { %v7557_v28 = vpop.eup %5216 }
 0x617   :  { %v7559_v19 = vpop.eup %5218 }
 0x618   :  { %v7563_v37 = vadd.f32 %v7559_v19, %v7557_v28 }
 0x61a   :  { %9079 = vst [vmem:[#allocation89_spill] sm:$0xff] %v7563_v37 }
 0x61c   :  { %3525 = vrot.lane.b32.xlu2 %v9080_v13, %s5575_s26  ;;  %4998 = vmatmul.msk.bf16.gmra.mxu2 %vm725_vm0, %v7551_v55 }
 0x61d   :  { %3115 = vadd.xlane.f32.xlu0 %v7386_v34  ;;  %v2573_v1 = vpop.xlane.xlu2 %2572 }
 0x61e   :  { %v2745_v14 = vsub.f32 %v7254_v47, %v2573_v1  ;;  %v2746_v49 = vsub.f32 %v7276_v11, %v2573_v1 }
 0x620   :  { %3600 = vmatmul.bf16.gmra.mxu0 %v3459_v15  ;;  %v2909_v56 = vmul.f32 1.442695, %v2745_v14  ;;  %v2911_v42 = vmul.f32 1.442695, %v2746_v49  ;;  %v3413_v15 = vunpack.c.l.b16 %v7491_v54 }
 0x622   :  { %5220 = vpow2.f32 %v2909_v56 }
 0x623   :  { %5222 = vpow2.f32 %v2911_v42  ;;  %v2594_v3 = vpop.xlane.xlu1 %2593 }
 0x624   :  { %v2759_v18 = vsub.f32 %v7338_v12, %v2594_v3  ;;  %v2760_v50 = vsub.f32 %v7342_v60, %v2594_v3  ;;  %v3532_v12 = vpop.permute.xlu0 %3531  ;;  %v3415_v60 = vunpack.c.l.b16 %v7495_v30  ;;  %v3420_v30 = vunpack.c.h.b16 %v7582_v57 }
 0x625   :  { %3121 = vadd.xlane.f32.xlu0 %v3120_v0  ;;  %v2582_v34 = vpop.xlane.xlu2 %2581 }
 0x626   :  { %v2937_v41 = vmul.f32 1.442695, %v2759_v18  ;;  %v2939_v5 = vmul.f32 1.442695, %v2760_v50  ;;  %v2751_v47 = vsub.f32 %v7298_v20, %v2582_v34  ;;  %v2752_v11 = vsub.f32 %v7306_v40, %v2582_v34 }
 0x627   :  { %v3126_v20 = vadd.f32 %v7428_v39, %v7426_v35  ;;  %v3461_v49 = vpack.c.b16 %v3415_v60, %v3413_v15  ;;  %v7604_v50 = vpack.c.bf16 %v7537_v25, %v7535_v62 }
 0x628   :  { %v5221_v23 = vpop.eup %5220  ;;  %5224 = vpow2.f32 %v2937_v41  ;;  %v2921_v59 = vmul.f32 1.442695, %v2751_v47  ;;  %v2923_v13 = vmul.f32 1.442695, %v2752_v11  ;;  %v7612_v11 = vpop.f32.mrf.mxu2 }
 0x629   :  { %v5223_v45 = vpop.eup %5222  ;;  %5226 = vpow2.f32 %v2939_v5 }
 0x62a   :  { %5228 = vpow2.f32 %v2921_v59  ;;  %v7589_v40 = vpack.c.bf16 %v5223_v45, %v5221_v23  ;;  %v7591_v1 = vadd.f32 %v5223_v45, %v5221_v23  ;;  %v7616_v59 = vpop.f32.mrf.mxu0 }
 0x62b   :  { %5230 = vpow2.f32 %v2923_v13  ;;  %v3422_v13 = vunpack.c.h.b16 %v7604_v50 }
 0x62c   :  { %4999 = vmatmul.msk.bf16.gmra.mxu2 %vm725_vm0, %v9081_v48  ;;  %v3418_v32 = vunpack.c.h.b16 %v7589_v40 }
 0x62d   :  { %3127 = vadd.xlane.f32.xlu0 %v3126_v20 }
 0x62e   :  { %v2588_v14 = vpop.xlane.xlu2 %2587  ;;  %v5225_v56 = vpop.eup %5224  ;;  %v7600_v42 = vpack.c.b16 %v3420_v30, %v3418_v32  ;;  %v3417_v30 = vunpack.c.l.b16 %v7589_v40 }
 0x62f   :  { %v2755_v35 = vsub.f32 %v7319_v63, %v2588_v14  ;;  %v2756_v39 = vsub.f32 %v7324_v43, %v2588_v14  ;;  %v5227_v0 = vpop.eup %5226 }
 0x630   :  { %3605 = vmatmul.bf16.gmra.mxu0 %v3461_v49  ;;  %v5229_v54 = vpop.eup %5228  ;;  %v7606_v34 = vadd.f32 %v5227_v0, %v5225_v56  ;;  %v3310_v40 = vpack.c.bf16 %v5227_v0, %v5225_v56 }
 0x631   :  { %v2929_v3 = vmul.f32 1.442695, %v2755_v35  ;;  %v2931_v18 = vmul.f32 1.442695, %v2756_v39  ;;  %v5231_v41 = vpop.eup %5230  ;;  %v2591_v5 = vpop.xlane.xlu0 %2590 }
 0x632   :  { %v2757_v63 = vsub.f32 %v7328_v9, %v2591_v5  ;;  %v2758_v43 = vsub.f32 %v7330_v46, %v2591_v5  ;;  %v7610_v47 = vpack.c.bf16 %v5231_v41, %v5229_v54  ;;  %v7614_v23 = vadd.f32 %v5231_v41, %v5229_v54  ;;  %v9082_v5 = vld [vmem:[#allocation57_spill] sm:$0xff] }
 0x633   :  { %5232 = vpow2.f32 %v2929_v3  ;;  %v7624_v46 = vpack.c.bf16 %v7559_v19, %v7557_v28  ;;  %v3419_v54 = vunpack.c.l.b16 %v7582_v57  ;;  %v3432_v0 = vunpack.c.h.b16 %v3310_v40 }
 0x634   :  { %5234 = vpow2.f32 %v2931_v18  ;;  %v2933_v62 = vmul.f32 1.442695, %v2757_v63  ;;  %v2935_v25 = vmul.f32 1.442695, %v2758_v43  ;;  %v3424_v45 = vunpack.c.h.b16 %v7610_v47  ;;  %v9083_v43 = vld [vmem:[#allocation9_spill] sm:$0xff] }
 0x635   :  { %v3426_v3 = vunpack.c.h.b16 %v7624_v46 }
 0x636   :  { %v3534_v60 = vpop.permute.xlu2 %3533  ;;  %5236 = vpow2.f32 %v2933_v62  ;;  %v7620_v9 = vpack.c.b16 %v3424_v45, %v3422_v13  ;;  %v3463_v62 = vpack.c.b16 %v3419_v54, %v3417_v30  ;;  %v9084_v45 = vld [vmem:[#allocation46_spill] sm:$0xff] }
 0x637   :  { %3649 = vmatpush.bf16.msra.mxu0 %v3534_v60  ;;  %5238 = vpow2.f32 %v2935_v25 }
 0x639   :  { %v5233_v20 = vpop.eup %5232  ;;  %v2597_v32 = vpop.xlane.xlu0 %2596 }
 0x63a   :  { %v5235_v15 = vpop.eup %5234  ;;  %v2761_v14 = vsub.f32 %v7378_v17, %v2597_v32  ;;  %v2762_v49 = vsub.f32 %v7372_v16, %v2597_v32  ;;  %v7637_v16 = vpop.f32.mrf.mxu2  ;;  %v9086_v32 = vld [vmem:[#allocation91_spill] sm:$0xff] }
 0x63b   :  { %3650 = vmatpush.bf16.msra.mxu0 %v3532_v12  ;;  %v3308_v35 = vpack.c.bf16 %v5235_v15, %v5233_v20  ;;  %v7629_v39 = vadd.f32 %v5235_v15, %v5233_v20  ;;  %v3530_v12 = vpop.permute.xlu1 %3529 }
 0x63c   :  { %v5237_v18 = vpop.eup %5236  ;;  %v2941_v28 = vmul.f32 1.442695, %v2761_v14  ;;  %v2943_v19 = vmul.f32 1.442695, %v2762_v49  ;;  %5000 = vmatmul.msk.bf16.gmra.mxu2 %vm725_vm0, %v9082_v5  ;;  %v9087_v49 = vld [vmem:[#allocation8_spill] sm:$0xff] }
 0x63d   :  { %v7633_v41 = vpop.f32.mrf.mxu0  ;;  %v3428_v17 = vunpack.c.h.b16 %v3308_v35  ;;  %v5239_v63 = vpop.eup %5238  ;;  %1220 = vxpose.xlu1.b32.start [1/16] (narrow) %v9083_v43, 32 }
 0x63e   :  { %5240 = vpow2.f32 %v2941_v28  ;;  %v3309_v57 = vpack.c.bf16 %v5239_v63, %v5237_v18  ;;  %v7642_v13 = vadd.f32 %v5239_v63, %v5237_v18  ;;  %v3421_v18 = vunpack.c.l.b16 %v7604_v50  ;;  %v9089_v63 = vld [vmem:[#allocation10_spill] sm:$0xff]  ;;  %v9090_v50 = vld [vmem:[#allocation11_spill] sm:$0xff] }
 0x63f   :  { %3651 = vmatpush.bf16.msra.mxu0 %v3530_v12  ;;  %v7640_v25 = vpack.c.b16 %v3428_v17, %v3426_v3  ;;  %5242 = vpow2.f32 %v2943_v19  ;;  %v3423_v3 = vunpack.c.l.b16 %v7610_v47  ;;  %v9088_v19 = vld [vmem:[#allocation61_spill] sm:$0xff] }
 0x640   :  { %3610 = vmatmul.bf16.gmra.mxu0 %v3463_v62  ;;  %v3430_v56 = vunpack.c.h.b16 %v3309_v57 }
 0x641   :  { %3925 = vrot.lane.b32.xlu0 %v9084_v45, %s5575_s26  ;;  %v3465_v12 = vpack.c.b16 %v3423_v3, %v3421_v18 }
 0x642   :  { %v7646_v60 = vpack.c.b16 %v3432_v0, %v3430_v56  ;;  %v7655_v14 = vpop.f32.mrf.mxu2  ;;  %v3427_v56 = vunpack.c.l.b16 %v3308_v35  ;;  %v3425_v0 = vunpack.c.l.b16 %v7624_v46  ;;  %v9094_v35 = vld [vmem:[#allocation13_spill] sm:$0xff] }
 0x644   :  { %9085 = vst [vmem:[#allocation54_spill] sm:$0xff] %v7646_v60  ;;  %v7648_v20 = vpop.eup %5240  ;;  %v3467_v3 = vpack.c.b16 %v3427_v56, %v3425_v0  ;;  %v9098_v56 = vld [vmem:[#allocation14_spill] sm:$0xff] }
 0x645   :  { %v7650_v15 = vpop.f32.mrf.mxu0  ;;  %3100 = vadd.xlane.f32.xlu2 %v9086_v32  ;;  %v7653_v30 = vpop.eup %5242  ;;  %1221 = vxpose.xlu1.b32.cont [2/16] (narrow) %v9087_v49, 32  ;;  %v9092_v49 = vld [vmem:[#allocation12_spill] sm:$0xff] }
 0x646   :  { %v7660_v54 = vadd.f32 %v7653_v30, %v7648_v20 }
 0x649   :  { %3907 = vrot.lane.b32.xlu0 %v9073_v36, %s5575_s26 }
 0x64a   :  { %v7672_v43 = vpop.f32.mrf.mxu2 }
 0x64c   :  { %5001 = vmatmul.msk.bf16.gmra.mxu2 %vm725_vm0, %v9088_v19  ;;  %v3528_v17 = vpop.permute.xlu0 %3527 }
 0x64d   :  { %v7666_v28 = vpop.f32.mrf.mxu0  ;;  %3106 = vadd.xlane.f32.xlu2 %v7374_v61  ;;  %3652 = vmatpush.bf16.msra.mxu0 %v3528_v17  ;;  %v9091_v61 = vld [vmem:[#allocation55_spill] sm:$0xff]  ;;  %v3429_v17 = vunpack.c.l.b16 %v3309_v57 }
 0x64e   :  { %1222 = vxpose.xlu1.b32.cont [3/16] (narrow) %v9089_v63, 32  ;;  %v3431_v63 = vunpack.c.l.b16 %v3310_v40 }
 0x650   :  { %3615 = vmatmul.bf16.gmra.mxu0 %v3465_v12  ;;  %v3469_v0 = vpack.c.b16 %v3431_v63, %v3429_v17 }
 0x652   :  { %v7678_v47 = vpop.f32.mrf.mxu2 }
 0x655   :  { %v7674_v62 = vpop.f32.mrf.mxu0  ;;  %3112 = vadd.xlane.f32.xlu2 %v7394_v24 }
 0x656   :  { %1223 = vxpose.xlu1.b32.cont [4/16] (narrow) %v9090_v50, 32  ;;  %v9096_v50 = vld [vmem:[#allocation43_spill] sm:$0xff] }
 0x65a   :  { %v7687_v18 = vpop.f32.mrf.mxu2 }
 0x65b   :  { %9093 = vst [vmem:[#allocation52_spill] sm:$0xff] %v7687_v18 }
 0x65c   :  { %5002 = vmatmul.msk.bf16.gmra.mxu2 %vm725_vm0, %v9091_v61 }
 0x65d   :  { %v7681_v32 = vpop.f32.mrf.mxu0  ;;  %3118 = vadd.xlane.f32.xlu2 %v7418_v4 }
 0x65e   :  { %1224 = vxpose.xlu1.b32.cont [5/16] (narrow) %v9092_v49, 32 }
 0x660   :  { %3620 = vmatmul.bf16.gmra.mxu0 %v3467_v3 }
 0x662   :  { %v7699_v4 = vpop.f32.mrf.mxu2 }
 0x663   :  { %9097 = vst [vmem:[#allocation92_spill] sm:$0xff] %v7699_v4 }
 0x665   :  { %v7689_v24 = vpop.f32.mrf.mxu0  ;;  %3124 = vadd.xlane.f32.xlu2 %v7445_v27 }
 0x666   :  { %1225 = vxpose.xlu1.b32.cont [6/16] (narrow) %v9094_v35, 32  ;;  %v7693_v46 = vpop.xlane.xlu1 %3094 }
 0x66c   :  { %5003 = vmatmul.msk.bf16.gmra.mxu2 %vm725_vm0, %v9096_v50 }
 0x66d   :  { %v7695_v12 = vpop.f32.mrf.mxu0 }
 0x66e   :  { %9095 = vst [vmem:[#allocation40_spill] sm:$0xff] %v7695_v12  ;;  %1226 = vxpose.xlu1.b32.cont [7/16] (narrow) %v9098_v56, 32  ;;  %v7702_v49 = vpop.xlane.xlu1 %3103  ;;  %v9099_v12 = vld [vmem:[#allocation15_spill] sm:$0xff] }
 0x66f   :  { %v2600_v3 = vpop.xlane.xlu2 %2599 }
 0x670   :  { %3625 = vmatmul.bf16.gmra.mxu0 %v3469_v0  ;;  %v2763_v27 = vsub.f32 %v7485_v52, %v2600_v3  ;;  %v2764_v35 = vsub.f32 %v7478_v8, %v2600_v3  ;;  %v7715_v8 = vpop.f32.mrf.mxu2 }
 0x672   :  { %v2945_v57 = vmul.f32 1.442695, %v2763_v27  ;;  %v2947_v40 = vmul.f32 1.442695, %v2764_v35  ;;  %v3311_v35 = vpack.c.bf16 %v7653_v30, %v7648_v20 }
 0x673   :  { %3130 = vadd.xlane.f32.xlu0 %v7464_v2 }
 0x674   :  { %5244 = vpow2.f32 %v2945_v57 }
 0x675   :  { %5246 = vpow2.f32 %v2947_v40  ;;  %v7707_v37 = vpop.f32.mrf.mxu0 }
 0x676   :  { %1227 = vxpose.xlu1.b32.cont [8/16] (narrow) %v9099_v12, 32  ;;  %v2606_v17 = vpop.xlane.xlu1 %2605 }
 0x677   :  { %v2228_v56 = vpop.permute.xlu2 %2227  ;;  %v2767_v0 = vsub.f32 %v7525_v51, %v2606_v17  ;;  %v2768_v52 = vsub.f32 %v7521_v31, %v2606_v17  ;;  %v7713_v60 = vpop.xlane.xlu0 %3097  ;;  %v9102_v31 = vld [vmem:[#allocation45_spill] sm:$0xff]  ;;  %v3433_v17 = vunpack.c.l.b16 %v3311_v35 }
 0x678   :  { %v2316_v63 = vsel %vm725_vm0, %v2228_v56, 0  ;;  %v9103_v56 = vld [vmem:[#allocation16_spill] sm:$0xff] }
 0x679   :  { %2435 = vmatpush.bf16.xpose.msra.mxu3 %v2316_v63  ;;  %v2953_v3 = vmul.f32 1.442695, %v2767_v0  ;;  %v2955_v27 = vmul.f32 1.442695, %v2768_v52  ;;  %v3434_v0 = vunpack.c.h.b16 %v3311_v35  ;;  %v9107_v35 = vld [vmem:[#allocation17_spill] sm:$0xff] }
 0x67a   :  { %v5245_v2 = vpop.eup %5244 }
 0x67b   :  { %v5247_v12 = vpop.eup %5246  ;;  %5248 = vpow2.f32 %v2953_v3 }
 0x67c   :  { %v3312_v57 = vpack.c.bf16 %v5247_v12, %v5245_v2  ;;  %v7719_v40 = vadd.f32 %v5247_v12, %v5245_v2  ;;  %5250 = vpow2.f32 %v2955_v27  ;;  %5004 = vmatmul.msk.bf16.gmra.mxu2 %vm725_vm0, %v9102_v31 }
 0x67d   :  { %v7721_v51 = vpop.f32.mrf.mxu0  ;;  %3909 = vrot.lane.b32.xlu2 %v9078_v26, %s5575_s26 }
 0x67e   :  { %9100 = vst [vmem:[#allocation57_spill] sm:$0xff] %v7719_v40  ;;  %1228 = vxpose.xlu1.b32.cont [9/16] (narrow) %v9103_v56, 32  ;;  %v3435_v63 = vunpack.c.l.b16 %v3312_v57  ;;  %v3436_v20 = vunpack.c.h.b16 %v3312_v57  ;;  %v7734_v40 = vpop.f32.mrf.mxu2 }
 0x67f   :  { %9101 = vst [vmem:[#allocation9_spill] sm:$0xff] %v7721_v51  ;;  %v3526_v30 = vpop.permute.xlu2 %3525  ;;  %v7728_v52 = vpop.xlane.xlu0 %3109 }
 0x680   :  { %5006 = vmatmul.msk.bf16.vlgmr.msra.gmra.mxu3 %vm725_vm0, %v7138_v33  ;;  %3653 = vmatpush.bf16.msra.mxu0 %v3526_v30  ;;  %v3471_v2 = vpack.c.b16 %v3435_v63, %v3433_v17  ;;  %v7732_v3 = vpack.c.b16 %v3436_v20, %v3434_v0 }
 0x681   :  { %v5249_v27 = vpop.eup %5248 }
 0x682   :  { %9104 = vst [vmem:[#allocation46_spill] sm:$0xff] %v7732_v3  ;;  %3630 = vmatmul.bf16.gmra.mxu0 %v3471_v2  ;;  %v5251_v12 = vpop.eup %5250 }
 0x683   :  { %v7736_v56 = vadd.f32 %v5251_v12, %v5249_v27 }
 0x685   :  { %9105 = vst [vmem:[#allocation91_spill] sm:$0xff] %v7736_v56  ;;  %v7738_v51 = vpop.f32.mrf.mxu0  ;;  %3923 = vrot.lane.b32.xlu2 %v9102_v31, %s5575_s26 }
 0x686   :  { %9106 = vst [vmem:[#allocation8_spill] sm:$0xff] %v7738_v51  ;;  %1229 = vxpose.xlu1.b32.cont [10/16] (narrow) %v9107_v35, 32  ;;  %v7747_v30 = vpop.f32.mrf.mxu2  ;;  %v9109_v35 = vld [vmem:[#allocation18_spill] sm:$0xff] }
 0x687   :  { %3905 = vrot.lane.b32.xlu0 %v9068_v21, %s5575_s26  ;;  %v2603_v57 = vpop.xlane.xlu0 %2602 }
 0x688   :  { %v2765_v17 = vsub.f32 %v7508_v6, %v2603_v57  ;;  %v2766_v63 = vsub.f32 %v7502_v10, %v2603_v57  ;;  %v3314_v6 = vpack.c.bf16 %v5251_v12, %v5249_v27 }
 0x68a   :  { %v2949_v0 = vmul.f32 1.442695, %v2765_v17  ;;  %v2951_v20 = vmul.f32 1.442695, %v2766_v63  ;;  %v3439_v56 = vunpack.c.l.b16 %v3314_v6  ;;  %v3440_v27 = vunpack.c.h.b16 %v3314_v6 }
 0x68c   :  { %5252 = vpow2.f32 %v2949_v0  ;;  %5005 = vmatmul.msk.bf16.gmra.mxu2 %vm725_vm0, %v9084_v45 }
 0x68d   :  { %v7749_v2 = vpop.f32.mrf.mxu0  ;;  %3921 = vrot.lane.b32.xlu2 %v9096_v50, %s5575_s26  ;;  %5254 = vpow2.f32 %v2951_v20  ;;  %v9112_v20 = vld [vmem:[#allocation19_spill] sm:$0xff] }
 0x68e   :  { %9108 = vst [vmem:[#allocation61_spill] sm:$0xff] %v7749_v2  ;;  %1230 = vxpose.xlu1.b32.cont [11/16] (narrow) %v9109_v35, 32  ;;  %5256 = vrcp.f32 %v7693_v46 }
 0x68f   :  { %3903 = vrot.lane.b32.xlu0 %v9064_v44, %s5575_s26  ;;  %5258 = vrcp.f32 %v7713_v60  ;;  %v9148_v60 = vld [vmem:[#allocation51_spill] sm:$0xff] }
 0x690   :  { %5007 = vmatmul.msk.bf16.gmra.mxu3 %vm725_vm0, %v7142_v53  ;;  %v7767_v35 = vpop.xlane.xlu0 %3115  ;;  %5260 = vrcp.f32 %v7702_v49 }
 0x692   :  { %v5253_v10 = vpop.eup %5252 }
 0x693   :  { %v5255_v57 = vpop.eup %5254 }
 0x694   :  { %v3313_v63 = vpack.c.bf16 %v5255_v57, %v5253_v10  ;;  %v7764_v0 = vadd.f32 %v5255_v57, %v5253_v10  ;;  %v9115_v10 = vld [vmem:[#allocation58_spill] sm:$0xff]  ;;  %v9116_v57 = vld [vmem:[#allocation20_spill] sm:$0xff] }
 0x695   :  { %v7760_v17 = vpop.f32.mrf.mxu0  ;;  %3919 = vrot.lane.b32.xlu2 %v9091_v61, %s5575_s26 }
 0x696   :  { %9110 = vst [vmem:[#allocation10_spill] sm:$0xff] %v7760_v17  ;;  %1231 = vxpose.xlu1.b32.cont [12/16] (narrow) %v9112_v20, 32  ;;  %v3437_v2 = vunpack.c.l.b16 %v3313_v63  ;;  %v3438_v51 = vunpack.c.h.b16 %v3313_v63  ;;  %v5105_v63 = vld [vmem:[%s8820_s3 + $0x8] sm:$0xff] }
 0x697   :  { %9111 = vst [vmem:[#allocation11_spill] sm:$0xff] %v7764_v0  ;;  %3901 = vrot.lane.b32.xlu0 %v6952_v7, %s5575_s26  ;;  %4400 = vmatpush.bf16.msrb.mxu1 %v5105_v63 }
 0x698   :  { %v3473_v12 = vpack.c.b16 %v3439_v56, %v3437_v2  ;;  %v7771_v3 = vpack.c.b16 %v3440_v27, %v3438_v51  ;;  %v7782_v20 = vpop.xlane.xlu0 %3121  ;;  %v9118_v51 = vld [vmem:[#allocation21_spill] sm:$0xff]  ;;  %v9119_v2 = vld [vmem:[#allocation90_spill] sm:$0xff] }
 0x69a   :  { %9113 = vst [vmem:[#allocation55_spill] sm:$0xff] %v7771_v3  ;;  %3635 = vmatmul.bf16.gmra.mxu0 %v3473_v12  ;;  %v9121_v12 = vld [vmem:[#allocation22_spill] sm:$0xff] }
 0x69d   :  { %v7773_v17 = vpop.f32.mrf.mxu0  ;;  %3899 = vrot.lane.b32.xlu2 %v9115_v10, %s5575_s26 }
 0x69e   :  { %9114 = vst [vmem:[#allocation12_spill] sm:$0xff] %v7773_v17  ;;  %1232 = vxpose.xlu1.b32.cont [13/16] (narrow) %v9116_v57, 32  ;;  %v9123_v57 = vld [vmem:[#allocation23_spill] sm:$0xff] }
 0x69f   :  { %3915 = vrot.lane.b32.xlu0 %v9082_v5, %s5575_s26 }
 0x6a0   :  { %5008 = vmatmul.msk.bf16.gmra.mxu3 %vm725_vm0, %v9115_v10  ;;  %v7791_v56 = vpop.xlane.xlu0 %3127 }
 0x6a5   :  { %v7784_v6 = vpop.f32.mrf.mxu0  ;;  %3913 = vrot.lane.b32.xlu2 %v9081_v48, %s5575_s26 }
 0x6a6   :  { %9117 = vst [vmem:[#allocation13_spill] sm:$0xff] %v7784_v6  ;;  %1233 = vxpose.xlu1.b32.cont [14/16] (narrow) %v9118_v51, 32  ;;  %v9134_v6 = vld [vmem:[#allocation96_spill] sm:$0xff] }
 0x6a7   :  { %3897 = vrot.lane.b32.xlu0 %v7142_v53, %s5575_s26 }
 0x6aa   :  { %3654 = vmatmul.bf16.vlgmr.msra.gmra.mxu0 %v9119_v2  ;;  %v9124_v2 = vld [vmem:[#allocation93_spill] sm:$0xff] }
 0x6ad   :  { %v7797_v27 = vpop.f32.mrf.mxu0 }
 0x6ae   :  { %9120 = vst [vmem:[#allocation43_spill] sm:$0xff] %v7797_v27  ;;  %1234 = vxpose.xlu1.b32.cont [15/16] (narrow) %v9121_v12, 32  ;;  %v9127_v12 = vld [vmem:[#allocation94_spill] sm:$0xff] }
 0x6af   :  { %3895 = vrot.lane.b32.xlu0 %v7138_v33, %s5575_s26 }
 0x6b0   :  { %5009 = vmatmul.msk.bf16.gmra.mxu3 %vm725_vm0, %v6952_v7 }
 0x6b3   :  { %v3926_v53 = vpop.permute.xlu0 %3925 }
 0x6b4   :  { %4032 = vmatpush.bf16.msrb.mxu3 %v3926_v53 }
 0x6b5   :  { %v7804_v10 = vpop.f32.mrf.mxu0 }
 0x6b6   :  { %9122 = vst [vmem:[#allocation14_spill] sm:$0xff] %v7804_v10  ;;  %1235 = vxpose.xlu1.b32.end [16/16] (narrow) %v9123_v57, 32 }
 0x6b8   :  { %v7807_v51 = vpop.xlane.xlu2 %3100 }
 0x6b9   :  { %5262 = vrcp.f32 %v7807_v51 }
 0x6ba   :  { %3659 = vmatmul.bf16.gmra.mxu0 %v9124_v2  ;;  %v7828_v2 = vpop.f32.mrf.mxu3  ;;  %5264 = vrcp.f32 %v7728_v52  ;;  %v9150_v52 = vld [vmem:[#allocation87_spill] sm:$0xff] }
 0x6bd   :  { %v7810_v27 = vpop.f32.mrf.mxu0 }
 0x6be   :  { %9125 = vst [vmem:[#allocation15_spill] sm:$0xff] %v7810_v27 }
 0x6c0   :  { %5010 = vmatmul.msk.bf16.gmra.mxu3 %vm725_vm0, %v9064_v44  ;;  %v7814_v63 = vpop.xlane.xlu2 %3106  ;;  %v2607_v44 = vmax.f32 %v7612_v11, %v7828_v2 }
 0x6c1   :  { %5266 = vrcp.f32 %v7814_v63 }
 0x6c5   :  { %v7816_v33 = vpop.f32.mrf.mxu0 }
 0x6c6   :  { %9126 = vst [vmem:[#allocation45_spill] sm:$0xff] %v7816_v33 }
 0x6c8   :  { %v7818_v7 = vpop.xlane.xlu2 %3112 }
 0x6ca   :  { %3664 = vmatmul.bf16.gmra.mxu0 %v9127_v12  ;;  %v9130_v12 = vld [vmem:[#allocation97_spill] sm:$0xff] }
 0x6cd   :  { %v7821_v53 = vpop.f32.mrf.mxu0 }
 0x6ce   :  { %9128 = vst [vmem:[#allocation16_spill] sm:$0xff] %v7821_v53  ;;  %3133 = vadd.xlane.f32.xlu2 %v7458_v38  ;;  %v9131_v53 = vld [vmem:[#allocation95_spill] sm:$0xff]  ;;  %v7838_v38 = vpop.f32.mrf.mxu3 }
 0x6d0   :  { %5011 = vmatmul.msk.bf16.gmra.mxu3 %vm725_vm0, %v9068_v21  ;;  %v7826_v57 = vpop.xlane.xlu2 %3118  ;;  %v2610_v21 = vmax.f32 %v7637_v16, %v7838_v38 }
 0x6d5   :  { %v7832_v27 = vpop.f32.mrf.mxu0 }
 0x6d6   :  { %9129 = vst [vmem:[#allocation17_spill] sm:$0xff] %v7832_v27  ;;  %2608 = vmax.xlane.f32.xlu2 %v2607_v44  ;;  %v3908_v44 = vpop.permute.xlu0 %3907 }
 0x6d8   :  { %v7834_v33 = vpop.xlane.xlu2 %3124 }
 0x6d9   :  { %3136 = vadd.xlane.f32.xlu0 %v9130_v12 }
 0x6da   :  { %3669 = vmatmul.bf16.gmra.mxu0 %v9131_v53 }
 0x6dd   :  { %v7843_v10 = vpop.f32.mrf.mxu0 }
 0x6de   :  { %3139 = vadd.xlane.f32.xlu2 %v7482_v58  ;;  %9132 = vst [vmem:[#allocation18_spill] sm:$0xff] %v7843_v10 }
 0x6e0   :  { %5012 = vmatmul.msk.bf16.gmra.mxu3 %vm725_vm0, %v9073_v36  ;;  %v3910_v27 = vpop.permute.xlu2 %3909 }
 0x6e1   :  { %3943 = vmatpush.bf16.msra.mxu2 %v3910_v27  ;;  %2611 = vmax.xlane.f32.xlu0 %v2610_v21 }
 0x6e5   :  { %3944 = vmatpush.bf16.msra.mxu2 %v3908_v44  ;;  %v7847_v53 = vpop.f32.mrf.mxu0 }
 0x6e6   :  { %9133 = vst [vmem:[#allocation19_spill] sm:$0xff] %v7847_v53  ;;  %v7852_v17 = vpop.xlane.xlu0 %3130 }
 0x6e7   :  { %9135 = vst [vmem:[#allocation58_spill] sm:$0xff] %v7852_v17 }
 0x6e8   :  { %v3924_v12 = vpop.permute.xlu2 %3923 }
 0x6e9   :  { %4033 = vmatpush.bf16.msrb.mxu3 %v3924_v12 }
 0x6ea   :  { %3674 = vmatmul.bf16.gmra.mxu0 %v9134_v6 }
 0x6ed   :  { %v7854_v10 = vpop.f32.mrf.mxu0 }
 0x6ee   :  { %9136 = vst [vmem:[#allocation20_spill] sm:$0xff] %v7854_v10 }
 0x6f0   :  { %5013 = vmatmul.msk.bf16.gmra.mxu3 %vm725_vm0, %v9078_v26  ;;  %v3922_v58 = vpop.permute.xlu2 %3921 }
 0x6f1   :  { %4034 = vmatpush.bf16.msrb.mxu3 %v3922_v58 }
 0x6f5   :  { %v7857_v21 = vpop.f32.mrf.mxu0 }
 0x6f6   :  { %9137 = vst [vmem:[#allocation21_spill] sm:$0xff] %v7857_v21 }
 0x6f8   :  { %v3920_v36 = vpop.permute.xlu2 %3919 }
 0x6f9   :  { %4035 = vmatpush.bf16.msrb.mxu3 %v3920_v36  ;;  %v3906_v27 = vpop.permute.xlu0 %3905  ;;  %v9139_v36 = vld [vmem:[#allocation41_spill] sm:$0xff] }
 0x6fa   :  { %3945 = vmatpush.bf16.msra.mxu2 %v3906_v27  ;;  %3679 = vmatmul.bf16.gmra.mxu0 %v7460_v29 }
 0x6ff   :  { %v7865_v12 = vpop.f32.mrf.mxu0 }
 0x700   :  { %5014 = vmatmul.msk.bf16.gmra.mxu3 %vm725_vm0, %v7551_v55  ;;  %9138 = vst [vmem:[#allocation90_spill] sm:$0xff] %v7865_v12  ;;  %v3900_v10 = vpop.permute.xlu2 %3899  ;;  %v7885_v12 = vpop.f32.mrf.mxu2 }
 0x701   :  { %v3904_v6 = vpop.permute.xlu0 %3903 }
 0x702   :  { %3946 = vmatpush.bf16.msra.mxu2 %v3904_v6 }
 0x703   :  { %v7861_v26 = vpop.f32.mrf.mxu3 }
 0x704   :  { %v2613_v44 = vmax.f32 %v7655_v14, %v7861_v26 }
 0x706   :  { %2614 = vmax.xlane.f32.xlu0 %v2613_v44 }
 0x707   :  { %v7872_v6 = vpop.f32.mrf.mxu0 }
 0x708   :  { %9140 = vst [vmem:[#allocation22_spill] sm:$0xff] %v7872_v6  ;;  %v9142_v6 = vld [vmem:[#allocation48_spill] sm:$0xff]  ;;  %v7898_v0 = vpop.f32.mrf.mxu2 }
 0x709   :  { %v3902_v58 = vpop.permute.xlu0 %3901 }
 0x70a   :  { %3947 = vmatpush.bf16.msra.mxu2 %v3902_v58  ;;  %3684 = vmatmul.bf16.gmra.mxu0 %v9139_v36  ;;  %v5104_v36 = vld [vmem:[%s8820_s3] sm:$0xff] }
 0x70b   :  { %v7868_v29 = vpop.f32.mrf.mxu3  ;;  %4401 = vmatpush.bf16.msrb.mxu1 %v5104_v36 }
 0x70c   :  { %v2616_v27 = vmax.f32 %v7672_v43, %v7868_v29 }
 0x70e   :  { %3948 = vmatpush.bf16.msra.mxu2 %v3900_v10  ;;  %2617 = vmax.xlane.f32.xlu2 %v2616_v27 }
 0x710   :  { %5015 = vmatmul.msk.bf16.gmra.mxu3 %vm725_vm0, %v9081_v48  ;;  %3917 = vrot.lane.b32.xlu1 %v9088_v19, %s5575_s26 }
 0x711   :  { %v7878_v44 = vpop.permute.xlu0 %3915 }
 0x713   :  { %v7880_v58 = vpop.f32.mrf.mxu3 }
 0x717   :  { %v7887_v10 = vpop.f32.mrf.mxu0 }
 0x718   :  { %9141 = vst [vmem:[#allocation23_spill] sm:$0xff] %v7887_v10 }
 0x719   :  { %v3898_v27 = vpop.permute.xlu0 %3897 }
 0x71a   :  { %3949 = vmatpush.bf16.msra.mxu2 %v3898_v27  ;;  %3689 = vmatmul.bf16.gmra.mxu0 %v9142_v6 }
 0x71b   :  { %v7890_v48 = vpop.f32.mrf.mxu3 }
 0x71c   :  { %9143 = vst [vmem:[#allocation93_spill] sm:$0xff] %v7890_v48  ;;  %v2622_v21 = vmax.f32 %v7687_v18, %v7890_v48 }
 0x71e   :  { %2623 = vmax.xlane.f32.xlu0 %v2622_v21  ;;  %v7907_v21 = vpop.f32.mrf.mxu2 }
 0x71f   :  { %v7894_v53 = vpop.f32.mrf.mxu0 }
 0x720   :  { %9144 = vst [vmem:[#allocation94_spill] sm:$0xff] %v7894_v53  ;;  %5016 = vmatmul.msk.bf16.gmra.mxu3 %vm725_vm0, %v9082_v5  ;;  %v9146_v53 = vld [vmem:[#allocation49_spill] sm:$0xff] }
 0x721   :  { %v3896_v36 = vpop.permute.xlu0 %3895 }
 0x722   :  { %3950 = vmatpush.bf16.msra.mxu2 %v3896_v36  ;;  %v9147_v36 = vld [vmem:[#allocation88_spill] sm:$0xff] }
 0x723   :  { %v7900_v10 = vpop.f32.mrf.mxu3 }
 0x724   :  { %9145 = vst [vmem:[#allocation97_spill] sm:$0xff] %v7900_v10  ;;  %v2625_v6 = vmax.f32 %v7699_v4, %v7900_v10 }
 0x726   :  { %3911 = vrot.lane.b32.xlu2 %v7551_v55, %s5575_s26  ;;  %2626 = vmax.xlane.f32.xlu0 %v2625_v6  ;;  %v5257_v55 = vpop.eup %5256 }
 0x727   :  { %v3655_v27 = vpop.f32.mrf.mxu0  ;;  %v5259_v46 = vpop.eup %5258 }
 0x728   :  { %v3656_v48 = vadd.f32 %v3655_v27, %v7585_v22  ;;  %v2619_v27 = vmax.f32 %v7678_v47, %v7880_v58 }
 0x72a   :  { %3694 = vmatmul.bf16.gmra.mxu0 %v9146_v53  ;;  %v4185_v4 = vmul.f32 %v5257_v55, %v3656_v48  ;;  %v7920_v53 = vpop.f32.mrf.mxu2  ;;  %v9149_v55 = vld [vmem:[#allocation60_spill] sm:$0xff] }
 0x72b   :  { %v7910_v5 = vpop.f32.mrf.mxu3 }
 0x72e   :  { %3151 = vadd.xlane.f32.xlu0 %v9147_v36 }
 0x72f   :  { %v3657_v10 = vpop.f32.mrf.mxu0 }
 0x730   :  { %5017 = vmatmul.msk.bf16.gmra.mxu3 %vm725_vm0, %v9088_v19  ;;  %v3658_v6 = vadd.f32 %v3657_v10, %v7616_v59  ;;  %v7926_v19 = vpop.permute.xlu2 %3913  ;;  %v5261_v10 = vpop.eup %5260 }
 0x731   :  { %v5263_v49 = vpop.eup %5262 }
 0x732   :  { %v4186_v18 = vmul.f32 %v5259_v46, %v3658_v6 }
 0x733   :  { %v7918_v3 = vpop.f32.mrf.mxu3 }
 0x734   :  { %v4249_v17 = vpack.c.bf16 %v4186_v18, %v4185_v4  ;;  %v7933_v18 = vpop.f32.mrf.mxu2 }
 0x736   :  { %3154 = vadd.xlane.f32.xlu0 %v9148_v60  ;;  %5030 = vmatmul.msk.bf16.vlgmr.msrb.gmra.mxu1 %vm725_vm0, %v4249_v17  ;;  %v1236_v60 = vpop.trf.xlu1 }
 0x737   :  { %v3660_v22 = vpop.f32.mrf.mxu0  ;;  %1348 = vst [vmem:[#allocation5] sm:$0xff] %v1236_v60 }
 0x738   :  { %v3661_v4 = vadd.f32 %v3660_v22, %v7633_v41 }
 0x73a   :  { %2620 = vmax.xlane.f32.xlu1 %v2619_v27  ;;  %3699 = vmatmul.bf16.gmra.mxu0 %v7600_v42  ;;  %v4187_v42 = vmul.f32 %v5263_v49, %v3661_v4  ;;  %v5265_v49 = vpop.eup %5264 }
 0x73b   :  { %v7930_v59 = vpop.f32.mrf.mxu3 }
 0x73c   :  { %v7945_v22 = vpop.f32.mrf.mxu2  ;;  %v2634_v63 = vmax.f32 %v7747_v30, %v7930_v59 }
 0x73f   :  { %v3662_v17 = vpop.f32.mrf.mxu0 }
 0x740   :  { %5018 = vmatmul.msk.bf16.gmra.mxu3 %vm725_vm0, %v9091_v61  ;;  %v3663_v48 = vadd.f32 %v3662_v17, %v7650_v15 }
 0x741   :  { %v7939_v36 = vpop.xlane.xlu2 %3133 }
 0x742   :  { %3145 = vadd.xlane.f32.xlu1 %v9149_v55  ;;  %v4188_v6 = vmul.f32 %v5261_v10, %v3663_v48  ;;  %v1237_v10 = vpop.trf.xlu1 }
 0x743   :  { %v7942_v46 = vpop.f32.mrf.mxu3  ;;  %1350 = vst [vmem:[#allocation5 + $0x10] sm:$0xff] %v1237_v10 }
 0x744   :  { %v4250_v51 = vpack.c.bf16 %v4188_v6, %v4187_v42  ;;  %v5267_v42 = vpop.eup %5266 }
 0x746   :  { %5031 = vmatmul.msk.bf16.gmra.mxu1 %vm725_vm0, %v4250_v51 }
 0x747   :  { %v3665_v41 = vpop.f32.mrf.mxu0 }
 0x749   :  { %v2609_v61 = vpop.xlane.xlu2 %2608 }
 0x74a   :  { %3148 = vadd.xlane.f32.xlu1 %v7591_v1  ;;  %3704 = vmatmul.bf16.gmra.mxu0 %v7620_v9  ;;  %v2769_v17 = vsub.f32 %v7612_v11, %v2609_v61  ;;  %v2770_v48 = vsub.f32 %v7828_v2, %v2609_v61  ;;  %v3666_v1 = vadd.f32 %v3665_v41, %v7666_v28  ;;  %v7966_v2 = vpop.f32.mrf.mxu2  ;;  %v1238_v10 = vpop.trf.xlu1 }
 0x74b   :  { %v7950_v15 = vpop.f32.mrf.mxu3  ;;  %v2628_v61 = vmax.f32 %v7715_v8, %v7910_v5  ;;  %1352 = vst [vmem:[#allocation5 + $0x20] sm:$0xff] %v1238_v10  ;;  %v9151_v10 = vld [vmem:[#allocation54_spill] sm:$0xff] }
 0x74c   :  { %v7953_v27 = vpop.xlane.xlu0 %3136  ;;  %v2640_v4 = vmax.f32 %v7898_v0, %v7950_v15  ;;  %v2957_v55 = vmul.f32 1.442695, %v2769_v17  ;;  %v2959_v6 = vmul.f32 1.442695, %v2770_v48  ;;  %v4189_v51 = vmul.f32 %v5267_v42, %v3666_v1 }
 0x74e   :  { %2641 = vmax.xlane.f32.xlu0 %v2640_v4  ;;  %5268 = vpow2.f32 %v2957_v55  ;;  %v2631_v55 = vmax.f32 %v7734_v40, %v7918_v3 }
 0x74f   :  { %3142 = vadd.xlane.f32.xlu2 %v9150_v52  ;;  %v3667_v9 = vpop.f32.mrf.mxu0  ;;  %5270 = vpow2.f32 %v2959_v6 }
 0x750   :  { %5019 = vmatmul.msk.bf16.gmra.mxu3 %vm725_vm0, %v9096_v50  ;;  %v3668_v11 = vadd.f32 %v3667_v9, %v7674_v62  ;;  %v2637_v9 = vmax.f32 %v7885_v12, %v7942_v46 }
 0x752   :  { %2635 = vmax.xlane.f32.xlu1 %v2634_v63  ;;  %v4190_v28 = vmul.f32 %v5265_v49, %v3668_v11  ;;  %v7988_v49 = vpop.f32.mrf.mxu2 }
 0x753   :  { %v7968_v60 = vpop.f32.mrf.mxu3 }
 0x754   :  { %v2612_v41 = vpop.xlane.xlu0 %2611  ;;  %v2643_v50 = vmax.f32 %v7907_v21, %v7968_v60  ;;  %v4251_v4 = vpack.c.bf16 %v4190_v28, %v4189_v51  ;;  %v7979_v63 = vpop.eup %5268 }
 0x755   :  { %v2771_v62 = vsub.f32 %v7637_v16, %v2612_v41  ;;  %v2772_v17 = vsub.f32 %v7838_v38, %v2612_v41  ;;  %v7985_v38 = vpop.eup %5270 }
 0x756   :  { %2644 = vmax.xlane.f32.xlu0 %v2643_v50  ;;  %5032 = vmatmul.msk.bf16.gmra.mxu1 %vm725_vm0, %v4251_v4 }
 0x757   :  { %v2961_v48 = vmul.f32 1.442695, %v2771_v62  ;;  %v2963_v1 = vmul.f32 1.442695, %v2772_v17  ;;  %2629 = vmax.xlane.f32.xlu2 %v2628_v61  ;;  %v3670_v52 = vpop.f32.mrf.mxu0 }
 0x759   :  { %5272 = vpow2.f32 %v2961_v48 }
 0x75a   :  { %5274 = vpow2.f32 %v2963_v1  ;;  %2638 = vmax.xlane.f32.xlu1 %v2637_v9  ;;  %3709 = vmatmul.bf16.gmra.mxu0 %v7640_v25  ;;  %v3671_v25 = vadd.f32 %v3670_v52, %v7681_v32  ;;  %v8015_v17 = vpop.f32.mrf.mxu2  ;;  %v9153_v9 = vld [vmem:[#allocation89_spill] sm:$0xff] }
 0x75b   :  { %5276 = vrcp.f32 %v7767_v35  ;;  %v7983_v16 = vpop.f32.mrf.mxu3  ;;  %v7997_v35 = vpack.c.bf16 %v7985_v38, %v7979_v63 }
 0x75c   :  { %5278 = vrcp.f32 %v7818_v7 }
 0x75d   :  { %v3441_v41 = vunpack.c.l.b16 %v7997_v35  ;;  %5280 = vrcp.f32 %v7782_v20 }
 0x75e   :  { %3169 = vadd.xlane.f32.xlu0 %v7606_v34  ;;  %5282 = vrcp.f32 %v7826_v57 }
 0x75f   :  { %v7993_v11 = vpop.eup %5272  ;;  %2632 = vmax.xlane.f32.xlu2 %v2631_v55  ;;  %v3672_v6 = vpop.f32.mrf.mxu0  ;;  %5284 = vrcp.f32 %v7791_v56 }
 0x760   :  { %v8000_v42 = vpop.eup %5274  ;;  %5020 = vmatmul.msk.bf16.gmra.mxu3 %vm725_vm0, %v9102_v31  ;;  %v3673_v34 = vadd.f32 %v3672_v6, %v7689_v24  ;;  %5286 = vrcp.f32 %v7834_v33 }
 0x761   :  { %v5277_v7 = vpop.eup %5276  ;;  %v8006_v51 = vpack.c.bf16 %v8000_v42, %v7993_v11 }
 0x762   :  { %v5279_v28 = vpop.eup %5278  ;;  %3163 = vadd.xlane.f32.xlu1 %v7629_v39  ;;  %v4192_v61 = vmul.f32 %v5277_v7, %v3673_v34  ;;  %v1239_v39 = vpop.trf.xlu1 }
 0x763   :  { %v3443_v32 = vunpack.c.l.b16 %v8006_v51  ;;  %v4191_v50 = vmul.f32 %v5279_v28, %v3671_v25  ;;  %v8012_v4 = vpop.f32.mrf.mxu3  ;;  %1354 = vst [vmem:[#allocation5 + $0x30] sm:$0xff] %v1239_v39  ;;  %v8032_v25 = vpop.f32.mrf.mxu2  ;;  %v2646_v28 = vmax.f32 %v7920_v53, %v7983_v16 }
 0x765   :  { %v4252_v62 = vpack.c.bf16 %v4192_v61, %v4191_v50  ;;  %v3475_v31 = vpack.c.b16 %v3443_v32, %v3441_v41 }
 0x766   :  { %3172 = vadd.xlane.f32.xlu0 %v7660_v54  ;;  %v9152_v54 = vld [vmem:[#allocation40_spill] sm:$0xff] }
 0x767   :  { %3640 = vmatmul.bf16.vlgmr.msrb.gmra.mxu2 %v3475_v31  ;;  %5033 = vmatmul.msk.bf16.gmra.mxu1 %vm725_vm0, %v4252_v62  ;;  %v3675_v24 = vpop.f32.mrf.mxu0  ;;  %v9154_v62 = vld [vmem:[#allocation46_spill] sm:$0xff] }
 0x768   :  { %3157 = vadd.xlane.f32.xlu2 %v7614_v23  ;;  %v3676_v1 = vadd.f32 %v3675_v24, %v9152_v54  ;;  %v9155_v54 = vld [vmem:[#allocation9_spill] sm:$0xff] }
 0x76a   :  { %3166 = vadd.xlane.f32.xlu1 %v7642_v13  ;;  %3714 = vmatmul.bf16.gmra.mxu0 %v9151_v10  ;;  %v5281_v13 = vpop.eup %5280  ;;  %v2649_v10 = vmax.f32 %v7933_v18, %v8012_v4 }
 0x76b   :  { %v8022_v48 = vpop.f32.mrf.mxu3  ;;  %v5283_v55 = vpop.eup %5282 }
 0x76c   :  { %v2652_v23 = vmax.f32 %v7945_v22, %v8022_v48  ;;  %v4193_v6 = vmul.f32 %v5283_v55, %v3676_v1  ;;  %v8049_v24 = vpop.f32.mrf.mxu2 }
 0x76f   :  { %v3677_v52 = vpop.f32.mrf.mxu0 }
 0x770   :  { %3160 = vadd.xlane.f32.xlu2 %v9153_v9  ;;  %5021 = vmatmul.msk.bf16.gmra.mxu3 %vm725_vm0, %v9084_v45  ;;  %v3678_v20 = vadd.f32 %v3677_v52, %v7707_v37  ;;  %v8041_v37 = vpop.xlane.xlu2 %3139  ;;  %v5285_v52 = vpop.eup %5284  ;;  %v9156_v9 = vld [vmem:[#allocation8_spill] sm:$0xff] }
 0x772   :  { %2653 = vmax.xlane.f32.xlu1 %v2652_v23  ;;  %v4194_v57 = vmul.f32 %v5281_v13, %v3678_v20  ;;  %v5287_v20 = vpop.eup %5286 }
 0x773   :  { %v8034_v7 = vpop.f32.mrf.mxu3 }
 0x774   :  { %v4253_v34 = vpack.c.bf16 %v4194_v57, %v4193_v6  ;;  %v2655_v41 = vmax.f32 %v7966_v2, %v8034_v7  ;;  %v9157_v57 = vld [vmem:[#allocation91_spill] sm:$0xff] }
 0x777   :  { %5034 = vmatmul.msk.bf16.gmra.mxu1 %vm725_vm0, %v4253_v34  ;;  %v3680_v45 = vpop.f32.mrf.mxu0 }
 0x778   :  { %2647 = vmax.xlane.f32.xlu2 %v2646_v28  ;;  %v3681_v56 = vadd.f32 %v3680_v45, %v9155_v54  ;;  %v9159_v54 = vld [vmem:[#allocation58_spill] sm:$0xff] }
 0x779   :  { %v2615_v32 = vpop.xlane.xlu0 %2614 }
 0x77a   :  { %v2773_v50 = vsub.f32 %v7655_v14, %v2615_v32  ;;  %2656 = vmax.xlane.f32.xlu1 %v2655_v41  ;;  %v2774_v61 = vsub.f32 %v7861_v26, %v2615_v32  ;;  %3719 = vmatmul.bf16.gmra.mxu0 %v9154_v62  ;;  %v4195_v34 = vmul.f32 %v5287_v20, %v3681_v56  ;;  %v8065_v62 = vpop.f32.mrf.mxu2  ;;  %v9160_v56 = vld [vmem:[#allocation55_spill] sm:$0xff] }
 0x77b   :  { %v8047_v31 = vpop.f32.mrf.mxu3 }
 0x77c   :  { %v2658_v39 = vmax.f32 %v7988_v49, %v8047_v31  ;;  %v2965_v14 = vmul.f32 1.442695, %v2773_v50  ;;  %v2967_v1 = vmul.f32 1.442695, %v2774_v61 }
 0x77e   :  { %2659 = vmax.xlane.f32.xlu0 %v2658_v39  ;;  %5288 = vpow2.f32 %v2965_v14  ;;  %v9158_v39 = vld [vmem:[#allocation57_spill] sm:$0xff] }
 0x77f   :  { %v3682_v26 = vpop.f32.mrf.mxu0  ;;  %5290 = vpow2.f32 %v2967_v1 }
 0x780   :  { %2650 = vmax.xlane.f32.xlu2 %v2649_v10  ;;  %v3683_v23 = vadd.f32 %v3682_v26, %v9156_v9  ;;  %v3183_v10 = vadd.f32 %v7985_v38, %v7979_v63 }
 0x781   :  { %v2618_v13 = vpop.xlane.xlu2 %2617 }
 0x782   :  { %v2775_v33 = vsub.f32 %v7672_v43, %v2618_v13  ;;  %v2776_v55 = vsub.f32 %v7868_v29, %v2618_v13  ;;  %v3918_v6 = vpop.permute.xlu1 %3917  ;;  %3181 = vadd.xlane.f32.xlu1 %v9157_v57  ;;  %v4196_v28 = vmul.f32 %v5285_v52, %v3683_v23  ;;  %v3186_v52 = vadd.f32 %v8000_v42, %v7993_v11  ;;  %v9161_v23 = vld [vmem:[#allocation61_spill] sm:$0xff]  ;;  %v8087_v20 = vpop.f32.mrf.mxu2  ;;  %v9162_v57 = vld [vmem:[#allocation11_spill] sm:$0xff]  ;;  %v9163_v42 = vld [vmem:[#allocation10_spill] sm:$0xff] }
 0x783   :  { %v8061_v45 = vpop.f32.mrf.mxu3  ;;  %4036 = vmatpush.bf16.msrb.mxu3 %v3918_v6 }
 0x784   :  { %v2969_v41 = vmul.f32 1.442695, %v2775_v33  ;;  %v2971_v32 = vmul.f32 1.442695, %v2776_v55  ;;  %v2661_v50 = vmax.f32 %v8015_v17, %v8061_v45  ;;  %v4254_v61 = vpack.c.bf16 %v4196_v28, %v4195_v34  ;;  %v5289_v43 = vpop.eup %5288 }
 0x785   :  { %v5291_v14 = vpop.eup %5290 }
 0x786   :  { %5292 = vpow2.f32 %v2969_v41  ;;  %2662 = vmax.xlane.f32.xlu0 %v2661_v50 }
 0x787   :  { %5294 = vpow2.f32 %v2971_v32  ;;  %5035 = vmatmul.msk.bf16.gmra.mxu1 %vm725_vm0, %v4254_v61  ;;  %4037 = vmatpush.bf16.msrb.mxu3 %v7878_v44  ;;  %v3685_v29 = vpop.f32.mrf.mxu0  ;;  %v3317_v44 = vpack.c.bf16 %v5291_v14, %v5289_v43 }
 0x788   :  { %3175 = vadd.xlane.f32.xlu2 %v9158_v39  ;;  %5296 = vrcp.f32 %v9159_v54  ;;  %v3686_v13 = vadd.f32 %v3685_v29, %v9161_v23  ;;  %v3189_v29 = vadd.f32 %v5291_v14, %v5289_v43  ;;  %v9165_v43 = vld [vmem:[#allocation93_spill] sm:$0xff] }
 0x789   :  { %5298 = vrcp.f32 %v7939_v36  ;;  %v3912_v38 = vpop.permute.xlu2 %3911  ;;  %v3768_v33 = vunpack.c.h.b16 %v3317_v44 }
 0x78a   :  { %3184 = vadd.xlane.f32.xlu1 %v3183_v10  ;;  %3724 = vmatmul.bf16.gmra.mxu0 %v9160_v56  ;;  %v3444_v56 = vunpack.c.h.b16 %v8006_v51  ;;  %v8098_v23 = vpop.f32.mrf.mxu2  ;;  %5300 = vrcp.f32 %v7953_v27 }
 0x78b   :  { %v8074_v1 = vpop.f32.mrf.mxu3  ;;  %4038 = vmatpush.bf16.msrb.mxu3 %v7926_v19  ;;  %v3767_v19 = vunpack.c.l.b16 %v3317_v44  ;;  %5302 = vrcp.f32 %v8041_v37  ;;  %v9168_v37 = vld [vmem:[#allocation92_spill] sm:$0xff] }
 0x78c   :  { %v8077_v26 = vpop.eup %5292  ;;  %v2664_v44 = vmax.f32 %v8032_v25, %v8074_v1 }
 0x78d   :  { %v8082_v9 = vpop.eup %5294 }
 0x78e   :  { %v3318_v63 = vpack.c.bf16 %v8082_v9, %v8077_v26  ;;  %3187 = vadd.xlane.f32.xlu0 %v3186_v52  ;;  %v5297_v11 = vpop.eup %5296  ;;  %v3442_v52 = vunpack.c.h.b16 %v7997_v35 }
 0x78f   :  { %4039 = vmatpush.bf16.msrb.mxu3 %v3912_v38  ;;  %v3687_v6 = vpop.f32.mrf.mxu0  ;;  %v5299_v28 = vpop.eup %5298  ;;  %v4197_v50 = vmul.f32 %v5297_v11, %v3686_v13  ;;  %v9164_v13 = vld [vmem:[#allocation52_spill] sm:$0xff] }
 0x790   :  { %v3769_v55 = vunpack.c.l.b16 %v3318_v63  ;;  %v3770_v36 = vunpack.c.h.b16 %v3318_v63  ;;  %3178 = vadd.xlane.f32.xlu2 %v9162_v57  ;;  %v3688_v34 = vadd.f32 %v3687_v6, %v9163_v42  ;;  %v3476_v38 = vpack.c.b16 %v3444_v56, %v3442_v52  ;;  %v9166_v6 = vld [vmem:[#allocation12_spill] sm:$0xff]  ;;  %v5301_v42 = vpop.eup %5300 }
 0x791   :  { %v2624_v54 = vpop.xlane.xlu0 %2623 }
 0x792   :  { %v3831_v41 = vpack.c.b16 %v3769_v55, %v3767_v19  ;;  %v3832_v32 = vpack.c.b16 %v3770_v36, %v3768_v33  ;;  %v4198_v61 = vmul.f32 %v5299_v28, %v3688_v34  ;;  %v2779_v19 = vsub.f32 %v9164_v13, %v2624_v54  ;;  %v9167_v34 = vld [vmem:[#allocation13_spill] sm:$0xff]  ;;  %v8116_v56 = vpop.f32.mrf.mxu2 }
 0x793   :  { %v8091_v39 = vpop.f32.mrf.mxu3  ;;  %v2780_v14 = vsub.f32 %v9165_v43, %v2624_v54 }
 0x794   :  { %3951 = vmatmul.bf16.vlgmr.msra.gmra.mxu2 %v3831_v41  ;;  %4040 = vmatmul.bf16.vlgmr.msrb.gmra.mxu3 %v3832_v32  ;;  %v4255_v10 = vpack.c.bf16 %v4198_v61, %v4197_v50  ;;  %v2977_v35 = vmul.f32 1.442695, %v2779_v19  ;;  %v2667_v55 = vmax.f32 %v8049_v24, %v8091_v39  ;;  %v5303_v41 = vpop.eup %5302  ;;  %v9169_v61 = vld [vmem:[#allocation97_spill] sm:$0xff] }
 0x795   :  { %v2979_v36 = vmul.f32 1.442695, %v2780_v14 }
 0x796   :  { %3190 = vadd.xlane.f32.xlu0 %v3189_v29  ;;  %5304 = vpow2.f32 %v2977_v35 }
 0x797   :  { %5036 = vmatmul.msk.bf16.gmra.mxu1 %vm725_vm0, %v4255_v10  ;;  %v3690_v63 = vpop.f32.mrf.mxu0  ;;  %5306 = vpow2.f32 %v2979_v36 }
 0x798   :  { %2665 = vmax.xlane.f32.xlu2 %v2664_v44  ;;  %v3691_v57 = vadd.f32 %v3690_v63, %v9166_v6 }
 0x799   :  { %v2627_v11 = vpop.xlane.xlu0 %2626 }
 0x79a   :  { %3729 = vmatmul.bf16.gmra.mxu0 %v3476_v38  ;;  %v2781_v32 = vsub.f32 %v9168_v37, %v2627_v11  ;;  %v4199_v50 = vmul.f32 %v5301_v42, %v3691_v57  ;;  %v2782_v29 = vsub.f32 %v9169_v61, %v2627_v11  ;;  %v3192_v38 = vadd.f32 %v8082_v9, %v8077_v26  ;;  %v8127_v6 = vpop.f32.mrf.mxu2 }
 0x79b   :  { %v8103_v51 = vpop.f32.mrf.mxu3  ;;  %9170 = vst [vmem:[#allocation95_spill] sm:$0xff] %v8127_v6 }
 0x79c   :  { %v2670_v33 = vmax.f32 %v8065_v62, %v8103_v51  ;;  %v2981_v63 = vmul.f32 1.442695, %v2781_v32  ;;  %v2983_v13 = vmul.f32 1.442695, %v2782_v29  ;;  %v5305_v19 = vpop.eup %5304 }
 0x79d   :  { %v5307_v14 = vpop.eup %5306 }
 0x79e   :  { %2671 = vmax.xlane.f32.xlu1 %v2670_v33  ;;  %5308 = vpow2.f32 %v2981_v63  ;;  %v3320_v29 = vpack.c.bf16 %v5307_v14, %v5305_v19 }
 0x79f   :  { %v3692_v27 = vpop.f32.mrf.mxu0  ;;  %5310 = vpow2.f32 %v2983_v13 }
 0x7a0   :  { %2668 = vmax.xlane.f32.xlu2 %v2667_v55  ;;  %v3693_v28 = vadd.f32 %v3692_v27, %v9167_v34  ;;  %v3198_v55 = vadd.f32 %v5307_v14, %v5305_v19 }
 0x7a2   :  { %v4200_v10 = vmul.f32 %v5303_v41, %v3693_v28  ;;  %v8135_v28 = vpop.xlane.xlu0 %3151 }
 0x7a3   :  { %v8114_v54 = vpop.f32.mrf.mxu3 }
 0x7a4   :  { %v2673_v44 = vmax.f32 %v8087_v20, %v8114_v54  ;;  %v4256_v52 = vpack.c.bf16 %v4200_v10, %v4199_v50  ;;  %v8131_v57 = vpop.eup %5308  ;;  %v8143_v50 = vpop.f32.mrf.mxu2 }
 0x7a5   :  { %v8133_v34 = vpop.eup %5310 }
 0x7a6   :  { %2674 = vmax.xlane.f32.xlu1 %v2673_v44 }
 0x7a7   :  { %5037 = vmatmul.msk.bf16.gmra.mxu1 %vm725_vm0, %v4256_v52  ;;  %v3695_v43 = vpop.f32.mrf.mxu0 }
 0x7a8   :  { %3193 = vadd.xlane.f32.xlu2 %v3192_v38 }
 0x7aa   :  { %v8149_v38 = vpop.xlane.xlu0 %3154 }
 0x7ab   :  { %v8123_v33 = vpop.f32.mrf.mxu3 }
 0x7ac   :  { %v2676_v35 = vmax.f32 %v8098_v23, %v8123_v33  ;;  %v8153_v19 = vpop.f32.mrf.mxu2 }
 0x7ad   :  { %v2621_v36 = vpop.xlane.xlu1 %2620 }
 0x7ae   :  { %v2777_v26 = vsub.f32 %v7678_v47, %v2621_v36  ;;  %v2778_v9 = vsub.f32 %v7880_v58, %v2621_v36  ;;  %3199 = vadd.xlane.f32.xlu1 %v3198_v55  ;;  %2677 = vmax.xlane.f32.xlu0 %v2676_v35  ;;  %v3201_v58 = vadd.f32 %v8133_v34, %v8131_v57  ;;  %v3773_v35 = vunpack.c.l.b16 %v3320_v29 }
 0x7af   :  { %v3697_v42 = vpop.f32.mrf.mxu0  ;;  %v3774_v36 = vunpack.c.h.b16 %v3320_v29 }
 0x7b0   :  { %v2973_v11 = vmul.f32 1.442695, %v2777_v26  ;;  %v2975_v27 = vmul.f32 1.442695, %v2778_v9 }
 0x7b2   :  { %5312 = vpow2.f32 %v2973_v11 }
 0x7b3   :  { %5314 = vpow2.f32 %v2975_v27  ;;  %v8137_v41 = vpop.f32.mrf.mxu3 }
 0x7b4   :  { %9171 = vst [vmem:[#allocation96_spill] sm:$0xff] %v8137_v41  ;;  %v2679_v47 = vmax.f32 %v8116_v56, %v8137_v41 }
 0x7b5   :  { %v3146_v37 = vpop.xlane.xlu1 %3145 }
 0x7b6   :  { %3202 = vadd.xlane.f32.xlu1 %v3201_v58  ;;  %2680 = vmax.xlane.f32.xlu0 %v2679_v47  ;;  %5316 = vrcp.f32 %v3146_v37  ;;  %v9173_v37 = vld [vmem:[#allocation43_spill] sm:$0xff] }
 0x7b7   :  { %v8145_v61 = vpop.f32.mrf.mxu0 }
 0x7b8   :  { %v5313_v32 = vpop.eup %5312 }
 0x7b9   :  { %v5315_v10 = vpop.eup %5314 }
 0x7ba   :  { %v3195_v44 = vadd.f32 %v5315_v10, %v5313_v32  ;;  %v3319_v52 = vpack.c.bf16 %v5315_v10, %v5313_v32 }
 0x7bb   :  { %v8147_v63 = vpop.f32.mrf.mxu3 }
 0x7bc   :  { %9172 = vst [vmem:[#allocation41_spill] sm:$0xff] %v8147_v63  ;;  %3196 = vadd.xlane.f32.xlu2 %v3195_v44  ;;  %v3771_v13 = vunpack.c.l.b16 %v3319_v52  ;;  %v3772_v55 = vunpack.c.h.b16 %v3319_v52  ;;  %v2682_v14 = vmax.f32 %v8127_v6, %v8147_v63  ;;  %v5317_v52 = vpop.eup %5316 }
 0x7bd   :  { %v3149_v26 = vpop.xlane.xlu1 %3148 }
 0x7be   :  { %v3833_v9 = vpack.c.b16 %v3773_v35, %v3771_v13  ;;  %v3834_v11 = vpack.c.b16 %v3774_v36, %v3772_v55  ;;  %v3696_v35 = vadd.f32 %v3695_v43, %v9173_v37  ;;  %v9174_v55 = vld [vmem:[#allocation14_spill] sm:$0xff] }
 0x7bf   :  { %v8151_v27 = vpop.f32.mrf.mxu0  ;;  %v3698_v36 = vadd.f32 %v3697_v42, %v9174_v55  ;;  %v8172_v42 = vpop.f32.mrf.mxu2 }
 0x7c0   :  { %3956 = vmatmul.bf16.gmra.mxu2 %v3833_v9  ;;  %4045 = vmatmul.bf16.gmra.mxu3 %v3834_v11  ;;  %9175 = vst [vmem:[#allocation48_spill] sm:$0xff] %v8172_v42  ;;  %v8181_v55 = vpop.f32.mrf.mxu1 }
 0x7c1   :  { %v2642_v32 = vpop.xlane.xlu0 %2641  ;;  %v4202_v6 = vmul.f32 %v5317_v52, %v3698_v36  ;;  %9176 = vst [vmem:[#allocation49_spill] sm:$0xff] %v8181_v55 }
 0x7c2   :  { %v3143_v47 = vpop.xlane.xlu2 %3142  ;;  %v2791_v13 = vsub.f32 %v7898_v0, %v2642_v32 }
 0x7c3   :  { %5318 = vrcp.f32 %v3143_v47  ;;  %v8157_v58 = vpop.f32.mrf.mxu3 }
 0x7c4   :  { %2683 = vmax.xlane.f32.xlu2 %v2682_v14  ;;  %v2685_v14 = vmax.f32 %v8143_v50, %v8157_v58 }
 0x7c5   :  { %v2636_v29 = vpop.xlane.xlu1 %2635 }
 0x7c6   :  { %v2787_v10 = vsub.f32 %v7747_v30, %v2636_v29  ;;  %v2788_v44 = vsub.f32 %v7930_v59, %v2636_v29  ;;  %v3001_v59 = vmul.f32 1.442695, %v2791_v13 }
 0x7c7   :  { %v8164_v63 = vpop.f32.mrf.mxu0 }
 0x7c8   :  { %v2993_v9 = vmul.f32 1.442695, %v2787_v10  ;;  %v2995_v11 = vmul.f32 1.442695, %v2788_v44  ;;  %v2792_v10 = vsub.f32 %v7950_v15, %v2642_v32 }
 0x7c9   :  { %v5319_v47 = vpop.eup %5318 }
 0x7ca   :  { %v4201_v41 = vmul.f32 %v5319_v47, %v3696_v35  ;;  %5320 = vpow2.f32 %v2993_v9  ;;  %v2630_v30 = vpop.xlane.xlu2 %2629 }
 0x7cb   :  { %5322 = vpow2.f32 %v2995_v11  ;;  %v2783_v0 = vsub.f32 %v7715_v8, %v2630_v30  ;;  %v2784_v43 = vsub.f32 %v7910_v5, %v2630_v30  ;;  %v8170_v29 = vpop.f32.mrf.mxu3 }
 0x7cc   :  { %2686 = vmax.xlane.f32.xlu2 %v2685_v14  ;;  %v4257_v44 = vpack.c.bf16 %v4202_v6, %v4201_v41  ;;  %v2688_v52 = vmax.f32 %v8153_v19, %v8170_v29  ;;  %5324 = vrcp.f32 %v8135_v28  ;;  %v3003_v6 = vmul.f32 1.442695, %v2792_v10  ;;  %v2645_v41 = vpop.xlane.xlu0 %2644 }
 0x7cd   :  { %v2985_v37 = vmul.f32 1.442695, %v2783_v0  ;;  %v2987_v13 = vmul.f32 1.442695, %v2784_v43  ;;  %v2639_v35 = vpop.xlane.xlu1 %2638  ;;  %5326 = vrcp.f32 %v3149_v26  ;;  %v2793_v11 = vsub.f32 %v7907_v21, %v2645_v41 }
 0x7ce   :  { %v2789_v8 = vsub.f32 %v7885_v12, %v2639_v35  ;;  %v2790_v5 = vsub.f32 %v7942_v46, %v2639_v35  ;;  %5038 = vmatmul.msk.bf16.gmra.mxu1 %vm725_vm0, %v4257_v44  ;;  %2689 = vmax.xlane.f32.xlu1 %v2688_v52  ;;  %5328 = vpow2.f32 %v3001_v59  ;;  %v2794_v0 = vsub.f32 %v7968_v60, %v2645_v41  ;;  %v9178_v35 = vld [vmem:[#allocation15_spill] sm:$0xff] }
 0x7cf   :  { %5330 = vpow2.f32 %v2985_v37  ;;  %v8185_v36 = vpop.f32.mrf.mxu0  ;;  %v8205_v37 = vpop.f32.mrf.mxu2  ;;  %v3701_v60 = vadd.f32 %v8145_v61, %v9178_v35 }
 0x7d0   :  { %v8183_v15 = vpop.eup %5320  ;;  %v2997_v28 = vmul.f32 1.442695, %v2789_v8  ;;  %v2999_v32 = vmul.f32 1.442695, %v2790_v5  ;;  %5332 = vpow2.f32 %v2987_v13  ;;  %v9179_v8 = vld [vmem:[#allocation45_spill] sm:$0xff]  ;;  %v8219_v61 = vpop.f32.mrf.mxu1 }
 0x7d1   :  { %v8187_v26 = vpop.eup %5322  ;;  %v3703_v5 = vadd.f32 %v8151_v27, %v9179_v8  ;;  %9180 = vst [vmem:[#allocation51_spill] sm:$0xff] %v8219_v61 }
 0x7d2   :  { %5334 = vpow2.f32 %v2997_v28  ;;  %v2633_v12 = vpop.xlane.xlu2 %2632  ;;  %v3210_v46 = vadd.f32 %v8187_v26, %v8183_v15  ;;  %v5325_v9 = vpop.eup %5324  ;;  %v3007_v28 = vmul.f32 1.442695, %v2794_v0 }
 0x7d3   :  { %5336 = vpow2.f32 %v2999_v32  ;;  %v2785_v47 = vsub.f32 %v7734_v40, %v2633_v12  ;;  %v2786_v14 = vsub.f32 %v7918_v3, %v2633_v12  ;;  %v8194_v30 = vpop.f32.mrf.mxu3  ;;  %v5327_v59 = vpop.eup %5326  ;;  %v3321_v40 = vpack.c.bf16 %v8133_v34, %v8131_v57 }
 0x7d4   :  { %9177 = vst [vmem:[#allocation88_spill] sm:$0xff] %v8194_v30  ;;  %5338 = vpow2.f32 %v3003_v6  ;;  %3211 = vadd.xlane.f32.xlu2 %v3210_v46  ;;  %v2691_v43 = vmax.f32 %v8172_v42, %v8194_v30  ;;  %v8199_v10 = vpop.eup %5328  ;;  %v3005_v6 = vmul.f32 1.442695, %v2793_v11  ;;  %v4203_v46 = vmul.f32 %v5327_v59, %v3701_v60 }
 0x7d5   :  { %v2989_v44 = vmul.f32 1.442695, %v2785_v47  ;;  %v2991_v52 = vmul.f32 1.442695, %v2786_v14  ;;  %v8201_v21 = vpop.xlane.xlu1 %3163  ;;  %v5331_v3 = vpop.eup %5330  ;;  %v3775_v47 = vunpack.c.l.b16 %v3321_v40 }
 0x7d6   :  { %2692 = vmax.xlane.f32.xlu1 %v2691_v43  ;;  %v5333_v13 = vpop.eup %5332  ;;  %v3776_v43 = vunpack.c.h.b16 %v3321_v40  ;;  %v8229_v40 = vpop.xlane.xlu0 %3169 }
 0x7d7   :  { %5340 = vpow2.f32 %v2989_v44  ;;  %v8213_v32 = vpop.f32.mrf.mxu0  ;;  %v3204_v57 = vadd.f32 %v5333_v13, %v5331_v3  ;;  %v3322_v34 = vpack.c.bf16 %v5333_v13, %v5331_v3  ;;  %v4204_v44 = vmul.f32 %v5325_v9, %v3703_v5  ;;  %v8232_v5 = vpop.f32.mrf.mxu2 }
 0x7d8   :  { %v8211_v41 = vpop.eup %5334  ;;  %5342 = vpow2.f32 %v2991_v52 }
 0x7d9   :  { %v8215_v12 = vpop.eup %5336  ;;  %3205 = vadd.xlane.f32.xlu0 %v3204_v57  ;;  %v3777_v11 = vunpack.c.l.b16 %v3322_v34  ;;  %v3778_v0 = vunpack.c.h.b16 %v3322_v34  ;;  %5344 = vpow2.f32 %v3005_v6  ;;  %v4258_v60 = vpack.c.bf16 %v4204_v44, %v4203_v46 }
 0x7da   :  { %v8217_v14 = vpop.eup %5338  ;;  %v3213_v27 = vadd.f32 %v8215_v12, %v8211_v41  ;;  %5346 = vpow2.f32 %v3007_v28  ;;  %v3324_v44 = vpack.c.bf16 %v8187_v26, %v8183_v15 }
 0x7db   :  { %v3158_v52 = vpop.xlane.xlu2 %3157  ;;  %v8223_v35 = vpop.f32.mrf.mxu3  ;;  %v3835_v59 = vpack.c.b16 %v3777_v11, %v3775_v47  ;;  %v3836_v3 = vpack.c.b16 %v3778_v0, %v3776_v43  ;;  %v3216_v57 = vadd.f32 %v8217_v14, %v8199_v10 }
 0x7dc   :  { %3214 = vadd.xlane.f32.xlu2 %v3213_v27  ;;  %5348 = vrcp.f32 %v3158_v52  ;;  %v8243_v11 = vpop.f32.mrf.mxu1  ;;  %v3781_v42 = vunpack.c.l.b16 %v3324_v44 }
 0x7dd   :  { %v5341_v13 = vpop.eup %5340  ;;  %v8225_v8 = vpop.xlane.xlu1 %3166  ;;  %3961 = vmatmul.bf16.gmra.mxu2 %v3835_v59  ;;  %4050 = vmatmul.bf16.gmra.mxu3 %v3836_v3  ;;  %5350 = vrcp.f32 %v8149_v38  ;;  %9181 = vst [vmem:[#allocation60_spill] sm:$0xff] %v8243_v11  ;;  %v9182_v59 = vld [vmem:[#allocation16_spill] sm:$0xff]  ;;  %v9183_v38 = vld [vmem:[#allocation17_spill] sm:$0xff]  ;;  %v2694_v11 = vmax.f32 %v8205_v37, %v8223_v35 }
 0x7de   :  { %v5343_v61 = vpop.eup %5342  ;;  %5039 = vmatmul.msk.bf16.gmra.mxu1 %vm725_vm0, %v4258_v60  ;;  %3217 = vadd.xlane.f32.xlu1 %v3216_v57  ;;  %v3706_v3 = vadd.f32 %v8164_v63, %v9182_v59  ;;  %v3708_v57 = vadd.f32 %v8185_v36, %v9183_v38  ;;  %v8257_v30 = vpop.xlane.xlu0 %3172  ;;  %v3782_v63 = vunpack.c.h.b16 %v3324_v44  ;;  %5352 = vrcp.f32 %v8201_v21 }
 0x7df   :  { %v3207_v9 = vadd.f32 %v5343_v61, %v5341_v13  ;;  %v8234_v6 = vpop.eup %5344  ;;  %v8238_v34 = vpop.f32.mrf.mxu0  ;;  %v3323_v27 = vpack.c.bf16 %v5343_v61, %v5341_v13 }
 0x7e0   :  { %v8236_v28 = vpop.eup %5346  ;;  %v8259_v59 = vpop.f32.mrf.mxu2 }
 0x7e1   :  { %3208 = vadd.xlane.f32.xlu0 %v3207_v9  ;;  %v3219_v0 = vadd.f32 %v8236_v28, %v8234_v6  ;;  %v3779_v13 = vunpack.c.l.b16 %v3323_v27  ;;  %v3780_v9 = vunpack.c.h.b16 %v3323_v27 }
 0x7e2   :  { %v5349_v52 = vpop.eup %5348 }
 0x7e3   :  { %v3161_v46 = vpop.xlane.xlu2 %3160  ;;  %v8241_v47 = vpop.f32.mrf.mxu3  ;;  %v4206_v15 = vmul.f32 %v5349_v52, %v3708_v57  ;;  %v3837_v27 = vpack.c.b16 %v3781_v42, %v3779_v13 }
 0x7e4   :  { %v5351_v55 = vpop.eup %5350  ;;  %5354 = vrcp.f32 %v3161_v46  ;;  %v8272_v57 = vpop.f32.mrf.mxu1 }
 0x7e5   :  { %v2654_v43 = vpop.xlane.xlu1 %2653  ;;  %9184 = vst [vmem:[#allocation87_spill] sm:$0xff] %v8272_v57  ;;  %v5353_v13 = vpop.eup %5352 }
 0x7e6   :  { %v2799_v60 = vsub.f32 %v7945_v22, %v2654_v43  ;;  %v2800_v61 = vsub.f32 %v8022_v48, %v2654_v43  ;;  %3220 = vadd.xlane.f32.xlu1 %v3219_v0  ;;  %v4205_v22 = vmul.f32 %v5351_v55, %v3706_v3  ;;  %v3838_v0 = vpack.c.b16 %v3782_v63, %v3780_v9 }
 0x7e7   :  { %v8264_v38 = vpop.f32.mrf.mxu0 }
 0x7e8   :  { %v3017_v26 = vmul.f32 1.442695, %v2799_v60  ;;  %v3019_v48 = vmul.f32 1.442695, %v2800_v61 }
 0x7e9   :  { %2695 = vmax.xlane.f32.xlu0 %v2694_v11  ;;  %v4259_v11 = vpack.c.bf16 %v4206_v15, %v4205_v22 }
 0x7ea   :  { %5356 = vpow2.f32 %v3017_v26  ;;  %v5355_v15 = vpop.eup %5354 }
 0x7eb   :  { %v2648_v36 = vpop.xlane.xlu2 %2647  ;;  %v8262_v43 = vpop.f32.mrf.mxu3  ;;  %5358 = vpow2.f32 %v3019_v48  ;;  %v3325_v48 = vpack.c.bf16 %v8215_v12, %v8211_v41 }
 0x7ec   :  { %v2795_v52 = vsub.f32 %v7920_v53, %v2648_v36  ;;  %v2796_v60 = vsub.f32 %v7983_v16, %v2648_v36  ;;  %v2700_v44 = vmax.f32 %v8259_v59, %v8262_v43  ;;  %v2697_v53 = vmax.f32 %v8232_v5, %v8241_v47  ;;  %v8285_v36 = vpop.f32.mrf.mxu2 }
 0x7ed   :  { %v2657_v55 = vpop.xlane.xlu1 %2656  ;;  %3966 = vmatmul.bf16.gmra.mxu2 %v3837_v27  ;;  %4055 = vmatmul.bf16.gmra.mxu3 %v3838_v0 }
 0x7ee   :  { %v3009_v21 = vmul.f32 1.442695, %v2795_v52  ;;  %v3011_v3 = vmul.f32 1.442695, %v2796_v60  ;;  %v2801_v42 = vsub.f32 %v7966_v2, %v2657_v55  ;;  %v2802_v46 = vsub.f32 %v8034_v7, %v2657_v55  ;;  %5040 = vmatmul.msk.bf16.gmra.mxu1 %vm725_vm0, %v4259_v11  ;;  %2701 = vmax.xlane.f32.xlu2 %v2700_v44 }
 0x7ef   :  { %v3326_v44 = vpack.c.bf16 %v8217_v14, %v8199_v10  ;;  %v3717_v11 = vpop.f32.mrf.mxu0  ;;  %v3784_v10 = vunpack.c.h.b16 %v3325_v48 }
 0x7f0   :  { %5360 = vpow2.f32 %v3009_v21  ;;  %v3021_v16 = vmul.f32 1.442695, %v2801_v42  ;;  %v3023_v61 = vmul.f32 1.442695, %v2802_v46  ;;  %v8279_v26 = vpop.eup %5356 }
 0x7f1   :  { %5362 = vpow2.f32 %v3011_v3  ;;  %v2660_v9 = vpop.xlane.xlu0 %2659  ;;  %2698 = vmax.xlane.f32.xlu0 %v2697_v53  ;;  %v9185_v3 = vld [vmem:[#allocation18_spill] sm:$0xff] }
 0x7f2   :  { %5364 = vpow2.f32 %v3021_v16  ;;  %v2803_v2 = vsub.f32 %v7988_v49, %v2660_v9  ;;  %v2804_v7 = vsub.f32 %v8047_v31, %v2660_v9  ;;  %v8289_v49 = vpop.eup %5358  ;;  %v3711_v42 = vadd.f32 %v8213_v32, %v9185_v3 }
 0x7f3   :  { %5366 = vpow2.f32 %v3023_v61  ;;  %v2651_v63 = vpop.xlane.xlu2 %2650  ;;  %v8281_v22 = vpop.f32.mrf.mxu3  ;;  %v3783_v16 = vunpack.c.l.b16 %v3325_v48 }
 0x7f4   :  { %v3025_v27 = vmul.f32 1.442695, %v2803_v2  ;;  %v3027_v0 = vmul.f32 1.442695, %v2804_v7  ;;  %v2797_v52 = vsub.f32 %v7933_v18, %v2651_v63  ;;  %v2798_v60 = vsub.f32 %v8012_v4, %v2651_v63  ;;  %v9186_v18 = vld [vmem:[#allocation19_spill] sm:$0xff]  ;;  %v8303_v61 = vpop.f32.mrf.mxu1 }
 0x7f5   :  { %v2703_v31 = vmax.f32 %v8285_v36, %v8281_v22  ;;  %v3713_v4 = vadd.f32 %v8238_v34, %v9186_v18  ;;  %9187 = vst [vmem:[#allocation54_spill] sm:$0xff] %v8303_v61  ;;  %v4207_v9 = vmul.f32 %v5355_v15, %v3711_v42  ;;  %v3785_v7 = vunpack.c.l.b16 %v3326_v44  ;;  %v8319_v42 = vpop.xlane.xlu1 %3181 }
 0x7f6   :  { %v5361_v55 = vpop.eup %5360  ;;  %5368 = vpow2.f32 %v3025_v27  ;;  %v3013_v41 = vmul.f32 1.442695, %v2797_v52  ;;  %v3015_v12 = vmul.f32 1.442695, %v2798_v60  ;;  %v3786_v27 = vunpack.c.h.b16 %v3326_v44 }
 0x7f7   :  { %v5363_v21 = vpop.eup %5362  ;;  %5370 = vpow2.f32 %v3027_v0  ;;  %2704 = vmax.xlane.f32.xlu2 %v2703_v31  ;;  %v4208_v0 = vmul.f32 %v5353_v13, %v3713_v4  ;;  %v3839_v15 = vpack.c.b16 %v3785_v7, %v3783_v16  ;;  %v8324_v4 = vpop.f32.mrf.mxu0 }
 0x7f8   :  { %v8299_v46 = vpop.eup %5364  ;;  %5372 = vpow2.f32 %v3013_v41  ;;  %v3222_v53 = vadd.f32 %v5363_v21, %v5361_v55  ;;  %v3840_v41 = vpack.c.b16 %v3786_v27, %v3784_v10 }
 0x7f9   :  { %v8301_v14 = vpop.eup %5366  ;;  %5374 = vpow2.f32 %v3015_v12  ;;  %v2663_v2 = vpop.xlane.xlu0 %2662  ;;  %v4260_v3 = vpack.c.bf16 %v4208_v0, %v4207_v9  ;;  %v3327_v0 = vpack.c.bf16 %v8236_v28, %v8234_v6 }
 0x7fa   :  { %3223 = vadd.xlane.f32.xlu0 %v3222_v53  ;;  %v2805_v32 = vsub.f32 %v8015_v17, %v2663_v2  ;;  %v2806_v34 = vsub.f32 %v8061_v45, %v2663_v2  ;;  %v3231_v63 = vadd.f32 %v8301_v14, %v8299_v46  ;;  %v3228_v17 = vadd.f32 %v8289_v49, %v8279_v26  ;;  %v8326_v53 = vpop.f32.mrf.mxu2 }
 0x7fb   :  { %v3176_v52 = vpop.xlane.xlu2 %3175  ;;  %v8321_v18 = vpop.f32.mrf.mxu3 }
 0x7fc   :  { %v8309_v48 = vpop.eup %5368  ;;  %v3029_v60 = vmul.f32 1.442695, %v2805_v32  ;;  %v3031_v31 = vmul.f32 1.442695, %v2806_v34  ;;  %3232 = vadd.xlane.f32.xlu1 %v3231_v63  ;;  %v2706_v10 = vmax.f32 %v8326_v53, %v8321_v18  ;;  %v8333_v9 = vpop.f32.mrf.mxu1  ;;  %v3328_v32 = vpack.c.bf16 %v5363_v21, %v5361_v55  ;;  %v9189_v63 = vld [vmem:[#allocation21_spill] sm:$0xff] }
 0x7fd   :  { %v8311_v12 = vpop.eup %5370  ;;  %3971 = vmatmul.bf16.gmra.mxu2 %v3839_v15  ;;  %4060 = vmatmul.bf16.gmra.mxu3 %v3840_v41  ;;  %9188 = vst [vmem:[#allocation40_spill] sm:$0xff] %v8333_v9  ;;  %v3718_v27 = vadd.f32 %v3717_v11, %v9189_v63  ;;  %v3788_v11 = vunpack.c.h.b16 %v3327_v0 }
 0x7fe   :  { %v5373_v45 = vpop.eup %5372  ;;  %5376 = vpow2.f32 %v3029_v60  ;;  %v8317_v13 = vadd.f32 %v8311_v12, %v8309_v48  ;;  %5041 = vmatmul.msk.bf16.gmra.mxu1 %vm725_vm0, %v4260_v3  ;;  %v9190_v60 = vld [vmem:[#allocation20_spill] sm:$0xff]  ;;  %v3789_v41 = vunpack.c.l.b16 %v3328_v32  ;;  %v3790_v3 = vunpack.c.h.b16 %v3328_v32 }
 0x7ff   :  { %v5375_v44 = vpop.eup %5374  ;;  %5378 = vpow2.f32 %v3031_v31  ;;  %3229 = vadd.xlane.f32.xlu2 %v3228_v17  ;;  %v3716_v31 = vadd.f32 %v8264_v38, %v9190_v60  ;;  %v8349_v17 = vpop.xlane.xlu1 %3184 }
 0x800   :  { %v8328_v16 = vadd.f32 %v5375_v44, %v5373_v45  ;;  %5380 = vrcp.f32 %v8229_v40  ;;  %v3722_v21 = vpop.f32.mrf.mxu0  ;;  %v3842_v57 = vpack.c.b16 %v3790_v3, %v3788_v11  ;;  %v9192_v11 = vld [vmem:[#allocation90_spill] sm:$0xff] }
 0x801   :  { %5382 = vrcp.f32 %v8225_v8 }
 0x802   :  { %5384 = vrcp.f32 %v3176_v52 }
 0x803   :  { %v8335_v2 = vpop.xlane.xlu2 %3178 }
 0x804   :  { %v8337_v7 = vpop.eup %5376  ;;  %2707 = vmax.xlane.f32.xlu1 %v2706_v10  ;;  %v3787_v10 = vunpack.c.l.b16 %v3327_v0  ;;  %v8353_v38 = vpop.f32.mrf.mxu1 }
 0x805   :  { %v8340_v34 = vpop.eup %5378 }
 0x806   :  { %v3237_v40 = vadd.f32 %v8340_v34, %v8337_v7  ;;  %v5381_v15 = vpop.eup %5380  ;;  %v3841_v28 = vpack.c.b16 %v3789_v41, %v3787_v10 }
 0x807   :  { %v4210_v8 = vmul.f32 %v5381_v15, %v3718_v27  ;;  %v5383_v55 = vpop.eup %5382  ;;  %v8355_v27 = vpop.xlane.xlu0 %3187 }
 0x808   :  { %3238 = vadd.xlane.f32.xlu2 %v3237_v40  ;;  %v4209_v63 = vmul.f32 %v5383_v55, %v3716_v31  ;;  %v3329_v31 = vpack.c.bf16 %v5375_v44, %v5373_v45  ;;  %v5385_v3 = vpop.eup %5384 }
 0x80a   :  { %v4261_v40 = vpack.c.bf16 %v4210_v8, %v4209_v63  ;;  %v9191_v8 = vld [vmem:[#allocation22_spill] sm:$0xff]  ;;  %v3792_v63 = vunpack.c.h.b16 %v3329_v31 }
 0x80b   :  { %v2666_v9 = vpop.xlane.xlu2 %2665  ;;  %v3723_v55 = vadd.f32 %v3722_v21, %v9191_v8  ;;  %v3791_v21 = vunpack.c.l.b16 %v3329_v31 }
 0x80c   :  { %v2807_v61 = vsub.f32 %v8032_v25, %v2666_v9  ;;  %v2808_v6 = vsub.f32 %v8074_v1, %v2666_v9  ;;  %v8372_v44 = vpop.f32.mrf.mxu1 }
 0x80d   :  { %3976 = vmatmul.bf16.gmra.mxu2 %v3841_v28  ;;  %4065 = vmatmul.bf16.gmra.mxu3 %v3842_v57  ;;  %v4212_v28 = vmul.f32 %v5385_v3, %v3723_v55 }
 0x80e   :  { %v3033_v60 = vmul.f32 1.442695, %v2807_v61  ;;  %v3035_v32 = vmul.f32 1.442695, %v2808_v6  ;;  %5042 = vmatmul.msk.bf16.gmra.mxu1 %vm725_vm0, %v4261_v40  ;;  %v8361_v61 = vpop.f32.mrf.mxu0 }
 0x80f   :  { %v8378_v40 = vpop.xlane.xlu0 %3190 }
 0x810   :  { %5386 = vpow2.f32 %v3033_v60 }
 0x811   :  { %5388 = vpow2.f32 %v3035_v32  ;;  %v2672_v0 = vpop.xlane.xlu1 %2671 }
 0x812   :  { %v2811_v25 = vsub.f32 %v8065_v62, %v2672_v0  ;;  %v2812_v1 = vsub.f32 %v8103_v51, %v2672_v0  ;;  %5390 = vrcp.f32 %v8257_v30  ;;  %v3330_v30 = vpack.c.bf16 %v8289_v49, %v8279_v26 }
 0x813   :  { %v2669_v9 = vpop.xlane.xlu2 %2668 }
 0x814   :  { %v3041_v15 = vmul.f32 1.442695, %v2811_v25  ;;  %v3043_v57 = vmul.f32 1.442695, %v2812_v1  ;;  %v2809_v52 = vsub.f32 %v8049_v24, %v2669_v9  ;;  %v2810_v41 = vsub.f32 %v8091_v39, %v2669_v9  ;;  %v8393_v8 = vpop.f32.mrf.mxu1 }
 0x815   :  { %v3721_v24 = vadd.f32 %v8324_v4, %v9192_v11  ;;  %v3793_v32 = vunpack.c.l.b16 %v3330_v30  ;;  %v3794_v4 = vunpack.c.h.b16 %v3330_v30  ;;  %v9193_v11 = vld [vmem:[#allocation42_spill] sm:$0xff] }
 0x816   :  { %v8366_v10 = vpop.eup %5386  ;;  %5392 = vpow2.f32 %v3041_v15  ;;  %v3037_v62 = vmul.f32 1.442695, %v2809_v52  ;;  %v3039_v51 = vmul.f32 1.442695, %v2810_v41  ;;  %v3727_v3 = vpop.f32.mrf.mxu0 }
 0x817   :  { %v8370_v45 = vpop.eup %5388  ;;  %5394 = vpow2.f32 %v3043_v57  ;;  %v3843_v15 = vpack.c.b16 %v3793_v32, %v3791_v21  ;;  %v3844_v31 = vpack.c.b16 %v3794_v4, %v3792_v63 }
 0x818   :  { %5396 = vpow2.f32 %v3037_v62  ;;  %v3240_v39 = vadd.f32 %v8370_v45, %v8366_v10  ;;  %v5391_v6 = vpop.eup %5390 }
 0x819   :  { %5398 = vpow2.f32 %v3039_v51  ;;  %v2675_v26 = vpop.xlane.xlu1 %2674  ;;  %v4211_v0 = vmul.f32 %v5391_v6, %v3721_v24 }
 0x81a   :  { %3241 = vadd.xlane.f32.xlu1 %v3240_v39  ;;  %v2813_v49 = vsub.f32 %v8087_v20, %v2675_v26  ;;  %v2814_v60 = vsub.f32 %v8114_v54, %v2675_v26  ;;  %v3641_v39 = vpop.f32.mrf.mxu2 }
 0x81b   :  { %v4262_v52 = vpack.c.bf16 %v4212_v28, %v4211_v0  ;;  %v9194_v28 = vld [vmem:[#allocation94_spill] sm:$0xff]  ;;  %v8417_v32 = vpop.xlane.xlu2 %3193 }
 0x81c   :  { %v8382_v25 = vpop.eup %5392  ;;  %v3045_v1 = vmul.f32 1.442695, %v2813_v49  ;;  %v3047_v9 = vmul.f32 1.442695, %v2814_v60  ;;  %v3728_v26 = vadd.f32 %v3727_v3, %v9194_v28  ;;  %v9195_v49 = vld [vmem:[#allocation23_spill] sm:$0xff] }
 0x81d   :  { %v8384_v57 = vpop.eup %5394  ;;  %3981 = vmatmul.bf16.gmra.mxu2 %v3843_v15  ;;  %4070 = vmatmul.bf16.gmra.mxu3 %v3844_v31  ;;  %v3726_v60 = vadd.f32 %v8361_v61, %v9195_v49  ;;  %v9196_v31 = vld [vmem:[#allocation96_spill] sm:$0xff] }
 0x81e   :  { %v8386_v41 = vpop.eup %5396  ;;  %5400 = vpow2.f32 %v3045_v1  ;;  %v3246_v20 = vadd.f32 %v8384_v57, %v8382_v25  ;;  %5043 = vmatmul.msk.bf16.gmra.mxu1 %vm725_vm0, %v4262_v52  ;;  %v9197_v61 = vld [vmem:[#allocation44_spill] sm:$0xff] }
 0x81f   :  { %v8390_v54 = vpop.eup %5398  ;;  %5402 = vpow2.f32 %v3047_v9 }
 0x820   :  { %3247 = vadd.xlane.f32.xlu2 %v3246_v20  ;;  %5404 = vrcp.f32 %v8319_v42  ;;  %v8398_v62 = vadd.f32 %v8390_v54, %v8386_v41  ;;  %v3332_v42 = vpack.c.bf16 %v8311_v12, %v8309_v48  ;;  %v3730_v48 = vpop.f32.mrf.mxu0 }
 0x821   :  { %v2678_v55 = vpop.xlane.xlu0 %2677  ;;  %5406 = vrcp.f32 %v8335_v2 }
 0x822   :  { %v2815_v51 = vsub.f32 %v8098_v23, %v2678_v55  ;;  %v2816_v30 = vsub.f32 %v8123_v33, %v2678_v55  ;;  %v3331_v33 = vpack.c.bf16 %v8301_v14, %v8299_v46  ;;  %v3797_v12 = vunpack.c.l.b16 %v3332_v42  ;;  %v8421_v14 = vpop.f32.mrf.mxu1  ;;  %v3643_v28 = vpop.f32.mrf.mxu2 }
 0x823   :  { %1284 = vxpose.xlu0.b32.start [1/16] (narrow) %v9193_v11, 32  ;;  %v3798_v0 = vunpack.c.h.b16 %v3332_v42 }
 0x824   :  { %v8404_v24 = vpop.eup %5400  ;;  %v3049_v21 = vmul.f32 1.442695, %v2815_v51  ;;  %v3051_v63 = vmul.f32 1.442695, %v2816_v30  ;;  %v3795_v3 = vunpack.c.l.b16 %v3331_v33  ;;  %v3796_v46 = vunpack.c.h.b16 %v3331_v33 }
 0x825   :  { %v8408_v6 = vpop.eup %5402 }
 0x826   :  { %5408 = vpow2.f32 %v3049_v21  ;;  %v3249_v23 = vadd.f32 %v8408_v6, %v8404_v24  ;;  %v5405_v2 = vpop.eup %5404  ;;  %v3845_v11 = vpack.c.b16 %v3797_v12, %v3795_v3  ;;  %v3846_v21 = vpack.c.b16 %v3798_v0, %v3796_v46 }
 0x827   :  { %5410 = vpow2.f32 %v3051_v63  ;;  %v5407_v4 = vpop.eup %5406  ;;  %v4214_v1 = vmul.f32 %v5405_v2, %v3728_v26  ;;  %v8432_v26 = vpop.xlane.xlu1 %3199  ;;  %v9198_v2 = vld [vmem:[#allocation47_spill] sm:$0xff] }
 0x828   :  { %3250 = vadd.xlane.f32.xlu1 %v3249_v23  ;;  %v4213_v20 = vmul.f32 %v5407_v4, %v3726_v60  ;;  %v3732_v33 = vpop.f32.mrf.mxu0  ;;  %v3334_v60 = vpack.c.bf16 %v8370_v45, %v8366_v10 }
 0x829   :  { %v2681_v9 = vpop.xlane.xlu0 %2680  ;;  %v3733_v0 = vadd.f32 %v3732_v33, %v3643_v28 }
 0x82a   :  { %v2817_v15 = vsub.f32 %v8116_v56, %v2681_v9  ;;  %v2818_v52 = vsub.f32 %v9196_v31, %v2681_v9  ;;  %v4263_v42 = vpack.c.bf16 %v4214_v1, %v4213_v20  ;;  %v8446_v12 = vpop.f32.mrf.mxu1  ;;  %v3952_v1 = vpop.f32.mrf.mxu2  ;;  %v3731_v31 = vadd.f32 %v3730_v48, %v3641_v39  ;;  %v9200_v20 = vld [vmem:[#allocation41_spill] sm:$0xff] }
 0x82b   :  { %1285 = vxpose.xlu0.b32.cont [2/16] (narrow) %v9197_v61, 32  ;;  %v4041_v9 = vpop.f32.mrf.mxu3  ;;  %v3801_v45 = vunpack.c.l.b16 %v3334_v60  ;;  %v3802_v61 = vunpack.c.h.b16 %v3334_v60 }
 0x82c   :  { %v8424_v55 = vpop.eup %5408  ;;  %v3053_v51 = vmul.f32 1.442695, %v2817_v15  ;;  %v3055_v30 = vmul.f32 1.442695, %v2818_v52  ;;  %v3333_v15 = vpack.c.bf16 %v8340_v34, %v8337_v7  ;;  %v9201_v7 = vld [vmem:[#allocation50_spill] sm:$0xff] }
 0x82d   :  { %v8426_v63 = vpop.eup %5410  ;;  %3986 = vmatmul.bf16.gmra.mxu2 %v3845_v11  ;;  %4075 = vmatmul.bf16.gmra.mxu3 %v3846_v21 }
 0x82e   :  { %5412 = vpow2.f32 %v3053_v51  ;;  %v8430_v56 = vadd.f32 %v8426_v63, %v8424_v55  ;;  %5044 = vmatmul.msk.bf16.gmra.mxu1 %vm725_vm0, %v4263_v42  ;;  %v3799_v28 = vunpack.c.l.b16 %v3333_v15  ;;  %v3800_v33 = vunpack.c.h.b16 %v3333_v15 }
 0x82f   :  { %5414 = vpow2.f32 %v3055_v30  ;;  %v8435_v23 = vpop.xlane.xlu2 %3196  ;;  %v8454_v30 = vpop.xlane.xlu1 %3202 }
 0x830   :  { %5416 = vrcp.f32 %v8355_v27  ;;  %v3847_v34 = vpack.c.b16 %v3801_v45, %v3799_v28  ;;  %v3848_v39 = vpack.c.b16 %v3802_v61, %v3800_v33 }
 0x831   :  { %5418 = vrcp.f32 %v8349_v17  ;;  %v9199_v17 = vld [vmem:[#allocation95_spill] sm:$0xff] }
 0x833   :  { %1286 = vxpose.xlu0.b32.cont [3/16] (narrow) %v9198_v2, 32 }
 0x834   :  { %v8439_v49 = vpop.eup %5412 }
 0x835   :  { %v8444_v4 = vpop.eup %5414 }
 0x836   :  { %v3255_v27 = vadd.f32 %v8444_v4, %v8439_v49  ;;  %v5417_v3 = vpop.eup %5416 }
 0x837   :  { %v2684_v52 = vpop.xlane.xlu2 %2683  ;;  %v4216_v51 = vmul.f32 %v5417_v3, %v3733_v0  ;;  %v5419_v11 = vpop.eup %5418 }
 0x838   :  { %v2819_v46 = vsub.f32 %v9199_v17, %v2684_v52  ;;  %v2820_v10 = vsub.f32 %v9200_v20, %v2684_v52  ;;  %3256 = vadd.xlane.f32.xlu2 %v3255_v27  ;;  %v4215_v2 = vmul.f32 %v5419_v11, %v3731_v31  ;;  %v8457_v27 = vpop.f32.mrf.mxu1  ;;  %v3954_v0 = vpop.f32.mrf.mxu2  ;;  %v3335_v11 = vpack.c.bf16 %v8390_v54, %v8386_v41 }
 0x839   :  { %v4043_v52 = vpop.f32.mrf.mxu3 }
 0x83a   :  { %v3057_v21 = vmul.f32 1.442695, %v2819_v46  ;;  %v3059_v42 = vmul.f32 1.442695, %v2820_v10  ;;  %v4264_v48 = vpack.c.bf16 %v4216_v51, %v4215_v2  ;;  %v3803_v33 = vunpack.c.l.b16 %v3335_v11 }
 0x83b   :  { %1287 = vxpose.xlu0.b32.cont [4/16] (narrow) %v9201_v7, 32 }
 0x83c   :  { %5420 = vpow2.f32 %v3057_v21  ;;  %v4044_v21 = vadd.f32 %v4043_v52, %v3954_v0  ;;  %v9204_v0 = vld [vmem:[#allocation88_spill] sm:$0xff] }
 0x83d   :  { %5422 = vpow2.f32 %v3059_v42  ;;  %3991 = vmatmul.bf16.gmra.mxu2 %v3847_v34  ;;  %4080 = vmatmul.bf16.gmra.mxu3 %v3848_v39  ;;  %v4042_v42 = vadd.f32 %v4041_v9, %v3952_v1 }
 0x83e   :  { %5045 = vmatmul.msk.bf16.gmra.mxu1 %vm725_vm0, %v4264_v48  ;;  %5424 = vrcp.f32 %v8417_v32  ;;  %v9202_v32 = vld [vmem:[#allocation53_spill] sm:$0xff]  ;;  %v9203_v48 = vld [vmem:[#allocation48_spill] sm:$0xff] }
 0x83f   :  { %v2687_v60 = vpop.xlane.xlu2 %2686  ;;  %5426 = vrcp.f32 %v8378_v40 }
 0x840   :  { %v2821_v15 = vsub.f32 %v8143_v50, %v2687_v60  ;;  %v2822_v31 = vsub.f32 %v8157_v58, %v2687_v60  ;;  %v3336_v50 = vpack.c.bf16 %v8384_v57, %v8382_v25  ;;  %v3804_v57 = vunpack.c.h.b16 %v3335_v11  ;;  %v8479_v54 = vpop.f32.mrf.mxu1 }
 0x841   :  { %v2690_v3 = vpop.xlane.xlu1 %2689 }
 0x842   :  { %v8463_v17 = vpop.eup %5420  ;;  %v3061_v46 = vmul.f32 1.442695, %v2821_v15  ;;  %v3063_v20 = vmul.f32 1.442695, %v2822_v31  ;;  %v2823_v10 = vsub.f32 %v8153_v19, %v2690_v3  ;;  %v2824_v45 = vsub.f32 %v8170_v29, %v2690_v3  ;;  %v9205_v15 = vld [vmem:[#allocation56_spill] sm:$0xff] }
 0x843   :  { %v8467_v61 = vpop.eup %5422  ;;  %1288 = vxpose.xlu0.b32.cont [5/16] (narrow) %v9202_v32, 32  ;;  %v3957_v40 = vpop.f32.mrf.mxu2  ;;  %v3805_v25 = vunpack.c.l.b16 %v3336_v50  ;;  %v3806_v2 = vunpack.c.h.b16 %v3336_v50 }
 0x844   :  { %5428 = vpow2.f32 %v3061_v46  ;;  %v3065_v58 = vmul.f32 1.442695, %v2823_v10  ;;  %v3067_v51 = vmul.f32 1.442695, %v2824_v45  ;;  %v3258_v19 = vadd.f32 %v8467_v61, %v8463_v17  ;;  %v5425_v29 = vpop.eup %5424  ;;  %v4046_v28 = vpop.f32.mrf.mxu3 }
 0x845   :  { %5430 = vpow2.f32 %v3063_v20  ;;  %v5427_v7 = vpop.eup %5426  ;;  %v4218_v34 = vmul.f32 %v5425_v29, %v4044_v21  ;;  %v3849_v20 = vpack.c.b16 %v3805_v25, %v3803_v33  ;;  %v3850_v10 = vpack.c.b16 %v3806_v2, %v3804_v57  ;;  %v9206_v29 = vld [vmem:[#allocation59_spill] sm:$0xff] }
 0x846   :  { %5432 = vpow2.f32 %v3065_v58  ;;  %3259 = vadd.xlane.f32.xlu1 %v3258_v19  ;;  %v4217_v9 = vmul.f32 %v5427_v7, %v4042_v42  ;;  %v3338_v25 = vpack.c.bf16 %v8426_v63, %v8424_v55 }
 0x847   :  { %5434 = vpow2.f32 %v3067_v51  ;;  %v8497_v11 = vpop.xlane.xlu2 %3211 }
 0x848   :  { %v4265_v32 = vpack.c.bf16 %v4218_v34, %v4217_v9  ;;  %v8503_v33 = vpop.f32.mrf.mxu1  ;;  %v3337_v34 = vpack.c.bf16 %v8408_v6, %v8404_v24 }
 0x849   :  { %v2693_v39 = vpop.xlane.xlu1 %2692 }
 0x84a   :  { %v8477_v41 = vpop.eup %5428  ;;  %v2825_v60 = vsub.f32 %v9203_v48, %v2693_v39  ;;  %v2826_v52 = vsub.f32 %v9204_v0, %v2693_v39  ;;  %v4047_v39 = vadd.f32 %v4046_v28, %v3957_v40  ;;  %v3810_v0 = vunpack.c.h.b16 %v3338_v25 }
 0x84b   :  { %v8483_v1 = vpop.eup %5430  ;;  %1289 = vxpose.xlu0.b32.cont [6/16] (narrow) %v9205_v15, 32  ;;  %v3959_v21 = vpop.f32.mrf.mxu2  ;;  %v3807_v55 = vunpack.c.l.b16 %v3337_v34  ;;  %v3808_v63 = vunpack.c.h.b16 %v3337_v34 }
 0x84c   :  { %v8486_v31 = vpop.eup %5432  ;;  %v3069_v3 = vmul.f32 1.442695, %v2825_v60  ;;  %v3071_v46 = vmul.f32 1.442695, %v2826_v52  ;;  %v3206_v50 = vpop.xlane.xlu0 %3205  ;;  %v8492_v58 = vadd.f32 %v8483_v1, %v8477_v41  ;;  %v3809_v60 = vunpack.c.l.b16 %v3338_v25 }
 0x84d   :  { %v8488_v45 = vpop.eup %5434  ;;  %3996 = vmatmul.bf16.gmra.mxu2 %v3849_v20  ;;  %4085 = vmatmul.bf16.gmra.mxu3 %v3850_v10  ;;  %v4048_v19 = vpop.f32.mrf.mxu3  ;;  %v3852_v20 = vpack.c.b16 %v3810_v0, %v3808_v63 }
 0x84e   :  { %5436 = vpow2.f32 %v3069_v3  ;;  %v3264_v51 = vadd.f32 %v8488_v45, %v8486_v31  ;;  %5046 = vmatmul.msk.bf16.gmra.mxu1 %vm725_vm0, %v4265_v32  ;;  %v4049_v2 = vadd.f32 %v4048_v19, %v3959_v21  ;;  %v9207_v3 = vld [vmem:[#allocation62_spill] sm:$0xff] }
 0x84f   :  { %5438 = vpow2.f32 %v3071_v46  ;;  %v8516_v9 = vpop.xlane.xlu2 %3214  ;;  %v3851_v46 = vpack.c.b16 %v3809_v60, %v3807_v55  ;;  %v3339_v60 = vpack.c.bf16 %v8444_v4, %v8439_v49 }
 0x850   :  { %3265 = vadd.xlane.f32.xlu2 %v3264_v51  ;;  %5440 = vrcp.f32 %v8432_v26  ;;  %v8521_v6 = vpop.f32.mrf.mxu1 }
 0x851   :  { %5442 = vrcp.f32 %v8435_v23  ;;  %v8519_v32 = vpop.xlane.xlu1 %3217 }
 0x853   :  { %1290 = vxpose.xlu0.b32.cont [7/16] (narrow) %v9206_v29, 32 }
 0x854   :  { %v8501_v42 = vpop.eup %5436  ;;  %v8510_v7 = vpop.xlane.xlu0 %3208 }
 0x855   :  { %v8508_v57 = vpop.eup %5438 }
 0x856   :  { %v3267_v26 = vadd.f32 %v8508_v57, %v8501_v42  ;;  %v5441_v48 = vpop.eup %5440 }
 0x857   :  { %v4220_v23 = vmul.f32 %v5441_v48, %v4049_v2  ;;  %v5443_v52 = vpop.eup %5442  ;;  %v9208_v2 = vld [vmem:[#allocation63_spill] sm:$0xff] }
 0x858   :  { %3268 = vadd.xlane.f32.xlu1 %v3267_v26  ;;  %v4219_v15 = vmul.f32 %v5443_v52, %v4047_v39 }
 0x859   :  { %v8536_v52 = vpop.xlane.xlu1 %3220 }
 0x85a   :  { %v4266_v10 = vpack.c.bf16 %v4220_v23, %v4219_v15 }
 0x85b   :  { %1291 = vxpose.xlu0.b32.cont [8/16] (narrow) %v9207_v3, 32 }
 0x85c   :  { %v2696_v24 = vpop.xlane.xlu0 %2695 }
 0x85d   :  { %v2827_v40 = vsub.f32 %v8205_v37, %v2696_v24  ;;  %v2828_v28 = vsub.f32 %v8223_v35, %v2696_v24  ;;  %4001 = vmatmul.bf16.gmra.mxu2 %v3851_v46  ;;  %4090 = vmatmul.bf16.gmra.mxu3 %v3852_v20  ;;  %v3340_v37 = vpack.c.bf16 %v8467_v61, %v8463_v17  ;;  %v8540_v17 = vpop.f32.mrf.mxu1  ;;  %v3812_v46 = vunpack.c.h.b16 %v3339_v60  ;;  %v9209_v24 = vld [vmem:[#allocation64_spill] sm:$0xff] }
 0x85e   :  { %5047 = vmatmul.msk.bf16.gmra.mxu1 %vm725_vm0, %v4266_v10 }
 0x85f   :  { %v3073_v51 = vmul.f32 1.442695, %v2827_v40  ;;  %v3075_v21 = vmul.f32 1.442695, %v2828_v28 }
 0x860   :  { %v3962_v19 = vpop.f32.mrf.mxu2  ;;  %v4051_v29 = vpop.f32.mrf.mxu3 }
 0x861   :  { %5444 = vpow2.f32 %v3073_v51  ;;  %v2702_v25 = vpop.xlane.xlu2 %2701 }
 0x862   :  { %5446 = vpow2.f32 %v3075_v21  ;;  %v2831_v26 = vsub.f32 %v8259_v59, %v2702_v25  ;;  %v2832_v34 = vsub.f32 %v8262_v43, %v2702_v25  ;;  %v3813_v59 = vunpack.c.l.b16 %v3340_v37 }
 0x863   :  { %1292 = vxpose.xlu0.b32.cont [9/16] (narrow) %v9208_v2, 32  ;;  %5448 = vrcp.f32 %v8454_v30  ;;  %v3814_v43 = vunpack.c.h.b16 %v3340_v37  ;;  %v4052_v30 = vadd.f32 %v4051_v29, %v3962_v19 }
 0x864   :  { %5450 = vrcp.f32 %v3206_v50  ;;  %v3081_v35 = vmul.f32 1.442695, %v2831_v26  ;;  %v3083_v39 = vmul.f32 1.442695, %v2832_v34  ;;  %v2699_v48 = vpop.xlane.xlu0 %2698 }
 0x865   :  { %v2829_v0 = vsub.f32 %v8232_v5, %v2699_v48  ;;  %v2830_v23 = vsub.f32 %v8241_v47, %v2699_v48  ;;  %v3811_v5 = vunpack.c.l.b16 %v3339_v60  ;;  %v3854_v29 = vpack.c.b16 %v3814_v43, %v3812_v46 }
 0x866   :  { %5452 = vpow2.f32 %v3081_v35  ;;  %v3342_v43 = vpack.c.bf16 %v8488_v45, %v8486_v31 }
 0x867   :  { %v8538_v55 = vpop.eup %5444  ;;  %5454 = vpow2.f32 %v3083_v39  ;;  %v3077_v61 = vmul.f32 1.442695, %v2829_v0  ;;  %v3079_v50 = vmul.f32 1.442695, %v2830_v23  ;;  %v3853_v19 = vpack.c.b16 %v3813_v59, %v3811_v5  ;;  %v8561_v39 = vpop.f32.mrf.mxu1  ;;  %v9210_v59 = vld [vmem:[#allocation65_spill] sm:$0xff] }
 0x868   :  { %v8542_v63 = vpop.eup %5446  ;;  %v3964_v49 = vpop.f32.mrf.mxu2 }
 0x869   :  { %v4053_v4 = vpop.f32.mrf.mxu3  ;;  %v5449_v15 = vpop.eup %5448  ;;  %5456 = vpow2.f32 %v3077_v61  ;;  %v8546_v20 = vadd.f32 %v8542_v63, %v8538_v55  ;;  %v3341_v61 = vpack.c.bf16 %v8483_v1, %v8477_v41 }
 0x86a   :  { %v4054_v47 = vadd.f32 %v4053_v4, %v3964_v49  ;;  %v2705_v3 = vpop.xlane.xlu2 %2704  ;;  %v5451_v10 = vpop.eup %5450  ;;  %5458 = vpow2.f32 %v3079_v50  ;;  %v4221_v51 = vmul.f32 %v5449_v15, %v4052_v30  ;;  %v3817_v4 = vunpack.c.l.b16 %v3342_v43 }
 0x86b   :  { %1293 = vxpose.xlu0.b32.cont [10/16] (narrow) %v9209_v24, 32  ;;  %v2833_v40 = vsub.f32 %v8285_v36, %v2705_v3  ;;  %v2834_v28 = vsub.f32 %v8281_v22, %v2705_v3 }
 0x86c   :  { %v4222_v21 = vmul.f32 %v5451_v10, %v4054_v47  ;;  %v8551_v25 = vpop.eup %5452 }
 0x86d   :  { %v3085_v2 = vmul.f32 1.442695, %v2833_v40  ;;  %v3087_v26 = vmul.f32 1.442695, %v2834_v28  ;;  %v8553_v34 = vpop.eup %5454  ;;  %4006 = vmatmul.bf16.gmra.mxu2 %v3853_v19  ;;  %4095 = vmatmul.bf16.gmra.mxu3 %v3854_v29  ;;  %v3816_v40 = vunpack.c.h.b16 %v3341_v61 }
 0x86e   :  { %v4267_v37 = vpack.c.bf16 %v4222_v21, %v4221_v51  ;;  %v3276_v36 = vadd.f32 %v8553_v34, %v8551_v25  ;;  %v9211_v51 = vld [vmem:[#allocation66_spill] sm:$0xff] }
 0x86f   :  { %5460 = vpow2.f32 %v3085_v2  ;;  %v8555_v35 = vpop.xlane.xlu1 %3232  ;;  %v8559_v22 = vpop.eup %5456 }
 0x870   :  { %5462 = vpow2.f32 %v3087_v26  ;;  %5048 = vmatmul.msk.bf16.gmra.mxu1 %vm725_vm0, %v4267_v37  ;;  %v8564_v48 = vpop.eup %5458  ;;  %v3967_v60 = vpop.f32.mrf.mxu2  ;;  %3277 = vadd.xlane.f32.xlu1 %v3276_v36 }
 0x871   :  { %v4056_v0 = vpop.f32.mrf.mxu3  ;;  %v3273_v23 = vadd.f32 %v8564_v48, %v8559_v22  ;;  %5464 = vrcp.f32 %v8497_v11  ;;  %v3818_v11 = vunpack.c.h.b16 %v3342_v43  ;;  %v8585_v10 = vpop.f32.mrf.mxu1  ;;  %v3343_v43 = vpack.c.bf16 %v8508_v57, %v8501_v42 }
 0x872   :  { %5466 = vrcp.f32 %v8510_v7  ;;  %v4057_v15 = vadd.f32 %v4056_v0, %v3967_v60  ;;  %v3815_v7 = vunpack.c.l.b16 %v3341_v61  ;;  %v9212_v60 = vld [vmem:[#allocation67_spill] sm:$0xff] }
 0x873   :  { %1294 = vxpose.xlu0.b32.cont [11/16] (narrow) %v9210_v59, 32  ;;  %3274 = vadd.xlane.f32.xlu2 %v3273_v23  ;;  %v3856_v29 = vpack.c.b16 %v3818_v11, %v3816_v40  ;;  %v3344_v59 = vpack.c.bf16 %v8542_v63, %v8538_v55  ;;  %v9214_v40 = vld [vmem:[#allocation69_spill] sm:$0xff] }
 0x874   :  { %v3855_v21 = vpack.c.b16 %v3817_v4, %v3815_v7  ;;  %v9213_v7 = vld [vmem:[#allocation68_spill] sm:$0xff] }
 0x875   :  { %v8572_v30 = vpop.eup %5460  ;;  %v3822_v4 = vunpack.c.h.b16 %v3344_v59 }
 0x876   :  { %v8577_v50 = vpop.eup %5462 }
 0x877   :  { %v2708_v49 = vpop.xlane.xlu1 %2707  ;;  %v8581_v5 = vadd.f32 %v8577_v50, %v8572_v30  ;;  %v5465_v46 = vpop.eup %5464 }
 0x878   :  { %v2835_v31 = vsub.f32 %v8326_v53, %v2708_v49  ;;  %v2836_v45 = vsub.f32 %v8321_v18, %v2708_v49  ;;  %v3969_v47 = vpop.f32.mrf.mxu2  ;;  %v5467_v28 = vpop.eup %5466  ;;  %v3821_v49 = vunpack.c.l.b16 %v3344_v59 }
 0x879   :  { %v4058_v3 = vpop.f32.mrf.mxu3  ;;  %v4223_v19 = vmul.f32 %v5467_v28, %v4057_v15  ;;  %v8591_v0 = vpop.f32.mrf.mxu1  ;;  %v3345_v28 = vpack.c.bf16 %v8564_v48, %v8559_v22 }
 0x87a   :  { %v3089_v41 = vmul.f32 1.442695, %v2835_v31  ;;  %v3091_v1 = vmul.f32 1.442695, %v2836_v45  ;;  %v4059_v24 = vadd.f32 %v4058_v3, %v3969_v47  ;;  %v3820_v47 = vunpack.c.h.b16 %v3343_v43 }
 0x87b   :  { %1295 = vxpose.xlu0.b32.cont [12/16] (narrow) %v9211_v51, 32  ;;  %v3346_v51 = vpack.c.bf16 %v8553_v34, %v8551_v25 }
 0x87c   :  { %5468 = vpow2.f32 %v3089_v41  ;;  %v4224_v53 = vmul.f32 %v5465_v46, %v4059_v24  ;;  %v3224_v24 = vpop.xlane.xlu0 %3223 }
 0x87d   :  { %5470 = vpow2.f32 %v3091_v1  ;;  %4011 = vmatmul.bf16.gmra.mxu2 %v3855_v21  ;;  %4100 = vmatmul.bf16.gmra.mxu3 %v3856_v29  ;;  %v3824_v29 = vunpack.c.h.b16 %v3345_v28  ;;  %v3826_v59 = vunpack.c.h.b16 %v3346_v51 }
 0x87e   :  { %v4268_v18 = vpack.c.bf16 %v4224_v53, %v4223_v19  ;;  %5472 = vrcp.f32 %v8516_v9  ;;  %v3819_v9 = vunpack.c.l.b16 %v3343_v43  ;;  %v3823_v53 = vunpack.c.l.b16 %v3345_v28  ;;  %v9226_v28 = vld [vmem:[#allocation29_spill] sm:$0xff] }
 0x87f   :  { %5474 = vrcp.f32 %v8519_v32  ;;  %v3858_v32 = vpack.c.b16 %v3822_v4, %v3820_v47  ;;  %v9216_v47 = vld [vmem:[#allocation24_spill] sm:$0xff] }
 0x880   :  { %5049 = vmatmul.msk.bf16.gmra.mxu1 %vm725_vm0, %v4268_v18  ;;  %v3972_v2 = vpop.f32.mrf.mxu2  ;;  %v3857_v63 = vpack.c.b16 %v3821_v49, %v3819_v9  ;;  %5476 = vrcp.f32 %v8536_v52  ;;  %v9215_v52 = vld [vmem:[#allocation70_spill] sm:$0xff]  ;;  %v3860_v49 = vpack.c.b16 %v3826_v59, %v3824_v29  ;;  %v9233_v59 = vld [vmem:[#allocation79_spill] sm:$0xff] }
 0x881   :  { %v4061_v26 = vpop.f32.mrf.mxu3  ;;  %v8599_v41 = vpop.f32.mrf.mxu1  ;;  %5478 = vrcp.f32 %v3224_v24  ;;  %v9224_v24 = vld [vmem:[#allocation28_spill] sm:$0xff] }
 0x882   :  { %v5469_v37 = vpop.eup %5468  ;;  %v4062_v61 = vadd.f32 %v4061_v26, %v3972_v2 }
 0x883   :  { %v5471_v36 = vpop.eup %5470  ;;  %1296 = vxpose.xlu0.b32.cont [13/16] (narrow) %v9212_v60, 32 }
 0x884   :  { %v3282_v23 = vadd.f32 %v5471_v36, %v5469_v37  ;;  %v5473_v45 = vpop.eup %5472  ;;  %v3348_v34 = vpack.c.bf16 %v5471_v36, %v5469_v37  ;;  %v9219_v36 = vld [vmem:[#allocation74_spill] sm:$0xff] }
 0x885   :  { %v5475_v3 = vpop.eup %5474  ;;  %v4225_v46 = vmul.f32 %v5473_v45, %v4062_v61 }
 0x886   :  { %3283 = vadd.xlane.f32.xlu2 %v3282_v23  ;;  %v5477_v26 = vpop.eup %5476  ;;  %v3825_v23 = vunpack.c.l.b16 %v3346_v51  ;;  %v3830_v45 = vunpack.c.h.b16 %v3348_v34 }
 0x887   :  { %v5479_v43 = vpop.eup %5478 }
 0x888   :  { %v3974_v15 = vpop.f32.mrf.mxu2  ;;  %v3859_v48 = vpack.c.b16 %v3825_v23, %v3823_v53  ;;  %v9228_v53 = vld [vmem:[#allocation30_spill] sm:$0xff]  ;;  %v9232_v23 = vld [vmem:[#allocation32_spill] sm:$0xff] }
 0x889   :  { %v4063_v31 = vpop.f32.mrf.mxu3  ;;  %v8608_v21 = vpop.f32.mrf.mxu1 }
 0x88a   :  { %v4064_v11 = vadd.f32 %v4063_v31, %v3974_v15  ;;  %v3347_v15 = vpack.c.bf16 %v8577_v50, %v8572_v30  ;;  %v3829_v31 = vunpack.c.l.b16 %v3348_v34  ;;  %v9220_v30 = vld [vmem:[#allocation26_spill] sm:$0xff]  ;;  %v9221_v50 = vld [vmem:[#allocation72_spill] sm:$0xff] }
 0x88b   :  { %1297 = vxpose.xlu0.b32.cont [14/16] (narrow) %v9213_v7, 32 }
 0x88c   :  { %v4226_v55 = vmul.f32 %v5475_v3, %v4064_v11  ;;  %v3827_v11 = vunpack.c.l.b16 %v3347_v15  ;;  %v3828_v9 = vunpack.c.h.b16 %v3347_v15  ;;  %v9239_v15 = vld [vmem:[#allocation82_spill] sm:$0xff] }
 0x88d   :  { %4016 = vmatmul.bf16.gmra.mxu2 %v3857_v63  ;;  %4105 = vmatmul.bf16.gmra.mxu3 %v3858_v32  ;;  %v9218_v63 = vld [vmem:[#allocation25_spill] sm:$0xff] }
 0x88e   :  { %v4269_v1 = vpack.c.bf16 %v4226_v55, %v4225_v46  ;;  %v3861_v7 = vpack.c.b16 %v3829_v31, %v3827_v11  ;;  %v3862_v46 = vpack.c.b16 %v3830_v45, %v3828_v9  ;;  %v9217_v55 = vld [vmem:[#allocation71_spill] sm:$0xff]  ;;  %v9240_v31 = vld [vmem:[#allocation36_spill] sm:$0xff]  ;;  %v9242_v9 = vld [vmem:[#allocation37_spill] sm:$0xff] }
 0x88f   :  { %v9241_v45 = vld [vmem:[#allocation83_spill] sm:$0xff] }
 0x890   :  { %5050 = vmatmul.msk.bf16.gmra.mxu1 %vm725_vm0, %v4269_v1  ;;  %v3977_v42 = vpop.f32.mrf.mxu2  ;;  %v9222_v1 = vld [vmem:[#allocation27_spill] sm:$0xff] }
 0x891   :  { %v4066_v57 = vpop.f32.mrf.mxu3  ;;  %v8612_v25 = vpop.f32.mrf.mxu1 }
 0x892   :  { %v4067_v19 = vadd.f32 %v4066_v57, %v3977_v42  ;;  %v9223_v42 = vld [vmem:[#allocation73_spill] sm:$0xff] }
 0x893   :  { %1298 = vxpose.xlu0.b32.cont [15/16] (narrow) %v9214_v40, 32  ;;  %v9225_v40 = vld [vmem:[#allocation75_spill] sm:$0xff] }
 0x894   :  { %v4227_v61 = vmul.f32 %v5477_v26, %v4067_v19  ;;  %v9227_v19 = vld [vmem:[#allocation76_spill] sm:$0xff]  ;;  %v9231_v26 = vld [vmem:[#allocation78_spill] sm:$0xff] }
 0x898   :  { %v3979_v18 = vpop.f32.mrf.mxu2 }
 0x899   :  { %v4068_v2 = vpop.f32.mrf.mxu3  ;;  %v8617_v3 = vpop.f32.mrf.mxu1 }
 0x89a   :  { %v4069_v60 = vadd.f32 %v4068_v2, %v3979_v18  ;;  %v9229_v18 = vld [vmem:[#allocation77_spill] sm:$0xff]  ;;  %v9230_v2 = vld [vmem:[#allocation31_spill] sm:$0xff] }
 0x89b   :  { %1299 = vxpose.xlu0.b32.end [16/16] (narrow) %v9215_v52, 32  ;;  %v9234_v52 = vld [vmem:[#allocation33_spill] sm:$0xff] }
 0x89c   :  { %v4228_v22 = vmul.f32 %v5479_v43, %v4069_v60 }
 0x89d   :  { %4021 = vmatmul.bf16.gmra.mxu2 %v3859_v48  ;;  %4110 = vmatmul.bf16.gmra.mxu3 %v3860_v49  ;;  %v9237_v49 = vld [vmem:[#allocation81_spill] sm:$0xff] }
 0x89e   :  { %v4270_v4 = vpack.c.bf16 %v4228_v22, %v4227_v61  ;;  %v9235_v61 = vld [vmem:[#allocation80_spill] sm:$0xff]  ;;  %v9236_v22 = vld [vmem:[#allocation34_spill] sm:$0xff] }
 0x8a0   :  { %5051 = vmatmul.msk.bf16.gmra.mxu1 %vm725_vm0, %v4270_v4  ;;  %v9238_v4 = vld [vmem:[#allocation35_spill] sm:$0xff] }
 0x8a1   :  { %v8621_v37 = vpop.f32.mrf.mxu1 }
 0x8a9   :  { %v8626_v32 = vpop.f32.mrf.mxu1 }
 0x8aa   :  { %1252 = vxpose.xlu1.b32.start [1/16] (narrow) %v9216_v47, 32  ;;  %v9243_v47 = vld [vmem:[#allocation84_spill] sm:$0xff] }
 0x8ad   :  { %4026 = vmatmul.bf16.gmra.mxu2 %v3861_v7  ;;  %4115 = vmatmul.bf16.gmra.mxu3 %v3862_v46  ;;  %v9244_v46 = vld [vmem:[#allocation38_spill] sm:$0xff] }
 0x8af   :  { %1316 = vxpose.xlu2.b32.start [1/16] (narrow) %v9217_v55, 32  ;;  %v9245_v55 = vld [vmem:[#allocation85_spill] sm:$0xff] }
 0x8b1   :  { %v8630_v57 = vpop.f32.mrf.mxu1 }
 0x8b2   :  { %1253 = vxpose.xlu1.b32.cont [2/16] (narrow) %v9218_v63, 32  ;;  %v9246_v63 = vld [vmem:[#allocation39_spill] sm:$0xff] }
 0x8b7   :  { %1317 = vxpose.xlu2.b32.cont [2/16] (narrow) %v9219_v36, 32 }
 0x8b9   :  { %v8635_v51 = vpop.f32.mrf.mxu1 }
 0x8ba   :  { %1254 = vxpose.xlu1.b32.cont [3/16] (narrow) %v9220_v30, 32 }
 0x8bf   :  { %1318 = vxpose.xlu2.b32.cont [3/16] (narrow) %v9221_v50, 32 }
 0x8c1   :  { %v8639_v29 = vpop.f32.mrf.mxu1 }
 0x8c2   :  { %1255 = vxpose.xlu1.b32.cont [4/16] (narrow) %v9222_v1, 32 }
 0x8c7   :  { %1319 = vxpose.xlu2.b32.cont [4/16] (narrow) %v9223_v42, 32 }
 0x8c9   :  { %v8644_v60 = vpop.f32.mrf.mxu1 }
 0x8ca   :  { %1256 = vxpose.xlu1.b32.cont [5/16] (narrow) %v9224_v24, 32 }
 0x8cf   :  { %1320 = vxpose.xlu2.b32.cont [5/16] (narrow) %v9225_v40, 32 }
 0x8d1   :  { %v8648_v43 = vpop.f32.mrf.mxu1 }
 0x8d2   :  { %1257 = vxpose.xlu1.b32.cont [6/16] (narrow) %v9226_v28, 32 }
 0x8d7   :  { %1321 = vxpose.xlu2.b32.cont [6/16] (narrow) %v9227_v19, 32 }
 0x8d9   :  { %v8653_v48 = vpop.f32.mrf.mxu1 }
 0x8da   :  { %1258 = vxpose.xlu1.b32.cont [7/16] (narrow) %v9228_v53, 32 }
 0x8df   :  { %1322 = vxpose.xlu2.b32.cont [7/16] (narrow) %v9229_v18, 32  ;;  %v4071_v18 = vpop.f32.mrf.mxu3 }
 0x8e1   :  { %v8657_v34 = vpop.f32.mrf.mxu1 }
 0x8e2   :  { %1259 = vxpose.xlu1.b32.cont [8/16] (narrow) %v9230_v2, 32 }
 0x8e7   :  { %1323 = vxpose.xlu2.b32.cont [8/16] (narrow) %v9231_v26, 32 }
 0x8e9   :  { %v4483_v11 = vpop.f32.mrf.mxu1 }
 0x8ea   :  { %1260 = vxpose.xlu1.b32.cont [9/16] (narrow) %v9232_v23, 32 }
 0x8ef   :  { %1324 = vxpose.xlu2.b32.cont [9/16] (narrow) %v9233_v59, 32 }
 0x8f1   :  { %v4485_v7 = vpop.f32.mrf.mxu1 }
 0x8f2   :  { %1261 = vxpose.xlu1.b32.cont [10/16] (narrow) %v9234_v52, 32  ;;  %v4073_v52 = vpop.f32.mrf.mxu3 }
 0x8f7   :  { %1325 = vxpose.xlu2.b32.cont [10/16] (narrow) %v9235_v61, 32 }
 0x8f9   :  { %v4488_v36 = vpop.f32.mrf.mxu1 }
 0x8fa   :  { %1262 = vxpose.xlu1.b32.cont [11/16] (narrow) %v9236_v22, 32 }
 0x8ff   :  { %1326 = vxpose.xlu2.b32.cont [11/16] (narrow) %v9237_v49, 32 }
 0x901   :  { %v4490_v1 = vpop.f32.mrf.mxu1 }
 0x902   :  { %1263 = vxpose.xlu1.b32.cont [12/16] (narrow) %v9238_v4, 32 }
 0x907   :  { %1327 = vxpose.xlu2.b32.cont [12/16] (narrow) %v9239_v15, 32 }
 0x909   :  { %v4493_v24 = vpop.f32.mrf.mxu1 }
 0x90a   :  { %1264 = vxpose.xlu1.b32.cont [13/16] (narrow) %v9240_v31, 32 }
 0x90c   :  { %3226 = vadd.xlane.f32.xlu0 %v8328_v16  ;;  %v5521_v16 = vld [vmem:[%s8821_s4] sm:$0x7]  ;;  %s5578_s4 = smov [#allocation5]  }
 0x90d   :  { %v8674_v30 = vperm.slane %v5521_v16, 2  ;;  %s4743_s0 = sshll.u32 %s5578_s4, 4  ;;  %s4744_s0 = int_to_ptr.vmem [resolvable:$true] %s4743_s0 }
 0x90f   :  { %1328 = vxpose.xlu2.b32.cont [13/16] (narrow) %v9241_v45, 32  ;;  %v4484_v50 = vadd.f32 %v4483_v11, %v8674_v30  ;;  %v4446_v42 = vadd.f32 %v8585_v10, %v8674_v30  ;;  %v4489_v40 = vadd.f32 %v4488_v36, %v8674_v30  ;;  %v4494_v10 = vadd.f32 %v4493_v24, %v8674_v30  ;;  %v4076_v45 = vpop.f32.mrf.mxu3  ;;  %v9250_v36 = vld [vmem:[#allocation60_spill] sm:$0xff] }
 0x910   :  { %v4454_v53 = vadd.f32 %v8608_v21, %v8674_v30  ;;  %v4456_v2 = vadd.f32 %v8612_v25, %v8674_v30  ;;  %v4459_v21 = vadd.f32 %v8617_v3, %v8674_v30  ;;  %v9248_v25 = vld [vmem:[#allocation49_spill] sm:$0xff]  ;;  %v4461_v15 = vadd.f32 %v8621_v37, %v8674_v30 }
 0x911   :  { %v4495_v28 = vpop.f32.mrf.mxu1  ;;  %v4404_v4 = vadd.f32 %v9248_v25, %v8674_v30  ;;  %v4409_v16 = vadd.f32 %v9250_v36, %v8674_v30 }
 0x912   :  { %1265 = vxpose.xlu1.b32.cont [14/16] (narrow) %v9242_v9, 32  ;;  %v9249_v9 = vld [vmem:[#allocation51_spill] sm:$0xff] }
 0x914   :  { %3235 = vadd.xlane.f32.xlu0 %v8317_v13  ;;  %v9247_v13 = vld [vmem:[#allocation86_spill] sm:$0xff] }
 0x917   :  { %1329 = vxpose.xlu2.b32.cont [14/16] (narrow) %v9243_v47, 32  ;;  %v4406_v47 = vadd.f32 %v9249_v9, %v8674_v30  ;;  %v4078_v37 = vpop.f32.mrf.mxu3  ;;  %v4476_v9 = vadd.f32 %v8648_v43, %v8674_v30 }
 0x919   :  { %v4498_v19 = vpop.f32.mrf.mxu1 }
 0x91a   :  { %1266 = vxpose.xlu1.b32.cont [15/16] (narrow) %v9244_v46, 32  ;;  %v4499_v23 = vadd.f32 %v4498_v19, %v8674_v30  ;;  %v4464_v46 = vadd.f32 %v8626_v32, %v8674_v30 }
 0x91c   :  { %3244 = vadd.xlane.f32.xlu0 %v8398_v62  ;;  %v4444_v62 = vadd.f32 %v8561_v39, %v8674_v30  ;;  %v4491_v39 = vadd.f32 %v4490_v1, %v8674_v30 }
 0x91f   :  { %1330 = vxpose.xlu2.b32.cont [15/16] (narrow) %v9245_v55, 32 }
 0x921   :  { %v4500_v26 = vpop.f32.mrf.mxu1 }
 0x922   :  { %1267 = vxpose.xlu1.b32.end [16/16] (narrow) %v9246_v63, 32  ;;  %v4501_v22 = vadd.f32 %v4500_v26, %v8674_v30 }
 0x924   :  { %3253 = vadd.xlane.f32.xlu0 %v8430_v56  ;;  %v4486_v56 = vadd.f32 %v4485_v7, %v8674_v30 }
 0x927   :  { %1331 = vxpose.xlu2.b32.end [16/16] (narrow) %v9247_v13, 32 }
 0x929   :  { %v4503_v61 = vpop.f32.mrf.mxu1 }
 0x92a   :  { %4643 = vxpose.xlu1.b32.start [1/16] (narrow) %v4484_v50, 32  ;;  %v4504_v11 = vadd.f32 %v4503_v61, %v8674_v30  ;;  %v4466_v50 = vadd.f32 %v8630_v57, %v8674_v30 }
 0x92c   :  { %3262 = vadd.xlane.f32.xlu0 %v8492_v58  ;;  %v4449_v58 = vadd.f32 %v8591_v0, %v8674_v30  ;;  %v4496_v0 = vadd.f32 %v4495_v28, %v8674_v30 }
 0x92f   :  { %4611 = vxpose.xlu2.b32.start [1/16] (narrow) %v4444_v62, 32 }
 0x931   :  { %v4505_v3 = vpop.f32.mrf.mxu1 }
 0x932   :  { %4644 = vxpose.xlu1.b32.cont [2/16] (narrow) %v4486_v56, 32  ;;  %v4506_v63 = vadd.f32 %v4505_v3, %v8674_v30  ;;  %v4081_v56 = vpop.f32.mrf.mxu3 }
 0x934   :  { %3271 = vadd.xlane.f32.xlu0 %v8546_v20  ;;  %v4451_v20 = vadd.f32 %v8599_v41, %v8674_v30  ;;  %v8698_v41 = vpop.trf.xlu0 }
 0x937   :  { %4612 = vxpose.xlu2.b32.cont [2/16] (narrow) %v4446_v42, 32  ;;  %v9251_v42 = vld [vmem:[#allocation87_spill] sm:$0xff] }
 0x938   :  { %v4411_v24 = vadd.f32 %v9251_v42, %v8674_v30 }
 0x939   :  { %v4508_v13 = vpop.f32.mrf.mxu1 }
 0x93a   :  { %4645 = vxpose.xlu1.b32.cont [3/16] (narrow) %v4489_v40, 32  ;;  %v4509_v32 = vadd.f32 %v4508_v13, %v8674_v30  ;;  %v3230_v40 = vpop.xlane.xlu2 %3229  ;;  %v3242_v13 = vpop.xlane.xlu1 %3241 }
 0x93b   :  { %5480 = vrcp.f32 %v3230_v40 }
 0x93c   :  { %3280 = vadd.xlane.f32.xlu0 %v8581_v5  ;;  %v3982_v5 = vpop.f32.mrf.mxu2  ;;  %v8704_v49 = vpop.trf.xlu0 }
 0x93d   :  { %v4072_v26 = vadd.f32 %v4071_v18, %v3982_v5 }
 0x93f   :  { %4613 = vxpose.xlu2.b32.cont [3/16] (narrow) %v4449_v58, 32  ;;  %v4469_v58 = vadd.f32 %v8635_v51, %v8674_v30  ;;  %v4471_v51 = vadd.f32 %v8639_v29, %v8674_v30 }
 0x942   :  { %4646 = vxpose.xlu1.b32.cont [4/16] (narrow) %v4491_v39, 32  ;;  %v4510_v39 = vpop.f32.mrf.mxu1 }
 0x943   :  { %v4511_v28 = vadd.f32 %v4510_v39, %v8674_v30  ;;  %v4426_v39 = vadd.f32 %v8421_v14, %v8674_v30 }
 0x944   :  { %v3984_v59 = vpop.f32.mrf.mxu2  ;;  %v8713_v7 = vpop.trf.xlu0 }
 0x945   :  { %v4074_v19 = vadd.f32 %v4073_v52, %v3984_v59  ;;  %v4474_v59 = vadd.f32 %v8644_v60, %v8674_v30  ;;  %v4419_v52 = vadd.f32 %v8353_v38, %v8674_v30  ;;  %v3239_v38 = vpop.xlane.xlu2 %3238 }
 0x947   :  { %4614 = vxpose.xlu2.b32.cont [4/16] (narrow) %v4451_v20, 32  ;;  %v9252_v20 = vld [vmem:[#allocation54_spill] sm:$0xff] }
 0x94a   :  { %4647 = vxpose.xlu1.b32.cont [5/16] (narrow) %v4494_v10, 32  ;;  %v4414_v10 = vadd.f32 %v9252_v20, %v8674_v30 }
 0x94c   :  { %v3987_v31 = vpop.f32.mrf.mxu2  ;;  %v8722_v62 = vpop.trf.xlu0 }
 0x94f   :  { %4615 = vxpose.xlu2.b32.cont [5/16] (narrow) %v4454_v53, 32 }
 0x952   :  { %4648 = vxpose.xlu1.b32.cont [6/16] (narrow) %v4496_v0, 32  ;;  %v4083_v0 = vpop.f32.mrf.mxu3 }
 0x954   :  { %v3989_v55 = vpop.f32.mrf.mxu2 }
 0x955   :  { %v4079_v3 = vadd.f32 %v4078_v37, %v3989_v55  ;;  %v4424_v37 = vadd.f32 %v8393_v8, %v8674_v30 }
 0x957   :  { %4616 = vxpose.xlu2.b32.cont [6/16] (narrow) %v4456_v2, 32  ;;  %v5481_v2 = vpop.eup %5480 }
 0x95a   :  { %4649 = vxpose.xlu1.b32.cont [7/16] (narrow) %v4499_v23, 32  ;;  %v4086_v18 = vpop.f32.mrf.mxu3 }
 0x95c   :  { %v8724_v1 = vpop.f32.mrf.mxu2 }
 0x95f   :  { %4617 = vxpose.xlu2.b32.cont [7/16] (narrow) %v4459_v21, 32  ;;  %v4230_v21 = vmul.f32 %v5481_v2, %v4074_v19 }
 0x962   :  { %4650 = vxpose.xlu1.b32.cont [8/16] (narrow) %v4501_v22, 32  ;;  %v4088_v36 = vpop.f32.mrf.mxu3 }
 0x964   :  { %v3994_v53 = vpop.f32.mrf.mxu2 }
 0x965   :  { %4579 = vxpose.xlu0.b32.start [1/16] (narrow) %v4404_v4, 32  ;;  %v9253_v4 = vld [vmem:[#allocation40_spill] sm:$0xff]  ;;  %v4084_v43 = vadd.f32 %v4083_v0, %v3994_v53 }
 0x967   :  { %4618 = vxpose.xlu2.b32.cont [8/16] (narrow) %v4461_v15, 32  ;;  %v4416_v15 = vadd.f32 %v9253_v4, %v8674_v30 }
 0x96a   :  { %4651 = vxpose.xlu1.b32.cont [9/16] (narrow) %v4504_v11, 32  ;;  %v4077_v11 = vadd.f32 %v4076_v45, %v3987_v31  ;;  %v4479_v31 = vadd.f32 %v8653_v48, %v8674_v30  ;;  %v4091_v55 = vpop.f32.mrf.mxu3 }
 0x96c   :  { %v3997_v5 = vpop.f32.mrf.mxu2 }
 0x96d   :  { %4580 = vxpose.xlu0.b32.cont [2/16] (narrow) %v4406_v47, 32 }
 0x96f   :  { %4619 = vxpose.xlu2.b32.cont [9/16] (narrow) %v4464_v46, 32 }
 0x972   :  { %4652 = vxpose.xlu1.b32.cont [10/16] (narrow) %v4506_v63, 32  ;;  %v4093_v8 = vpop.f32.mrf.mxu3 }
 0x974   :  { %v3999_v60 = vpop.f32.mrf.mxu2 }
 0x975   :  { %4581 = vxpose.xlu0.b32.cont [3/16] (narrow) %v4409_v16, 32  ;;  %v4089_v20 = vadd.f32 %v4088_v36, %v3999_v60 }
 0x977   :  { %4620 = vxpose.xlu2.b32.cont [10/16] (narrow) %v4466_v50, 32  ;;  %v4082_v50 = vadd.f32 %v4081_v56, %v8724_v1  ;;  %v3248_v1 = vpop.xlane.xlu2 %3247 }
 0x97a   :  { %4653 = vxpose.xlu1.b32.cont [11/16] (narrow) %v4509_v32, 32  ;;  %v4481_v32 = vadd.f32 %v8657_v34, %v8674_v30  ;;  %v4429_v34 = vadd.f32 %v8446_v12, %v8674_v30  ;;  %v4096_v0 = vpop.f32.mrf.mxu3 }
 0x97c   :  { %v4002_v45 = vpop.f32.mrf.mxu2 }
 0x97d   :  { %4582 = vxpose.xlu0.b32.cont [4/16] (narrow) %v4411_v24, 32 }
 0x97f   :  { %v3227_v57 = vpop.xlane.xlu0 %3226  ;;  %4621 = vxpose.xlu2.b32.cont [11/16] (narrow) %v4469_v58, 32 }
 0x980   :  { %5482 = vrcp.f32 %v3227_v57 }
 0x982   :  { %4654 = vxpose.xlu1.b32.cont [12/16] (narrow) %v4511_v28, 32  ;;  %v4087_v28 = vadd.f32 %v4086_v18, %v3997_v5  ;;  %v4098_v12 = vpop.f32.mrf.mxu3 }
 0x984   :  { %v4004_v57 = vpop.f32.mrf.mxu2 }
 0x985   :  { %4583 = vxpose.xlu0.b32.cont [5/16] (narrow) %v4414_v10, 32  ;;  %v4094_v4 = vadd.f32 %v4093_v8, %v4004_v57 }
 0x986   :  { %v5483_v23 = vpop.eup %5482 }
 0x987   :  { %v4229_v61 = vmul.f32 %v5483_v23, %v4072_v26  ;;  %4622 = vxpose.xlu2.b32.cont [12/16] (narrow) %v4471_v51, 32  ;;  %v3236_v22 = vpop.xlane.xlu0 %3235  ;;  %v4431_v51 = vadd.f32 %v8457_v27, %v8674_v30  ;;  %v3251_v23 = vpop.xlane.xlu1 %3250 }
 0x988   :  { %5484 = vrcp.f32 %v3236_v22  ;;  %v4434_v22 = vadd.f32 %v8479_v54, %v8674_v30 }
 0x989   :  { %v4271_v25 = vpack.c.bf16 %v4230_v21, %v4229_v61  ;;  %5486 = vrcp.f32 %v8555_v35  ;;  %v4421_v35 = vadd.f32 %v8372_v44, %v8674_v30 }
 0x98a   :  { %5488 = vrcp.f32 %v3242_v13 }
 0x98b   :  { %5052 = vmatmul.msk.bf16.gmra.mxu1 %vm725_vm0, %v4271_v25  ;;  %5490 = vrcp.f32 %v3239_v38  ;;  %v4092_v25 = vadd.f32 %v4091_v55, %v4002_v45  ;;  %v4441_v38 = vadd.f32 %v8540_v17, %v8674_v30 }
 0x98c   :  { %v4007_v10 = vpop.f32.mrf.mxu2 }
 0x98d   :  { %4584 = vxpose.xlu0.b32.cont [6/16] (narrow) %v4416_v15, 32 }
 0x98e   :  { %v5485_v29 = vpop.eup %5484 }
 0x98f   :  { %4623 = vxpose.xlu2.b32.cont [13/16] (narrow) %v4474_v59, 32  ;;  %v4232_v47 = vmul.f32 %v5485_v29, %v4079_v3  ;;  %v5487_v46 = vpop.eup %5486  ;;  %v3245_v58 = vpop.xlane.xlu0 %3244 }
 0x990   :  { %v4231_v63 = vmul.f32 %v5487_v46, %v4077_v11  ;;  %v5489_v44 = vpop.eup %5488  ;;  %5492 = vrcp.f32 %v3245_v58  ;;  %v4101_v29 = vpop.f32.mrf.mxu3 }
 0x991   :  { %v4234_v42 = vmul.f32 %v5489_v44, %v4084_v43  ;;  %v5491_v24 = vpop.eup %5490  ;;  %5494 = vrcp.f32 %v3248_v1  ;;  %v3260_v11 = vpop.xlane.xlu1 %3259 }
 0x992   :  { %v4272_v16 = vpack.c.bf16 %v4232_v47, %v4231_v63  ;;  %v4233_v48 = vmul.f32 %v5491_v24, %v4082_v50  ;;  %v3257_v3 = vpop.xlane.xlu2 %3256  ;;  %v4097_v47 = vadd.f32 %v4096_v0, %v4007_v10 }
 0x994   :  { %v4273_v40 = vpack.c.bf16 %v4234_v42, %v4233_v48  ;;  %v4009_v21 = vpop.f32.mrf.mxu2 }
 0x995   :  { %4585 = vxpose.xlu0.b32.cont [7/16] (narrow) %v4419_v52, 32  ;;  %v4436_v52 = vadd.f32 %v8503_v33, %v8674_v30  ;;  %v4099_v54 = vadd.f32 %v4098_v12, %v4009_v21 }
 0x996   :  { %v5493_v56 = vpop.eup %5492 }
 0x997   :  { %4624 = vxpose.xlu2.b32.cont [14/16] (narrow) %v4476_v9, 32  ;;  %v4235_v19 = vmul.f32 %v5493_v56, %v4087_v28  ;;  %v5495_v53 = vpop.eup %5494  ;;  %v3254_v2 = vpop.xlane.xlu0 %3253  ;;  %v4439_v9 = vadd.f32 %v8521_v6, %v8674_v30 }
 0x998   :  { %v4236_v14 = vmul.f32 %v5495_v53, %v4089_v20  ;;  %5496 = vrcp.f32 %v3254_v2  ;;  %v4103_v60 = vpop.f32.mrf.mxu3 }
 0x999   :  { %5498 = vrcp.f32 %v3251_v23  ;;  %v3269_v17 = vpop.xlane.xlu1 %3268 }
 0x99a   :  { %v4274_v26 = vpack.c.bf16 %v4236_v14, %v4235_v19  ;;  %5500 = vrcp.f32 %v3260_v11 }
 0x99b   :  { %5053 = vmatmul.msk.bf16.gmra.mxu1 %vm725_vm0, %v4272_v16  ;;  %5502 = vrcp.f32 %v3257_v3 }
 0x99c   :  { %v4012_v18 = vpop.f32.mrf.mxu2 }
 0x99d   :  { %4586 = vxpose.xlu0.b32.cont [8/16] (narrow) %v4421_v35, 32  ;;  %v4102_v55 = vadd.f32 %v4101_v29, %v4012_v18 }
 0x99e   :  { %v5497_v61 = vpop.eup %5496 }
 0x99f   :  { %4625 = vxpose.xlu2.b32.cont [15/16] (narrow) %v4479_v31, 32  ;;  %v4238_v15 = vmul.f32 %v5497_v61, %v4094_v4  ;;  %v5499_v59 = vpop.eup %5498  ;;  %v3263_v13 = vpop.xlane.xlu0 %3262 }
 0x9a0   :  { %v4237_v5 = vmul.f32 %v5499_v59, %v4092_v25  ;;  %v5501_v63 = vpop.eup %5500  ;;  %5504 = vrcp.f32 %v3263_v13  ;;  %v3266_v31 = vpop.xlane.xlu2 %3265  ;;  %v4563_v59 = vld [vmem:[#allocation5] sm:$0xff] }
 0x9a1   :  { %v4240_v36 = vmul.f32 %v5501_v63, %v4099_v54  ;;  %v5503_v16 = vpop.eup %5502  ;;  %v4106_v6 = vpop.f32.mrf.mxu3  ;;  %5506 = vrcp.f32 %v3266_v31  ;;  %v4565_v54 = vld [vmem:[#allocation5 + $0x10] sm:$0xff] }
 0x9a2   :  { %v4275_v27 = vpack.c.bf16 %v4238_v15, %v4237_v5  ;;  %v4239_v35 = vmul.f32 %v5503_v16, %v4097_v47  ;;  %v3278_v10 = vpop.xlane.xlu1 %3277 }
 0x9a4   :  { %v4014_v46 = vpop.f32.mrf.mxu2  ;;  %v4276_v33 = vpack.c.bf16 %v4240_v36, %v4239_v35 }
 0x9a5   :  { %4587 = vxpose.xlu0.b32.cont [9/16] (narrow) %v4424_v37, 32  ;;  %v4104_v37 = vadd.f32 %v4103_v60, %v4014_v46 }
 0x9a6   :  { %v5505_v45 = vpop.eup %5504 }
 0x9a7   :  { %4626 = vxpose.xlu2.b32.end [16/16] (narrow) %v4481_v32, 32  ;;  %v4241_v50 = vmul.f32 %v5505_v45, %v4102_v55  ;;  %v5507_v44 = vpop.eup %5506  ;;  %v3272_v48 = vpop.xlane.xlu0 %3271 }
 0x9a8   :  { %v4242_v32 = vmul.f32 %v5507_v44, %v4104_v37  ;;  %5508 = vrcp.f32 %v3272_v48  ;;  %v3275_v0 = vpop.xlane.xlu2 %3274  ;;  %v4569_v37 = vld [vmem:[#allocation5 + $0x30] sm:$0xff] }
 0x9a9   :  { %v4108_v24 = vpop.f32.mrf.mxu3  ;;  %5510 = vrcp.f32 %v3269_v17 }
 0x9aa   :  { %5512 = vrcp.f32 %v3278_v10 }
 0x9ab   :  { %5054 = vmatmul.msk.bf16.gmra.mxu1 %vm725_vm0, %v4273_v40  ;;  %v4277_v40 = vpack.c.bf16 %v4242_v32, %v4241_v50  ;;  %5514 = vrcp.f32 %v3275_v0  ;;  %v8782_v32 = vpop.trf.xlu1 }
 0x9ac   :  { %v4017_v43 = vpop.f32.mrf.mxu2 }
 0x9ad   :  { %4588 = vxpose.xlu0.b32.cont [10/16] (narrow) %v4426_v39, 32  ;;  %v4107_v8 = vadd.f32 %v4106_v6, %v4017_v43 }
 0x9ae   :  { %v5509_v39 = vpop.eup %5508 }
 0x9af   :  { %v3281_v2 = vpop.xlane.xlu0 %3280 }
 0x9b0   :  { %5516 = vrcp.f32 %v3281_v2 }
 0x9b1   :  { %v4111_v57 = vpop.f32.mrf.mxu3 }
 0x9b3   :  { %v8786_v17 = vpop.trf.xlu1 }
 0x9b4   :  { %v4019_v42 = vpop.f32.mrf.mxu2 }
 0x9b5   :  { %4589 = vxpose.xlu0.b32.cont [11/16] (narrow) %v4429_v34, 32  ;;  %v4109_v1 = vadd.f32 %v4108_v24, %v4019_v42  ;;  %v5511_v34 = vpop.eup %5510 }
 0x9b6   :  { %v4243_v28 = vmul.f32 %v5511_v34, %v4107_v8 }
 0x9b7   :  { %v4244_v56 = vmul.f32 %v5509_v39, %v4109_v1 }
 0x9b9   :  { %v4278_v20 = vpack.c.bf16 %v4244_v56, %v4243_v28  ;;  %v4113_v53 = vpop.f32.mrf.mxu3 }
 0x9bb   :  { %5055 = vmatmul.msk.bf16.gmra.mxu1 %vm725_vm0, %v4274_v26 }
 0x9bc   :  { %v4022_v58 = vpop.f32.mrf.mxu2 }
 0x9bd   :  { %4590 = vxpose.xlu0.b32.cont [12/16] (narrow) %v4431_v51, 32  ;;  %v4112_v26 = vadd.f32 %v4111_v57, %v4022_v58  ;;  %v5513_v51 = vpop.eup %5512  ;;  %v8789_v57 = vpop.trf.xlu1 }
 0x9be   :  { %v5515_v12 = vpop.eup %5514 }
 0x9bf   :  { %v5517_v47 = vpop.eup %5516 }
 0x9c1   :  { %v4116_v61 = vpop.f32.mrf.mxu3 }
 0x9c4   :  { %v4024_v19 = vpop.f32.mrf.mxu2 }
 0x9c5   :  { %4591 = vxpose.xlu0.b32.cont [13/16] (narrow) %v4434_v22, 32  ;;  %v4114_v14 = vadd.f32 %v4113_v53, %v4024_v19  ;;  %v4245_v22 = vmul.f32 %v5515_v12, %v4112_v26  ;;  %v8792_v56 = vpop.trf.xlu1 }
 0x9c7   :  { %v4246_v23 = vmul.f32 %v5513_v51, %v4114_v14 }
 0x9c9   :  { %v4279_v4 = vpack.c.bf16 %v4246_v23, %v4245_v22 }
 0x9cb   :  { %5056 = vmatmul.msk.bf16.gmra.mxu1 %vm725_vm0, %v4275_v27  ;;  %v3284_v27 = vpop.xlane.xlu2 %3283 }
 0x9cc   :  { %v4027_v21 = vpop.f32.mrf.mxu2  ;;  %5518 = vrcp.f32 %v3284_v27 }
 0x9cd   :  { %4592 = vxpose.xlu0.b32.cont [14/16] (narrow) %v4436_v52, 32  ;;  %v4118_v52 = vpop.f32.mrf.mxu3  ;;  %v4117_v63 = vadd.f32 %v4116_v61, %v4027_v21 }
 0x9cf   :  { %v4247_v36 = vmul.f32 %v5517_v47, %v4117_v63 }
 0x9d2   :  { %v5519_v16 = vpop.eup %5518 }
 0x9d4   :  { %v4029_v29 = vpop.f32.mrf.mxu2 }
 0x9d5   :  { %4593 = vxpose.xlu0.b32.cont [15/16] (narrow) %v4439_v9, 32  ;;  %v4119_v60 = vadd.f32 %v4118_v52, %v4029_v29 }
 0x9d7   :  { %v4248_v35 = vmul.f32 %v5519_v16, %v4119_v60 }
 0x9d9   :  { %v4280_v43 = vpack.c.bf16 %v4248_v35, %v4247_v36 }
 0x9db   :  { %5057 = vmatmul.msk.bf16.gmra.mxu1 %vm725_vm0, %v4276_v33 }
 0x9dd   :  { %4594 = vxpose.xlu0.b32.end [16/16] (narrow) %v4441_v38, 32  ;;  %v4567_v38 = vld [vmem:[#allocation5 + $0x20] sm:$0xff] }
 0x9eb   :  { %5058 = vmatmul.msk.bf16.gmra.mxu1 %vm725_vm0, %v4277_v40 }
 0x9fb   :  { %5059 = vmatmul.msk.bf16.gmra.mxu1 %vm725_vm0, %v4278_v20 }
 0xa08   :  { %v4513_v25 = vpop.f32.mrf.mxu1 }
 0xa09   :  { %v4514_v15 = vadd.f32 %v4513_v25, %v8674_v30  ;;  %v4595_v5 = vpop.trf.xlu0 }
 0xa0a   :  { %v4707_v18 = vadd.f32 %v4595_v5, %v4563_v59  ;;  %v1332_v59 = vpop.trf.xlu2 }
 0xa0b   :  { %4655 = vxpose.xlu1.b32.cont [13/16] (narrow) %v4514_v15, 32  ;;  %5060 = vmatmul.msk.bf16.gmra.mxu1 %vm725_vm0, %v4279_v4 }
 0xa0c   :  { %4723 = vst [vmem:[#allocation5] sm:$0xff] %v4707_v18 }
 0xa10   :  { %v4515_v11 = vpop.f32.mrf.mxu1 }
 0xa11   :  { %v4516_v3 = vadd.f32 %v4515_v11, %v8674_v30  ;;  %v4596_v9 = vpop.trf.xlu0 }
 0xa12   :  { %v4709_v46 = vadd.f32 %v4596_v9, %v4565_v54  ;;  %v1333_v27 = vpop.trf.xlu2 }
 0xa13   :  { %4656 = vxpose.xlu1.b32.cont [14/16] (narrow) %v4516_v3, 32 }
 0xa14   :  { %4725 = vst [vmem:[#allocation5 + $0x10] sm:$0xff] %v4709_v46 }
 0xa18   :  { %v4518_v33 = vpop.f32.mrf.mxu1 }
 0xa19   :  { %v4519_v13 = vadd.f32 %v4518_v33, %v8674_v30  ;;  %v4597_v31 = vpop.trf.xlu0 }
 0xa1a   :  { %v4711_v6 = vadd.f32 %v4597_v31, %v4567_v38  ;;  %v1334_v52 = vpop.trf.xlu2 }
 0xa1b   :  { %4657 = vxpose.xlu1.b32.cont [15/16] (narrow) %v4519_v13, 32  ;;  %5061 = vmatmul.msk.bf16.gmra.mxu1 %vm725_vm0, %v4280_v43 }
 0xa1c   :  { %4727 = vst [vmem:[#allocation5 + $0x20] sm:$0xff] %v4711_v6 }
 0xa20   :  { %v4520_v45 = vpop.f32.mrf.mxu1 }
 0xa21   :  { %v4521_v55 = vadd.f32 %v4520_v45, %v8674_v30  ;;  %v4598_v50 = vpop.trf.xlu0 }
 0xa22   :  { %v4713_v44 = vadd.f32 %v4598_v50, %v4569_v37  ;;  %v1335_v54 = vpop.trf.xlu2 }
 0xa23   :  { %4658 = vxpose.xlu1.b32.end [16/16] (narrow) %v4521_v55, 32 }
 0xa24   :  { %4729 = vst [vmem:[#allocation5 + $0x30] sm:$0xff] %v4713_v44 }
 0xa28   :  { %v4523_v42 = vpop.f32.mrf.mxu1 }
 0xa29   :  { %v4524_v24 = vadd.f32 %v4523_v42, %v8674_v30 }
 0xa2a   :  { %v4627_v46 = vpop.trf.xlu2 }
 0xa2b   :  { %4675 = vxpose.xlu0.b32.start [1/16] (narrow) %v4524_v24, 32  ;;  %v4708_v63 = vadd.f32 %v4627_v46, %v8782_v32 }
 0xa2d   :  { %4724 = vst [vmem:[#allocation5 + $0x8] sm:$0xff] %v4708_v63 }
 0xa30   :  { %v4525_v48 = vpop.f32.mrf.mxu1 }
 0xa31   :  { %v4526_v40 = vadd.f32 %v4525_v48, %v8674_v30 }
 0xa32   :  { %v4628_v16 = vpop.trf.xlu2 }
 0xa33   :  { %4676 = vxpose.xlu0.b32.cont [2/16] (narrow) %v4526_v40, 32  ;;  %v4710_v35 = vadd.f32 %v4628_v16, %v8786_v17 }
 0xa35   :  { %4726 = vst [vmem:[#allocation5 + $0x18] sm:$0xff] %v4710_v35 }
 0xa38   :  { %v4528_v58 = vpop.f32.mrf.mxu1 }
 0xa39   :  { %v4529_v39 = vadd.f32 %v4528_v58, %v8674_v30 }
 0xa3a   :  { %v4629_v33 = vpop.trf.xlu2 }
 0xa3b   :  { %4677 = vxpose.xlu0.b32.cont [3/16] (narrow) %v4529_v39, 32  ;;  %v4712_v13 = vadd.f32 %v4629_v33, %v8789_v57 }
 0xa3d   :  { %4728 = vst [vmem:[#allocation5 + $0x28] sm:$0xff] %v4712_v13 }
 0xa40   :  { %v4530_v8 = vpop.f32.mrf.mxu1 }
 0xa41   :  { %v4531_v1 = vadd.f32 %v4530_v8, %v8674_v30 }
 0xa42   :  { %v4630_v38 = vpop.trf.xlu2 }
 0xa43   :  { %4678 = vxpose.xlu0.b32.cont [4/16] (narrow) %v4531_v1, 32  ;;  %v4714_v31 = vadd.f32 %v4630_v38, %v8792_v56 }
 0xa45   :  { %4730 = vst [vmem:[#allocation5 + $0x38] sm:$0xff] %v4714_v31 }
 0xa48   :  { %v4533_v34 = vpop.f32.mrf.mxu1 }
 0xa49   :  { %v4534_v28 = vadd.f32 %v4533_v34, %v8674_v30 }
 0xa4b   :  { %4679 = vxpose.xlu0.b32.cont [5/16] (narrow) %v4534_v28, 32 }
 0xa4f   :  { %v4659_v20 = vpop.trf.xlu1 }
 0xa50   :  { %v4715_v10 = vadd.f32 %v4659_v20, %v8698_v41  ;;  %v4535_v19 = vpop.f32.mrf.mxu1 }
 0xa51   :  { %v4536_v53 = vadd.f32 %v4535_v19, %v8674_v30 }
 0xa52   :  { %4731 = vst [vmem:[#allocation5 + $0x40] sm:$0xff] %v4715_v10 }
 0xa53   :  { %4680 = vxpose.xlu0.b32.cont [6/16] (narrow) %v4536_v53, 32 }
 0xa57   :  { %v4660_v0 = vpop.trf.xlu1 }
 0xa58   :  { %v4717_v14 = vadd.f32 %v4660_v0, %v8704_v49  ;;  %v4538_v2 = vpop.f32.mrf.mxu1 }
 0xa59   :  { %v4539_v26 = vadd.f32 %v4538_v2, %v8674_v30 }
 0xa5a   :  { %4733 = vst [vmem:[#allocation5 + $0x50] sm:$0xff] %v4717_v14 }
 0xa5b   :  { %4681 = vxpose.xlu0.b32.cont [7/16] (narrow) %v4539_v26, 32 }
 0xa5f   :  { %v4661_v51 = vpop.trf.xlu1 }
 0xa60   :  { %v4719_v23 = vadd.f32 %v4661_v51, %v8713_v7  ;;  %v4540_v21 = vpop.f32.mrf.mxu1 }
 0xa61   :  { %v4541_v12 = vadd.f32 %v4540_v21, %v8674_v30 }
 0xa62   :  { %4735 = vst [vmem:[#allocation5 + $0x60] sm:$0xff] %v4719_v23 }
 0xa63   :  { %4682 = vxpose.xlu0.b32.cont [8/16] (narrow) %v4541_v12, 32 }
 0xa67   :  { %v4662_v41 = vpop.trf.xlu1 }
 0xa68   :  { %v4721_v61 = vadd.f32 %v4662_v41, %v8722_v62  ;;  %v4543_v22 = vpop.f32.mrf.mxu1 }
 0xa69   :  { %v4544_v25 = vadd.f32 %v4543_v22, %v8674_v30 }
 0xa6a   :  { %4737 = vst [vmem:[#allocation5 + $0x70] sm:$0xff] %v4721_v61 }
 0xa6b   :  { %4683 = vxpose.xlu0.b32.cont [9/16] (narrow) %v4544_v25, 32 }
 0xa70   :  { %v4545_v49 = vpop.f32.mrf.mxu1 }
 0xa71   :  { %v4546_v4 = vadd.f32 %v4545_v49, %v8674_v30 }
 0xa73   :  { %4684 = vxpose.xlu0.b32.cont [10/16] (narrow) %v4546_v4, 32 }
 0xa78   :  { %v4548_v15 = vpop.f32.mrf.mxu1 }
 0xa79   :  { %v4549_v7 = vadd.f32 %v4548_v15, %v8674_v30 }
 0xa7b   :  { %4685 = vxpose.xlu0.b32.cont [11/16] (narrow) %v4549_v7, 32 }
 0xa80   :  { %v4550_v5 = vpop.f32.mrf.mxu1 }
 0xa81   :  { %v4551_v18 = vadd.f32 %v4550_v5, %v8674_v30 }
 0xa83   :  { %4686 = vxpose.xlu0.b32.cont [12/16] (narrow) %v4551_v18, 32 }
 0xa88   :  { %v4553_v62 = vpop.f32.mrf.mxu1 }
 0xa89   :  { %v4554_v29 = vadd.f32 %v4553_v62, %v8674_v30 }
 0xa8b   :  { %4687 = vxpose.xlu0.b32.cont [13/16] (narrow) %v4554_v29, 32 }
 0xa90   :  { %v4555_v11 = vpop.f32.mrf.mxu1 }
 0xa91   :  { %v4556_v3 = vadd.f32 %v4555_v11, %v8674_v30 }
 0xa93   :  { %4688 = vxpose.xlu0.b32.cont [14/16] (narrow) %v4556_v3, 32 }
 0xa98   :  { %v4558_v9 = vpop.f32.mrf.mxu1 }
 0xa99   :  { %v4559_v47 = vadd.f32 %v4558_v9, %v8674_v30 }
 0xa9b   :  { %4689 = vxpose.xlu0.b32.cont [15/16] (narrow) %v4559_v47, 32 }
 0xaa0   :  { %v4560_v60 = vpop.f32.mrf.mxu1 }
 0xaa1   :  { %v4561_v36 = vadd.f32 %v4560_v60, %v8674_v30 }
 0xaa3   :  { %4690 = vxpose.xlu0.b32.end [16/16] (narrow) %v4561_v36, 32 }
 0xacf   :  { %v4691_v43 = vpop.trf.xlu0 }
 0xad0   :  { %v4716_v6 = vadd.f32 %v4691_v43, %v1332_v59 }
 0xad2   :  { %4732 = vst [vmem:[#allocation5 + $0x48] sm:$0xff] %v4716_v6 }
 0xad7   :  { %v4692_v45 = vpop.trf.xlu0 }
 0xad8   :  { %v4718_v55 = vadd.f32 %v4692_v45, %v1333_v27 }
 0xada   :  { %4734 = vst [vmem:[#allocation5 + $0x58] sm:$0xff] %v4718_v55 }
 0xadf   :  { %v4693_v30 = vpop.trf.xlu0 }
 0xae0   :  { %v4720_v37 = vadd.f32 %v4693_v30, %v1334_v52 }
 0xae2   :  { %4736 = vst [vmem:[#allocation5 + $0x68] sm:$0xff] %v4720_v37 }
 0xae7   :  { %v4694_v50 = vpop.trf.xlu0 }
 0xae8   :  { %v4722_v44 = vadd.f32 %v4694_v50, %v1335_v54 }
 0xaea   :  { %4738 = vst [vmem:[#allocation5 + $0x78] sm:$0xff] %v4722_v44 }
 0xaeb   :  { %4751 = dma.vmem_to_hbm [thread:$0]  %s4744_s0, 2048, %s4746_s10, [#allocation4], %s5579_s11, %s5579_s11, %s5580_s12  }
 0xaec   :  { %5572 = dma.done.wait [#allocation4], 2048  }
 0xaed   :  { %5573 = vsyncadd [#allocation4], 4294965248 }
 0xaee   :  { %4756 = vsyncpa [#allocation3], 1 }
 0xaef   :  { %4757 = vsyncpa [#allocation4], 1 }

</bundles_post_ra>
